<compile_context>
chip_gen: v6e
topology: v6e:2x2x1
jax: 0.10.0
libtpu: 0.0.40
codegen_flags: <defaults>
</compile_context>

<pallas_src>
import math
from functools import partial

import jax
import jax.numpy as jnp
from jax import lax
from jax.experimental import pallas as pl
from jax.experimental.pallas import tpu as pltpu

# ------------------------- small, module-consistent config -------------------------
D_MODEL = 32          # stands in for 512
NHEAD = 4             # stands in for 8
HEAD_DIM = D_MODEL // NHEAD
NUM_LAYERS = 2        # stands in for 6
DIM_FF = 64           # stands in for 2048
SRC_VOCAB = 96        # stands in for bert-base-multilingual-cased vocab
TGT_VOCAB = 128       # stands in for bert-base-cased vocab (kept a multiple of 128 lanes)
MAX_LEN = 64
LN_EPS = 1e-5
ATTN_SCALE = 1.0 / math.sqrt(HEAD_DIM)

# MXU operand dtype: bf16 keeps the MXU at full rate on v6e/v7x (accumulation stays f32 via
# preferred_element_type) and halves weight DMA bytes.  All LayerNorm / softmax / ReLU math
# stays f32.  Set to jnp.float32 for bit-closer parity with the f32 PyTorch reference.
MXU_DTYPE = jnp.bfloat16

VMEM = pl.BlockSpec(memory_space=pltpu.MemorySpace.VMEM)

# TODO(synk): dropout(p=0.1) is stochastic at train time; implemented as identity (eval mode).
# TODO(synk): all masks are None in the reference forward call; attention masking not implemented.
# TODO(synk): at real sizes (D=512, FF=2048, vocab ~30k-120k) the "whole array in VMEM, no grid"
#             specs must become tiled BlockSpecs (tile M and the vocab/N dims, K resident) with
#             "parallel" grid axes so v7x's 2 TensorCores are used and its 64 MiB VMEM holds.


# --------------------------- in-kernel helper functions ------------------------------
def _proj(x, w, b):
    """(M, K) f32 @ (K, N) MXU_DTYPE weight + (1, N) f32 bias -> (M, N) f32 (f32 accumulate)."""
    return jnp.dot(x.astype(w.dtype), w, preferred_element_type=jnp.float32) + b


def _layernorm(x, g, b):
    """LayerNorm over last dim, PyTorch semantics (biased variance), f32 math."""
    mean = jnp.mean(x, axis=-1, keepdims=True)
    c = x - mean
    var = jnp.mean(c * c, axis=-1, keepdims=True)
    return c * lax.rsqrt(var + LN_EPS) * g + b


def _split_heads(x2d, seq, n_batch):
    """(n_batch*seq, D) -> (NHEAD*n_batch, seq, HEAD_DIM)  (head-major, batch-minor)."""
    x3 = x2d.reshape(n_batch, seq, D_MODEL)
    return jnp.concatenate(
        [x3[:, :, h * HEAD_DIM:(h + 1) * HEAD_DIM] for h in range(NHEAD)], axis=0)


def _merge_heads(o, seq, n_batch):
    """(NHEAD*n_batch, seq, HEAD_DIM) -> (n_batch*seq, D)."""
    merged = jnp.concatenate(
        [o[h * n_batch:(h + 1) * n_batch] for h in range(NHEAD)], axis=-1)
    return merged.reshape(n_batch * seq, D_MODEL)


def _sdpa(q, k, v):
    """Scaled-dot-product attention over ALL (batch*head) slices in one batched dot.
    q: (B, Lq, dh), k/v: (B, Lk, dh) -> (B, Lq, dh), f32."""
    # contract on the last axes of q and k (no explicit K transpose / relayout)
    s = lax.dot_general(q, k, (((2,), (2,)), ((0,), (0,))),
                        preferred_element_type=jnp.float32) * ATTN_SCALE
    s = s - jnp.max(s, axis=-1, keepdims=True)
    p = jnp.exp(s)
    # exact reciprocal; flip approx=True to move the divide onto the EUP (~1e-3 rel err)
    p = p * pl.reciprocal(jnp.sum(p, axis=-1, keepdims=True), approx=False)
    return lax.dot_general(p, v, (((2,), (1,)), ((0,), (0,))),
                           preferred_element_type=jnp.float32)


# ------------------------------- fused layer kernels ---------------------------------
def _encoder_layer_kernel(x_ref, qkvw_ref, qkvb_ref, ow_ref, ob_ref,
                          f1w_ref, f1b_ref, f2w_ref, f2b_ref,
                          g1_ref, b1_ref, g2_ref, b2_ref,
                          o_ref, *, n_batch):
    m, d = x_ref.shape
    seq = m // n_batch
    x = x_ref[...]

    # ---- self-attention: fused QKV projection (one (M, D) x (D, 3D) matmul) ----
    qkv = _proj(x, qkvw_ref[...], qkvb_ref[...])                       # (M, 3D)
    q = _split_heads(qkv[:, 0 * d:1 * d], seq, n_batch)
    k = _split_heads(qkv[:, 1 * d:2 * d], seq, n_batch)
    v = _split_heads(qkv[:, 2 * d:3 * d], seq, n_batch)
    ctx = _merge_heads(_sdpa(q, k, v), seq, n_batch)                   # (M, D)
    attn = _proj(ctx, ow_ref[...], ob_ref[...])
    x = _layernorm(x + attn, g1_ref[...], b1_ref[...])

    # ---- feed-forward: ff1 + ReLU + ff2, fused ----
    h = jnp.maximum(_proj(x, f1w_ref[...], f1b_ref[...]), 0.0)
    ff = _proj(h, f2w_ref[...], f2b_ref[...])
    x = _layernorm(x + ff, g2_ref[...], b2_ref[...])

    o_ref[...] = x.astype(o_ref.dtype)


def _decoder_layer_kernel(y_ref, m_ref,
                          sqkvw_ref, sqkvb_ref, sow_ref, sob_ref,
                          cqw_ref, cqb_ref, ckvw_ref, ckvb_ref, cow_ref, cob_ref,
                          f1w_ref, f1b_ref, f2w_ref, f2b_ref,
                          g1_ref, b1_ref, g2_ref, b2_ref, g3_ref, b3_ref,
                          o_ref, *, n_batch):
    mt, d = y_ref.shape
    ms = m_ref.shape[0]
    t = mt // n_batch
    s = ms // n_batch
    y = y_ref[...]
    mem = m_ref[...]

    # ---- decoder self-attention (tgt_mask=None in the reference forward) ----
    qkv = _proj(y, sqkvw_ref[...], sqkvb_ref[...])                     # (Mt, 3D)
    q = _split_heads(qkv[:, 0 * d:1 * d], t, n_batch)
    k = _split_heads(qkv[:, 1 * d:2 * d], t, n_batch)
    v = _split_heads(qkv[:, 2 * d:3 * d], t, n_batch)
    sa = _merge_heads(_sdpa(q, k, v), t, n_batch)
    sa = _proj(sa, sow_ref[...], sob_ref[...])
    y = _layernorm(y + sa, g1_ref[...], b1_ref[...])

    # ---- cross-attention: queries from decoder, fused K/V projection of encoder memory ----
    cq = _proj(y, cqw_ref[...], cqb_ref[...])                          # (Mt, D)
    ckv = _proj(mem, ckvw_ref[...], ckvb_ref[...])                     # (Ms, 2D)
    q = _split_heads(cq, t, n_batch)
    k = _split_heads(ckv[:, 0 * d:1 * d], s, n_batch)
    v = _split_heads(ckv[:, 1 * d:2 * d], s, n_batch)
    ca = _merge_heads(_sdpa(q, k, v), t, n_batch)
    ca = _proj(ca, cow_ref[...], cob_ref[...])
    y = _layernorm(y + ca, g2_ref[...], b2_ref[...])

    # ---- feed-forward ----
    h = jnp.maximum(_proj(y, f1w_ref[...], f1b_ref[...]), 0.0)
    ff = _proj(h, f2w_ref[...], f2b_ref[...])
    y = _layernorm(y + ff, g3_ref[...], b3_ref[...])

    o_ref[...] = y.astype(o_ref.dtype)


def _layernorm_kernel(x_ref, g_ref, b_ref, o_ref):
    o_ref[...] = _layernorm(x_ref[...], g_ref[...], b_ref[...]).astype(o_ref.dtype)


def _final_norm_fc_kernel(y_ref, g_ref, b_ref, w_ref, wb_ref, o_ref):
    y = _layernorm(y_ref[...], g_ref[...], b_ref[...])
    o_ref[...] = (jnp.dot(y.astype(w_ref.dtype), w_ref[...],
                          preferred_element_type=jnp.float32)
                  + wb_ref[...]).astype(o_ref.dtype)


# ------------------------------- pallas_call wrappers ---------------------------------
def encoder_layer(x2d, p, n_batch):
    m, d = x2d.shape
    return pl.pallas_call(
        partial(_encoder_layer_kernel, n_batch=n_batch),
        out_shape=jax.ShapeDtypeStruct((m, d), jnp.float32),
        in_specs=[VMEM] * 13,
        out_specs=VMEM,
    )(x2d, p["qkv_w"], p["qkv_b"], p["out_w"], p["out_b"],
      p["ff1_w"], p["ff1_b"], p["ff2_w"], p["ff2_b"],
      p["ln1_g"], p["ln1_b"], p["ln2_g"], p["ln2_b"])


def decoder_layer(y2d, mem2d, p, n_batch):
    m, d = y2d.shape
    return pl.pallas_call(
        partial(_decoder_layer_kernel, n_batch=n_batch),
        out_shape=jax.ShapeDtypeStruct((m, d), jnp.float32),
        in_specs=[VMEM] * 22,
        out_specs=VMEM,
    )(y2d, mem2d,
      p["qkv_w"], p["qkv_b"], p["out_w"], p["out_b"],
      p["cq_w"], p["cq_b"], p["ckv_w"], p["ckv_b"], p["cout_w"], p["cout_b"],
      p["ff1_w"], p["ff1_b"], p["ff2_w"], p["ff2_b"],
      p["ln1_g"], p["ln1_b"], p["ln2_g"], p["ln2_b"], p["ln3_g"], p["ln3_b"])


def layernorm(x2d, gamma, beta):
    m, d = x2d.shape
    return pl.pallas_call(
        _layernorm_kernel,
        out_shape=jax.ShapeDtypeStruct((m, d), jnp.float32),
        in_specs=[VMEM] * 3,
        out_specs=VMEM,
    )(x2d, gamma, beta)


def final_norm_fc(y2d, gamma, beta, w, b):
    m, _ = y2d.shape
    v = w.shape[1]
    return pl.pallas_call(
        _final_norm_fc_kernel,
        out_shape=jax.ShapeDtypeStruct((m, v), jnp.float32),
        in_specs=[VMEM] * 5,
        out_specs=VMEM,
    )(y2d, gamma, beta, w, b)


# ------------------------------- model glue (plain JAX) --------------------------------
def positional_encoding(max_len, d_model):
    pos = jnp.arange(max_len, dtype=jnp.float32)[:, None]
    div = jnp.exp(jnp.arange(0, d_model, 2, dtype=jnp.float32)
                  * (-math.log(10000.0) / d_model))
    pe = jnp.zeros((max_len, d_model), jnp.float32)
    pe = pe.at[:, 0::2].set(jnp.sin(pos * div))
    pe = pe.at[:, 1::2].set(jnp.cos(pos * div))
    return pe


def transformer_forward(params, src, tgt):
    # src: (S, N) int32, tgt: (T, N) int32  ->  logits (T, N, TGT_VOCAB)
    s, n_batch = src.shape
    t, _ = tgt.shape
    pe = params["pe"]

    # embedding gather + positional encoding (glue)
    x = params["enc_emb"][src] + pe[:s][:, None, :]      # (S, N, D)
    y = params["dec_emb"][tgt] + pe[:t][:, None, :]      # (T, N, D)

    # batch-major 2D layout for the fused kernels: row = n * seq + position
    x2 = x.transpose(1, 0, 2).reshape(n_batch * s, D_MODEL)
    y2 = y.transpose(1, 0, 2).reshape(n_batch * t, D_MODEL)

    # encoder stack + final encoder norm (LN-only kernel; no fake zero residual)
    for lp in params["enc_layers"]:
        x2 = encoder_layer(x2, lp, n_batch)
    mem = layernorm(x2, params["enc_norm_g"], params["enc_norm_b"])

    # decoder stack + fused (final decoder norm + vocab projection); lane-dense (128) output
    for lp in params["dec_layers"]:
        y2 = decoder_layer(y2, mem, lp, n_batch)
    logits = final_norm_fc(y2, params["dec_norm_g"], params["dec_norm_b"],
                           params["fc_w"], params["fc_b"])           # (N*T, V)

    return logits.reshape(n_batch, t, TGT_VOCAB).transpose(1, 0, 2)  # (T, N, V)


# ------------------------------- parameter init -------------------------------------
def init_params(key):
    keys = iter(jax.random.split(key, 512))

    def nrm(shape, scale=0.02, dtype=jnp.float32):
        return (jax.random.normal(next(keys), shape, jnp.float32) * scale).astype(dtype)

    def zeros(shape):
        return jnp.zeros(shape, jnp.float32)

    def ones(shape):
        return jnp.ones(shape, jnp.float32)

    def attn_self():
        return {
            "qkv_w": nrm((D_MODEL, 3 * D_MODEL), dtype=MXU_DTYPE),   # = in_proj_weight.T
            "qkv_b": zeros((1, 3 * D_MODEL)),
            "out_w": nrm((D_MODEL, D_MODEL), dtype=MXU_DTYPE),       # = out_proj.weight.T
            "out_b": zeros((1, D_MODEL)),
        }

    def ffn_ln():
        return {
            "ff1_w": nrm((D_MODEL, DIM_FF), dtype=MXU_DTYPE), "ff1_b": zeros((1, DIM_FF)),
            "ff2_w": nrm((DIM_FF, D_MODEL), dtype=MXU_DTYPE), "ff2_b": zeros((1, D_MODEL)),
            "ln1_g": ones((1, D_MODEL)), "ln1_b": zeros((1, D_MODEL)),
            "ln2_g": ones((1, D_MODEL)), "ln2_b": zeros((1, D_MODEL)),
        }

    def enc_layer_params():
        p = attn_self()
        p.update(ffn_ln())
        return p

    def dec_layer_params():
        p = attn_self()
        p.update(ffn_ln())
        # cross-attention: q-projection (decoder side) and fused k/v-projection (memory side)
        p.update({
            "cq_w": nrm((D_MODEL, D_MODEL), dtype=MXU_DTYPE), "cq_b": zeros((1, D_MODEL)),
            "ckv_w": nrm((D_MODEL, 2 * D_MODEL), dtype=MXU_DTYPE),
            "ckv_b": zeros((1, 2 * D_MODEL)),
            "cout_w": nrm((D_MODEL, D_MODEL), dtype=MXU_DTYPE), "cout_b": zeros((1, D_MODEL)),
            "ln3_g": ones((1, D_MODEL)), "ln3_b": zeros((1, D_MODEL)),
        })
        return p

    return {
        "enc_emb": nrm((SRC_VOCAB, D_MODEL), 1.0),
        "dec_emb": nrm((TGT_VOCAB, D_MODEL), 1.0),
        "pe": positional_encoding(MAX_LEN, D_MODEL),
        "enc_layers": [enc_layer_params() for _ in range(NUM_LAYERS)],
        "dec_layers": [dec_layer_params() for _ in range(NUM_LAYERS)],
        "enc_norm_g": ones((1, D_MODEL)), "enc_norm_b": zeros((1, D_MODEL)),
        "dec_norm_g": ones((1, D_MODEL)), "dec_norm_b": zeros((1, D_MODEL)),
        "fc_w": nrm((D_MODEL, TGT_VOCAB), dtype=MXU_DTYPE),          # = fc.weight.T
        "fc_b": zeros((1, TGT_VOCAB)),
    }


# ----------------------------------- main --------------------------------------------
if __name__ == "__main__":
    key = jax.random.PRNGKey(0)
    pkey, skey, tkey = jax.random.split(key, 3)
    params = init_params(pkey)

    S, T, Nb = 8, 8, 2   # (seq, batch) token-id layout
    src = jax.random.randint(skey, (S, Nb), 0, SRC_VOCAB, dtype=jnp.int32)
    tgt = jax.random.randint(tkey, (T, Nb), 0, TGT_VOCAB, dtype=jnp.int32)

    logits = jax.jit(transformer_forward)(params, src, tgt)
    jax.block_until_ready(logits)

    assert logits.shape == (T, Nb, TGT_VOCAB), logits.shape
    assert bool(jnp.all(jnp.isfinite(logits)))
    print("KERNEL_OK")
</pallas_src>

<mosaic_0001>
module attributes {stable_mosaic.version = 11 : i64} {
  func.func @_encoder_layer_kernel(%arg0: memref<16x32xf32, #tpu.memory_space<vmem>>, %arg1: memref<32x96xbf16, #tpu.memory_space<vmem>>, %arg2: memref<1x96xf32, #tpu.memory_space<vmem>>, %arg3: memref<32x32xbf16, #tpu.memory_space<vmem>>, %arg4: memref<1x32xf32, #tpu.memory_space<vmem>>, %arg5: memref<32x64xbf16, #tpu.memory_space<vmem>>, %arg6: memref<1x64xf32, #tpu.memory_space<vmem>>, %arg7: memref<64x32xbf16, #tpu.memory_space<vmem>>, %arg8: memref<1x32xf32, #tpu.memory_space<vmem>>, %arg9: memref<1x32xf32, #tpu.memory_space<vmem>>, %arg10: memref<1x32xf32, #tpu.memory_space<vmem>>, %arg11: memref<1x32xf32, #tpu.memory_space<vmem>>, %arg12: memref<1x32xf32, #tpu.memory_space<vmem>>, %arg13: memref<16x32xf32, #tpu.memory_space<vmem>>) attributes {dimension_semantics = [], scalar_prefetch = 0 : i64, scratch_operands = 0 : i64, tpu.core_type = #tpu.core_type<tc>} {
    %c0 = arith.constant 0 : index
    %c0_0 = arith.constant 0 : index
    %0 = vector.load %arg0[%c0, %c0_0] : memref<16x32xf32, #tpu.memory_space<vmem>>, vector<16x32xf32>
    %c0_1 = arith.constant 0 : index
    %c0_2 = arith.constant 0 : index
    %1 = vector.load %arg1[%c0_1, %c0_2] : memref<32x96xbf16, #tpu.memory_space<vmem>>, vector<32x96xbf16>
    %c0_3 = arith.constant 0 : index
    %c0_4 = arith.constant 0 : index
    %2 = vector.load %arg2[%c0_3, %c0_4] : memref<1x96xf32, #tpu.memory_space<vmem>>, vector<1x96xf32>
    %3 = arith.truncf %0 : vector<16x32xf32> to vector<16x32xbf16>
    %cst = arith.constant dense<0.000000e+00> : vector<16x96xf32>
    %4 = tpu.matmul %3, %1, %cst {dimension_numbers = #tpu.dot_dimension_numbers<[1], [0], [0], [1], [0, 0, 1, 1], [], []>} : vector<16x32xbf16>, vector<32x96xbf16>, vector<16x96xf32> -> vector<16x96xf32>
    %5 = vector.broadcast %2 : vector<1x96xf32> to vector<16x96xf32>
    %6 = arith.addf %4, %5 : vector<16x96xf32>
    %7 = vector.extract_strided_slice %6 {offsets = [0, 0], sizes = [16, 32], strides = [1, 1]} : vector<16x96xf32> to vector<16x32xf32>
    %8 = vector.shape_cast %7 : vector<16x32xf32> to vector<2x8x32xf32>
    %9 = vector.extract_strided_slice %8 {offsets = [0, 0, 0], sizes = [2, 8, 8], strides = [1, 1, 1]} : vector<2x8x32xf32> to vector<2x8x8xf32>
    %10 = vector.extract_strided_slice %8 {offsets = [0, 0, 8], sizes = [2, 8, 8], strides = [1, 1, 1]} : vector<2x8x32xf32> to vector<2x8x8xf32>
    %11 = vector.extract_strided_slice %8 {offsets = [0, 0, 16], sizes = [2, 8, 8], strides = [1, 1, 1]} : vector<2x8x32xf32> to vector<2x8x8xf32>
    %12 = vector.extract_strided_slice %8 {offsets = [0, 0, 24], sizes = [2, 8, 8], strides = [1, 1, 1]} : vector<2x8x32xf32> to vector<2x8x8xf32>
    %13 = tpu.concatenate %9, %10, %11, %12 in 0 : vector<2x8x8xf32>, vector<2x8x8xf32>, vector<2x8x8xf32>, vector<2x8x8xf32> -> vector<8x8x8xf32>
    %14 = vector.extract_strided_slice %6 {offsets = [0, 32], sizes = [16, 32], strides = [1, 1]} : vector<16x96xf32> to vector<16x32xf32>
    %15 = vector.shape_cast %14 : vector<16x32xf32> to vector<2x8x32xf32>
    %16 = vector.extract_strided_slice %15 {offsets = [0, 0, 0], sizes = [2, 8, 8], strides = [1, 1, 1]} : vector<2x8x32xf32> to vector<2x8x8xf32>
    %17 = vector.extract_strided_slice %15 {offsets = [0, 0, 8], sizes = [2, 8, 8], strides = [1, 1, 1]} : vector<2x8x32xf32> to vector<2x8x8xf32>
    %18 = vector.extract_strided_slice %15 {offsets = [0, 0, 16], sizes = [2, 8, 8], strides = [1, 1, 1]} : vector<2x8x32xf32> to vector<2x8x8xf32>
    %19 = vector.extract_strided_slice %15 {offsets = [0, 0, 24], sizes = [2, 8, 8], strides = [1, 1, 1]} : vector<2x8x32xf32> to vector<2x8x8xf32>
    %20 = tpu.concatenate %16, %17, %18, %19 in 0 : vector<2x8x8xf32>, vector<2x8x8xf32>, vector<2x8x8xf32>, vector<2x8x8xf32> -> vector<8x8x8xf32>
    %21 = vector.extract_strided_slice %6 {offsets = [0, 64], sizes = [16, 32], strides = [1, 1]} : vector<16x96xf32> to vector<16x32xf32>
    %22 = vector.shape_cast %21 : vector<16x32xf32> to vector<2x8x32xf32>
    %23 = vector.extract_strided_slice %22 {offsets = [0, 0, 0], sizes = [2, 8, 8], strides = [1, 1, 1]} : vector<2x8x32xf32> to vector<2x8x8xf32>
    %24 = vector.extract_strided_slice %22 {offsets = [0, 0, 8], sizes = [2, 8, 8], strides = [1, 1, 1]} : vector<2x8x32xf32> to vector<2x8x8xf32>
    %25 = vector.extract_strided_slice %22 {offsets = [0, 0, 16], sizes = [2, 8, 8], strides = [1, 1, 1]} : vector<2x8x32xf32> to vector<2x8x8xf32>
    %26 = vector.extract_strided_slice %22 {offsets = [0, 0, 24], sizes = [2, 8, 8], strides = [1, 1, 1]} : vector<2x8x32xf32> to vector<2x8x8xf32>
    %27 = tpu.concatenate %23, %24, %25, %26 in 0 : vector<2x8x8xf32>, vector<2x8x8xf32>, vector<2x8x8xf32>, vector<2x8x8xf32> -> vector<8x8x8xf32>
    %cst_5 = arith.constant dense<0.000000e+00> : vector<8x8x8xf32>
    %28 = tpu.matmul %13, %20, %cst_5 {dimension_numbers = #tpu.dot_dimension_numbers<[2], [2], [1], [1], [0, 0, 0, 1, 1, 1], [0], [0]>} : vector<8x8x8xf32>, vector<8x8x8xf32>, vector<8x8x8xf32> -> vector<8x8x8xf32>
    %cst_6 = arith.constant 0.353553385 : f32
    %29 = vector.broadcast %cst_6 : f32 to vector<8x8x8xf32>
    %30 = arith.mulf %28, %29 : vector<8x8x8xf32>
    %cst_7 = arith.constant dense<0xFF800000> : vector<8x8xf32>
    %31 = vector.multi_reduction <maximumf>, %30, %cst_7 [2] : vector<8x8x8xf32> to vector<8x8xf32>
    %32 = vector.shape_cast %31 : vector<8x8xf32> to vector<8x8x1xf32>
    %33 = vector.broadcast %32 : vector<8x8x1xf32> to vector<8x8x8xf32>
    %34 = arith.subf %30, %33 : vector<8x8x8xf32>
    %35 = math.exp %34 : vector<8x8x8xf32>
    %cst_8 = arith.constant dense<0.000000e+00> : vector<8x8xf32>
    %36 = vector.multi_reduction <add>, %35, %cst_8 [2] : vector<8x8x8xf32> to vector<8x8xf32>
    %37 = vector.shape_cast %36 : vector<8x8xf32> to vector<8x8x1xf32>
    %38 = tpu.reciprocal %37 : vector<8x8x1xf32> -> vector<8x8x1xf32>
    %39 = vector.broadcast %38 : vector<8x8x1xf32> to vector<8x8x8xf32>
    %40 = arith.mulf %35, %39 : vector<8x8x8xf32>
    %cst_9 = arith.constant dense<0.000000e+00> : vector<8x8x8xf32>
    %41 = tpu.matmul %40, %27, %cst_9 {dimension_numbers = #tpu.dot_dimension_numbers<[2], [1], [1], [2], [0, 0, 0, 1, 1, 2], [0], [0]>} : vector<8x8x8xf32>, vector<8x8x8xf32>, vector<8x8x8xf32> -> vector<8x8x8xf32>
    %42 = vector.extract_strided_slice %41 {offsets = [0, 0, 0], sizes = [2, 8, 8], strides = [1, 1, 1]} : vector<8x8x8xf32> to vector<2x8x8xf32>
    %43 = vector.extract_strided_slice %41 {offsets = [2, 0, 0], sizes = [2, 8, 8], strides = [1, 1, 1]} : vector<8x8x8xf32> to vector<2x8x8xf32>
    %44 = vector.extract_strided_slice %41 {offsets = [4, 0, 0], sizes = [2, 8, 8], strides = [1, 1, 1]} : vector<8x8x8xf32> to vector<2x8x8xf32>
    %45 = vector.extract_strided_slice %41 {offsets = [6, 0, 0], sizes = [2, 8, 8], strides = [1, 1, 1]} : vector<8x8x8xf32> to vector<2x8x8xf32>
    %46 = tpu.concatenate %42, %43, %44, %45 in 2 : vector<2x8x8xf32>, vector<2x8x8xf32>, vector<2x8x8xf32>, vector<2x8x8xf32> -> vector<2x8x32xf32>
    %47 = vector.shape_cast %46 : vector<2x8x32xf32> to vector<16x32xf32>
    %c0_10 = arith.constant 0 : index
    %c0_11 = arith.constant 0 : index
    %48 = vector.load %arg3[%c0_10, %c0_11] : memref<32x32xbf16, #tpu.memory_space<vmem>>, vector<32x32xbf16>
    %c0_12 = arith.constant 0 : index
    %c0_13 = arith.constant 0 : index
    %49 = vector.load %arg4[%c0_12, %c0_13] : memref<1x32xf32, #tpu.memory_space<vmem>>, vector<1x32xf32>
    %50 = arith.truncf %47 : vector<16x32xf32> to vector<16x32xbf16>
    %cst_14 = arith.constant dense<0.000000e+00> : vector<16x32xf32>
    %51 = tpu.matmul %50, %48, %cst_14 {dimension_numbers = #tpu.dot_dimension_numbers<[1], [0], [0], [1], [0, 0, 1, 1], [], []>} : vector<16x32xbf16>, vector<32x32xbf16>, vector<16x32xf32> -> vector<16x32xf32>
    %52 = vector.broadcast %49 : vector<1x32xf32> to vector<16x32xf32>
    %53 = arith.addf %51, %52 : vector<16x32xf32>
    %54 = arith.addf %0, %53 : vector<16x32xf32>
    %c0_15 = arith.constant 0 : index
    %c0_16 = arith.constant 0 : index
    %55 = vector.load %arg9[%c0_15, %c0_16] : memref<1x32xf32, #tpu.memory_space<vmem>>, vector<1x32xf32>
    %c0_17 = arith.constant 0 : index
    %c0_18 = arith.constant 0 : index
    %56 = vector.load %arg10[%c0_17, %c0_18] : memref<1x32xf32, #tpu.memory_space<vmem>>, vector<1x32xf32>
    %cst_19 = arith.constant dense<0.000000e+00> : vector<16xf32>
    %57 = vector.multi_reduction <add>, %54, %cst_19 [1] : vector<16x32xf32> to vector<16xf32>
    %58 = vector.shape_cast %57 : vector<16xf32> to vector<16x1xf32>
    %cst_20 = arith.constant 3.200000e+01 : f32
    %59 = vector.broadcast %cst_20 : f32 to vector<16x1xf32>
    %60 = arith.divf %58, %59 : vector<16x1xf32>
    %61 = vector.broadcast %60 : vector<16x1xf32> to vector<16x32xf32>
    %62 = arith.subf %54, %61 : vector<16x32xf32>
    %63 = arith.mulf %62, %62 : vector<16x32xf32>
    %cst_21 = arith.constant dense<0.000000e+00> : vector<16xf32>
    %64 = vector.multi_reduction <add>, %63, %cst_21 [1] : vector<16x32xf32> to vector<16xf32>
    %65 = vector.shape_cast %64 : vector<16xf32> to vector<16x1xf32>
    %cst_22 = arith.constant 3.200000e+01 : f32
    %66 = vector.broadcast %cst_22 : f32 to vector<16x1xf32>
    %67 = arith.divf %65, %66 : vector<16x1xf32>
    %cst_23 = arith.constant 9.99999974E-6 : f32
    %68 = vector.broadcast %cst_23 : f32 to vector<16x1xf32>
    %69 = arith.addf %67, %68 : vector<16x1xf32>
    %70 = math.rsqrt %69 : vector<16x1xf32>
    %71 = vector.broadcast %70 : vector<16x1xf32> to vector<16x32xf32>
    %72 = arith.mulf %62, %71 : vector<16x32xf32>
    %73 = vector.broadcast %55 : vector<1x32xf32> to vector<16x32xf32>
    %74 = arith.mulf %72, %73 : vector<16x32xf32>
    %75 = vector.broadcast %56 : vector<1x32xf32> to vector<16x32xf32>
    %76 = arith.addf %74, %75 : vector<16x32xf32>
    %c0_24 = arith.constant 0 : index
    %c0_25 = arith.constant 0 : index
    %77 = vector.load %arg5[%c0_24, %c0_25] : memref<32x64xbf16, #tpu.memory_space<vmem>>, vector<32x64xbf16>
    %c0_26 = arith.constant 0 : index
    %c0_27 = arith.constant 0 : index
    %78 = vector.load %arg6[%c0_26, %c0_27] : memref<1x64xf32, #tpu.memory_space<vmem>>, vector<1x64xf32>
    %79 = arith.truncf %76 : vector<16x32xf32> to vector<16x32xbf16>
    %cst_28 = arith.constant dense<0.000000e+00> : vector<16x64xf32>
    %80 = tpu.matmul %79, %77, %cst_28 {dimension_numbers = #tpu.dot_dimension_numbers<[1], [0], [0], [1], [0, 0, 1, 1], [], []>} : vector<16x32xbf16>, vector<32x64xbf16>, vector<16x64xf32> -> vector<16x64xf32>
    %81 = vector.broadcast %78 : vector<1x64xf32> to vector<16x64xf32>
    %82 = arith.addf %80, %81 : vector<16x64xf32>
    %cst_29 = arith.constant 0.000000e+00 : f32
    %83 = vector.broadcast %cst_29 : f32 to vector<16x64xf32>
    %84 = arith.maximumf %82, %83 : vector<16x64xf32>
    %c0_30 = arith.constant 0 : index
    %c0_31 = arith.constant 0 : index
    %85 = vector.load %arg7[%c0_30, %c0_31] : memref<64x32xbf16, #tpu.memory_space<vmem>>, vector<64x32xbf16>
    %c0_32 = arith.constant 0 : index
    %c0_33 = arith.constant 0 : index
    %86 = vector.load %arg8[%c0_32, %c0_33] : memref<1x32xf32, #tpu.memory_space<vmem>>, vector<1x32xf32>
    %87 = arith.truncf %84 : vector<16x64xf32> to vector<16x64xbf16>
    %cst_34 = arith.constant dense<0.000000e+00> : vector<16x32xf32>
    %88 = tpu.matmul %87, %85, %cst_34 {dimension_numbers = #tpu.dot_dimension_numbers<[1], [0], [0], [1], [0, 0, 1, 1], [], []>} : vector<16x64xbf16>, vector<64x32xbf16>, vector<16x32xf32> -> vector<16x32xf32>
    %89 = vector.broadcast %86 : vector<1x32xf32> to vector<16x32xf32>
    %90 = arith.addf %88, %89 : vector<16x32xf32>
    %91 = arith.addf %76, %90 : vector<16x32xf32>
    %c0_35 = arith.constant 0 : index
    %c0_36 = arith.constant 0 : index
    %92 = vector.load %arg11[%c0_35, %c0_36] : memref<1x32xf32, #tpu.memory_space<vmem>>, vector<1x32xf32>
    %c0_37 = arith.constant 0 : index
    %c0_38 = arith.constant 0 : index
    %93 = vector.load %arg12[%c0_37, %c0_38] : memref<1x32xf32, #tpu.memory_space<vmem>>, vector<1x32xf32>
    %cst_39 = arith.constant dense<0.000000e+00> : vector<16xf32>
    %94 = vector.multi_reduction <add>, %91, %cst_39 [1] : vector<16x32xf32> to vector<16xf32>
    %95 = vector.shape_cast %94 : vector<16xf32> to vector<16x1xf32>
    %cst_40 = arith.constant 3.200000e+01 : f32
    %96 = vector.broadcast %cst_40 : f32 to vector<16x1xf32>
    %97 = arith.divf %95, %96 : vector<16x1xf32>
    %98 = vector.broadcast %97 : vector<16x1xf32> to vector<16x32xf32>
    %99 = arith.subf %91, %98 : vector<16x32xf32>
    %100 = arith.mulf %99, %99 : vector<16x32xf32>
    %cst_41 = arith.constant dense<0.000000e+00> : vector<16xf32>
    %101 = vector.multi_reduction <add>, %100, %cst_41 [1] : vector<16x32xf32> to vector<16xf32>
    %102 = vector.shape_cast %101 : vector<16xf32> to vector<16x1xf32>
    %cst_42 = arith.constant 3.200000e+01 : f32
    %103 = vector.broadcast %cst_42 : f32 to vector<16x1xf32>
    %104 = arith.divf %102, %103 : vector<16x1xf32>
    %cst_43 = arith.constant 9.99999974E-6 : f32
    %105 = vector.broadcast %cst_43 : f32 to vector<16x1xf32>
    %106 = arith.addf %104, %105 : vector<16x1xf32>
    %107 = math.rsqrt %106 : vector<16x1xf32>
    %108 = vector.broadcast %107 : vector<16x1xf32> to vector<16x32xf32>
    %109 = arith.mulf %99, %108 : vector<16x32xf32>
    %110 = vector.broadcast %92 : vector<1x32xf32> to vector<16x32xf32>
    %111 = arith.mulf %109, %110 : vector<16x32xf32>
    %112 = vector.broadcast %93 : vector<1x32xf32> to vector<16x32xf32>
    %113 = arith.addf %111, %112 : vector<16x32xf32>
    %c0_44 = arith.constant 0 : index
    %c0_45 = arith.constant 0 : index
    %114 = vector.load %arg13[%c0_44, %c0_45] : memref<16x32xf32, #tpu.memory_space<vmem>>, vector<16x32xf32>
    tpu.vector_store %arg13[%c0_44, %c0_45], %113 {strides = array<i32>} : memref<16x32xf32, #tpu.memory_space<vmem>>, vector<16x32xf32>,
    return
  }
}

module attributes {stable_mosaic.version = 11 : i64} {
  func.func @_decoder_layer_kernel(%arg0: memref<16x32xf32, #tpu.memory_space<vmem>>, %arg1: memref<16x32xf32, #tpu.memory_space<vmem>>, %arg2: memref<32x96xbf16, #tpu.memory_space<vmem>>, %arg3: memref<1x96xf32, #tpu.memory_space<vmem>>, %arg4: memref<32x32xbf16, #tpu.memory_space<vmem>>, %arg5: memref<1x32xf32, #tpu.memory_space<vmem>>, %arg6: memref<32x32xbf16, #tpu.memory_space<vmem>>, %arg7: memref<1x32xf32, #tpu.memory_space<vmem>>, %arg8: memref<32x64xbf16, #tpu.memory_space<vmem>>, %arg9: memref<1x64xf32, #tpu.memory_space<vmem>>, %arg10: memref<32x32xbf16, #tpu.memory_space<vmem>>, %arg11: memref<1x32xf32, #tpu.memory_space<vmem>>, %arg12: memref<32x64xbf16, #tpu.memory_space<vmem>>, %arg13: memref<1x64xf32, #tpu.memory_space<vmem>>, %arg14: memref<64x32xbf16, #tpu.memory_space<vmem>>, %arg15: memref<1x32xf32, #tpu.memory_space<vmem>>, %arg16: memref<1x32xf32, #tpu.memory_space<vmem>>, %arg17: memref<1x32xf32, #tpu.memory_space<vmem>>, %arg18: memref<1x32xf32, #tpu.memory_space<vmem>>, %arg19: memref<1x32xf32, #tpu.memory_space<vmem>>, %arg20: memref<1x32xf32, #tpu.memory_space<vmem>>, %arg21: memref<1x32xf32, #tpu.memory_space<vmem>>, %arg22: memref<16x32xf32, #tpu.memory_space<vmem>>) attributes {dimension_semantics = [], scalar_prefetch = 0 : i64, scratch_operands = 0 : i64, tpu.core_type = #tpu.core_type<tc>} {
    %c0 = arith.constant 0 : index
    %c0_0 = arith.constant 0 : index
    %0 = vector.load %arg0[%c0, %c0_0] : memref<16x32xf32, #tpu.memory_space<vmem>>, vector<16x32xf32>
    %c0_1 = arith.constant 0 : index
    %c0_2 = arith.constant 0 : index
    %1 = vector.load %arg1[%c0_1, %c0_2] : memref<16x32xf32, #tpu.memory_space<vmem>>, vector<16x32xf32>
    %c0_3 = arith.constant 0 : index
    %c0_4 = arith.constant 0 : index
    %2 = vector.load %arg2[%c0_3, %c0_4] : memref<32x96xbf16, #tpu.memory_space<vmem>>, vector<32x96xbf16>
    %c0_5 = arith.constant 0 : index
    %c0_6 = arith.constant 0 : index
    %3 = vector.load %arg3[%c0_5, %c0_6] : memref<1x96xf32, #tpu.memory_space<vmem>>, vector<1x96xf32>
    %4 = arith.truncf %0 : vector<16x32xf32> to vector<16x32xbf16>
    %cst = arith.constant dense<0.000000e+00> : vector<16x96xf32>
    %5 = tpu.matmul %4, %2, %cst {dimension_numbers = #tpu.dot_dimension_numbers<[1], [0], [0], [1], [0, 0, 1, 1], [], []>} : vector<16x32xbf16>, vector<32x96xbf16>, vector<16x96xf32> -> vector<16x96xf32>
    %6 = vector.broadcast %3 : vector<1x96xf32> to vector<16x96xf32>
    %7 = arith.addf %5, %6 : vector<16x96xf32>
    %8 = vector.extract_strided_slice %7 {offsets = [0, 0], sizes = [16, 32], strides = [1, 1]} : vector<16x96xf32> to vector<16x32xf32>
    %9 = vector.shape_cast %8 : vector<16x32xf32> to vector<2x8x32xf32>
    %10 = vector.extract_strided_slice %9 {offsets = [0, 0, 0], sizes = [2, 8, 8], strides = [1, 1, 1]} : vector<2x8x32xf32> to vector<2x8x8xf32>
    %11 = vector.extract_strided_slice %9 {offsets = [0, 0, 8], sizes = [2, 8, 8], strides = [1, 1, 1]} : vector<2x8x32xf32> to vector<2x8x8xf32>
    %12 = vector.extract_strided_slice %9 {offsets = [0, 0, 16], sizes = [2, 8, 8], strides = [1, 1, 1]} : vector<2x8x32xf32> to vector<2x8x8xf32>
    %13 = vector.extract_strided_slice %9 {offsets = [0, 0, 24], sizes = [2, 8, 8], strides = [1, 1, 1]} : vector<2x8x32xf32> to vector<2x8x8xf32>
    %14 = tpu.concatenate %10, %11, %12, %13 in 0 : vector<2x8x8xf32>, vector<2x8x8xf32>, vector<2x8x8xf32>, vector<2x8x8xf32> -> vector<8x8x8xf32>
    %15 = vector.extract_strided_slice %7 {offsets = [0, 32], sizes = [16, 32], strides = [1, 1]} : vector<16x96xf32> to vector<16x32xf32>
    %16 = vector.shape_cast %15 : vector<16x32xf32> to vector<2x8x32xf32>
    %17 = vector.extract_strided_slice %16 {offsets = [0, 0, 0], sizes = [2, 8, 8], strides = [1, 1, 1]} : vector<2x8x32xf32> to vector<2x8x8xf32>
    %18 = vector.extract_strided_slice %16 {offsets = [0, 0, 8], sizes = [2, 8, 8], strides = [1, 1, 1]} : vector<2x8x32xf32> to vector<2x8x8xf32>
    %19 = vector.extract_strided_slice %16 {offsets = [0, 0, 16], sizes = [2, 8, 8], strides = [1, 1, 1]} : vector<2x8x32xf32> to vector<2x8x8xf32>
    %20 = vector.extract_strided_slice %16 {offsets = [0, 0, 24], sizes = [2, 8, 8], strides = [1, 1, 1]} : vector<2x8x32xf32> to vector<2x8x8xf32>
    %21 = tpu.concatenate %17, %18, %19, %20 in 0 : vector<2x8x8xf32>, vector<2x8x8xf32>, vector<2x8x8xf32>, vector<2x8x8xf32> -> vector<8x8x8xf32>
    %22 = vector.extract_strided_slice %7 {offsets = [0, 64], sizes = [16, 32], strides = [1, 1]} : vector<16x96xf32> to vector<16x32xf32>
    %23 = vector.shape_cast %22 : vector<16x32xf32> to vector<2x8x32xf32>
    %24 = vector.extract_strided_slice %23 {offsets = [0, 0, 0], sizes = [2, 8, 8], strides = [1, 1, 1]} : vector<2x8x32xf32> to vector<2x8x8xf32>
    %25 = vector.extract_strided_slice %23 {offsets = [0, 0, 8], sizes = [2, 8, 8], strides = [1, 1, 1]} : vector<2x8x32xf32> to vector<2x8x8xf32>
    %26 = vector.extract_strided_slice %23 {offsets = [0, 0, 16], sizes = [2, 8, 8], strides = [1, 1, 1]} : vector<2x8x32xf32> to vector<2x8x8xf32>
    %27 = vector.extract_strided_slice %23 {offsets = [0, 0, 24], sizes = [2, 8, 8], strides = [1, 1, 1]} : vector<2x8x32xf32> to vector<2x8x8xf32>
    %28 = tpu.concatenate %24, %25, %26, %27 in 0 : vector<2x8x8xf32>, vector<2x8x8xf32>, vector<2x8x8xf32>, vector<2x8x8xf32> -> vector<8x8x8xf32>
    %cst_7 = arith.constant dense<0.000000e+00> : vector<8x8x8xf32>
    %29 = tpu.matmul %14, %21, %cst_7 {dimension_numbers = #tpu.dot_dimension_numbers<[2], [2], [1], [1], [0, 0, 0, 1, 1, 1], [0], [0]>} : vector<8x8x8xf32>, vector<8x8x8xf32>, vector<8x8x8xf32> -> vector<8x8x8xf32>
    %cst_8 = arith.constant 0.353553385 : f32
    %30 = vector.broadcast %cst_8 : f32 to vector<8x8x8xf32>
    %31 = arith.mulf %29, %30 : vector<8x8x8xf32>
    %cst_9 = arith.constant dense<0xFF800000> : vector<8x8xf32>
    %32 = vector.multi_reduction <maximumf>, %31, %cst_9 [2] : vector<8x8x8xf32> to vector<8x8xf32>
    %33 = vector.shape_cast %32 : vector<8x8xf32> to vector<8x8x1xf32>
    %34 = vector.broadcast %33 : vector<8x8x1xf32> to vector<8x8x8xf32>
    %35 = arith.subf %31, %34 : vector<8x8x8xf32>
    %36 = math.exp %35 : vector<8x8x8xf32>
    %cst_10 = arith.constant dense<0.000000e+00> : vector<8x8xf32>
    %37 = vector.multi_reduction <add>, %36, %cst_10 [2] : vector<8x8x8xf32> to vector<8x8xf32>
    %38 = vector.shape_cast %37 : vector<8x8xf32> to vector<8x8x1xf32>
    %39 = tpu.reciprocal %38 : vector<8x8x1xf32> -> vector<8x8x1xf32>
    %40 = vector.broadcast %39 : vector<8x8x1xf32> to vector<8x8x8xf32>
    %41 = arith.mulf %36, %40 : vector<8x8x8xf32>
    %cst_11 = arith.constant dense<0.000000e+00> : vector<8x8x8xf32>
    %42 = tpu.matmul %41, %28, %cst_11 {dimension_numbers = #tpu.dot_dimension_numbers<[2], [1], [1], [2], [0, 0, 0, 1, 1, 2], [0], [0]>} : vector<8x8x8xf32>, vector<8x8x8xf32>, vector<8x8x8xf32> -> vector<8x8x8xf32>
    %43 = vector.extract_strided_slice %42 {offsets = [0, 0, 0], sizes = [2, 8, 8], strides = [1, 1, 1]} : vector<8x8x8xf32> to vector<2x8x8xf32>
    %44 = vector.extract_strided_slice %42 {offsets = [2, 0, 0], sizes = [2, 8, 8], strides = [1, 1, 1]} : vector<8x8x8xf32> to vector<2x8x8xf32>
    %45 = vector.extract_strided_slice %42 {offsets = [4, 0, 0], sizes = [2, 8, 8], strides = [1, 1, 1]} : vector<8x8x8xf32> to vector<2x8x8xf32>
    %46 = vector.extract_strided_slice %42 {offsets = [6, 0, 0], sizes = [2, 8, 8], strides = [1, 1, 1]} : vector<8x8x8xf32> to vector<2x8x8xf32>
    %47 = tpu.concatenate %43, %44, %45, %46 in 2 : vector<2x8x8xf32>, vector<2x8x8xf32>, vector<2x8x8xf32>, vector<2x8x8xf32> -> vector<2x8x32xf32>
    %48 = vector.shape_cast %47 : vector<2x8x32xf32> to vector<16x32xf32>
    %c0_12 = arith.constant 0 : index
    %c0_13 = arith.constant 0 : index
    %49 = vector.load %arg4[%c0_12, %c0_13] : memref<32x32xbf16, #tpu.memory_space<vmem>>, vector<32x32xbf16>
    %c0_14 = arith.constant 0 : index
    %c0_15 = arith.constant 0 : index
    %50 = vector.load %arg5[%c0_14, %c0_15] : memref<1x32xf32, #tpu.memory_space<vmem>>, vector<1x32xf32>
    %51 = arith.truncf %48 : vector<16x32xf32> to vector<16x32xbf16>
    %cst_16 = arith.constant dense<0.000000e+00> : vector<16x32xf32>
    %52 = tpu.matmul %51, %49, %cst_16 {dimension_numbers = #tpu.dot_dimension_numbers<[1], [0], [0], [1], [0, 0, 1, 1], [], []>} : vector<16x32xbf16>, vector<32x32xbf16>, vector<16x32xf32> -> vector<16x32xf32>
    %53 = vector.broadcast %50 : vector<1x32xf32> to vector<16x32xf32>
    %54 = arith.addf %52, %53 : vector<16x32xf32>
    %55 = arith.addf %0, %54 : vector<16x32xf32>
    %c0_17 = arith.constant 0 : index
    %c0_18 = arith.constant 0 : index
    %56 = vector.load %arg16[%c0_17, %c0_18] : memref<1x32xf32, #tpu.memory_space<vmem>>, vector<1x32xf32>
    %c0_19 = arith.constant 0 : index
    %c0_20 = arith.constant 0 : index
    %57 = vector.load %arg17[%c0_19, %c0_20] : memref<1x32xf32, #tpu.memory_space<vmem>>, vector<1x32xf32>
    %cst_21 = arith.constant dense<0.000000e+00> : vector<16xf32>
    %58 = vector.multi_reduction <add>, %55, %cst_21 [1] : vector<16x32xf32> to vector<16xf32>
    %59 = vector.shape_cast %58 : vector<16xf32> to vector<16x1xf32>
    %cst_22 = arith.constant 3.200000e+01 : f32
    %60 = vector.broadcast %cst_22 : f32 to vector<16x1xf32>
    %61 = arith.divf %59, %60 : vector<16x1xf32>
    %62 = vector.broadcast %61 : vector<16x1xf32> to vector<16x32xf32>
    %63 = arith.subf %55, %62 : vector<16x32xf32>
    %64 = arith.mulf %63, %63 : vector<16x32xf32>
    %cst_23 = arith.constant dense<0.000000e+00> : vector<16xf32>
    %65 = vector.multi_reduction <add>, %64, %cst_23 [1] : vector<16x32xf32> to vector<16xf32>
    %66 = vector.shape_cast %65 : vector<16xf32> to vector<16x1xf32>
    %cst_24 = arith.constant 3.200000e+01 : f32
    %67 = vector.broadcast %cst_24 : f32 to vector<16x1xf32>
    %68 = arith.divf %66, %67 : vector<16x1xf32>
    %cst_25 = arith.constant 9.99999974E-6 : f32
    %69 = vector.broadcast %cst_25 : f32 to vector<16x1xf32>
    %70 = arith.addf %68, %69 : vector<16x1xf32>
    %71 = math.rsqrt %70 : vector<16x1xf32>
    %72 = vector.broadcast %71 : vector<16x1xf32> to vector<16x32xf32>
    %73 = arith.mulf %63, %72 : vector<16x32xf32>
    %74 = vector.broadcast %56 : vector<1x32xf32> to vector<16x32xf32>
    %75 = arith.mulf %73, %74 : vector<16x32xf32>
    %76 = vector.broadcast %57 : vector<1x32xf32> to vector<16x32xf32>
    %77 = arith.addf %75, %76 : vector<16x32xf32>
    %c0_26 = arith.constant 0 : index
    %c0_27 = arith.constant 0 : index
    %78 = vector.load %arg6[%c0_26, %c0_27] : memref<32x32xbf16, #tpu.memory_space<vmem>>, vector<32x32xbf16>
    %c0_28 = arith.constant 0 : index
    %c0_29 = arith.constant 0 : index
    %79 = vector.load %arg7[%c0_28, %c0_29] : memref<1x32xf32, #tpu.memory_space<vmem>>, vector<1x32xf32>
    %80 = arith.truncf %77 : vector<16x32xf32> to vector<16x32xbf16>
    %cst_30 = arith.constant dense<0.000000e+00> : vector<16x32xf32>
    %81 = tpu.matmul %80, %78, %cst_30 {dimension_numbers = #tpu.dot_dimension_numbers<[1], [0], [0], [1], [0, 0, 1, 1], [], []>} : vector<16x32xbf16>, vector<32x32xbf16>, vector<16x32xf32> -> vector<16x32xf32>
    %82 = vector.broadcast %79 : vector<1x32xf32> to vector<16x32xf32>
    %83 = arith.addf %81, %82 : vector<16x32xf32>
    %c0_31 = arith.constant 0 : index
    %c0_32 = arith.constant 0 : index
    %84 = vector.load %arg8[%c0_31, %c0_32] : memref<32x64xbf16, #tpu.memory_space<vmem>>, vector<32x64xbf16>
    %c0_33 = arith.constant 0 : index
    %c0_34 = arith.constant 0 : index
    %85 = vector.load %arg9[%c0_33, %c0_34] : memref<1x64xf32, #tpu.memory_space<vmem>>, vector<1x64xf32>
    %86 = arith.truncf %1 : vector<16x32xf32> to vector<16x32xbf16>
    %cst_35 = arith.constant dense<0.000000e+00> : vector<16x64xf32>
    %87 = tpu.matmul %86, %84, %cst_35 {dimension_numbers = #tpu.dot_dimension_numbers<[1], [0], [0], [1], [0, 0, 1, 1], [], []>} : vector<16x32xbf16>, vector<32x64xbf16>, vector<16x64xf32> -> vector<16x64xf32>
    %88 = vector.broadcast %85 : vector<1x64xf32> to vector<16x64xf32>
    %89 = arith.addf %87, %88 : vector<16x64xf32>
    %90 = vector.shape_cast %83 : vector<16x32xf32> to vector<2x8x32xf32>
    %91 = vector.extract_strided_slice %90 {offsets = [0, 0, 0], sizes = [2, 8, 8], strides = [1, 1, 1]} : vector<2x8x32xf32> to vector<2x8x8xf32>
    %92 = vector.extract_strided_slice %90 {offsets = [0, 0, 8], sizes = [2, 8, 8], strides = [1, 1, 1]} : vector<2x8x32xf32> to vector<2x8x8xf32>
    %93 = vector.extract_strided_slice %90 {offsets = [0, 0, 16], sizes = [2, 8, 8], strides = [1, 1, 1]} : vector<2x8x32xf32> to vector<2x8x8xf32>
    %94 = vector.extract_strided_slice %90 {offsets = [0, 0, 24], sizes = [2, 8, 8], strides = [1, 1, 1]} : vector<2x8x32xf32> to vector<2x8x8xf32>
    %95 = tpu.concatenate %91, %92, %93, %94 in 0 : vector<2x8x8xf32>, vector<2x8x8xf32>, vector<2x8x8xf32>, vector<2x8x8xf32> -> vector<8x8x8xf32>
    %96 = vector.extract_strided_slice %89 {offsets = [0, 0], sizes = [16, 32], strides = [1, 1]} : vector<16x64xf32> to vector<16x32xf32>
    %97 = vector.shape_cast %96 : vector<16x32xf32> to vector<2x8x32xf32>
    %98 = vector.extract_strided_slice %97 {offsets = [0, 0, 0], sizes = [2, 8, 8], strides = [1, 1, 1]} : vector<2x8x32xf32> to vector<2x8x8xf32>
    %99 = vector.extract_strided_slice %97 {offsets = [0, 0, 8], sizes = [2, 8, 8], strides = [1, 1, 1]} : vector<2x8x32xf32> to vector<2x8x8xf32>
    %100 = vector.extract_strided_slice %97 {offsets = [0, 0, 16], sizes = [2, 8, 8], strides = [1, 1, 1]} : vector<2x8x32xf32> to vector<2x8x8xf32>
    %101 = vector.extract_strided_slice %97 {offsets = [0, 0, 24], sizes = [2, 8, 8], strides = [1, 1, 1]} : vector<2x8x32xf32> to vector<2x8x8xf32>
    %102 = tpu.concatenate %98, %99, %100, %101 in 0 : vector<2x8x8xf32>, vector<2x8x8xf32>, vector<2x8x8xf32>, vector<2x8x8xf32> -> vector<8x8x8xf32>
    %103 = vector.extract_strided_slice %89 {offsets = [0, 32], sizes = [16, 32], strides = [1, 1]} : vector<16x64xf32> to vector<16x32xf32>
    %104 = vector.shape_cast %103 : vector<16x32xf32> to vector<2x8x32xf32>
    %105 = vector.extract_strided_slice %104 {offsets = [0, 0, 0], sizes = [2, 8, 8], strides = [1, 1, 1]} : vector<2x8x32xf32> to vector<2x8x8xf32>
    %106 = vector.extract_strided_slice %104 {offsets = [0, 0, 8], sizes = [2, 8, 8], strides = [1, 1, 1]} : vector<2x8x32xf32> to vector<2x8x8xf32>
    %107 = vector.extract_strided_slice %104 {offsets = [0, 0, 16], sizes = [2, 8, 8], strides = [1, 1, 1]} : vector<2x8x32xf32> to vector<2x8x8xf32>
    %108 = vector.extract_strided_slice %104 {offsets = [0, 0, 24], sizes = [2, 8, 8], strides = [1, 1, 1]} : vector<2x8x32xf32> to vector<2x8x8xf32>
    %109 = tpu.concatenate %105, %106, %107, %108 in 0 : vector<2x8x8xf32>, vector<2x8x8xf32>, vector<2x8x8xf32>, vector<2x8x8xf32> -> vector<8x8x8xf32>
    %cst_36 = arith.constant dense<0.000000e+00> : vector<8x8x8xf32>
    %110 = tpu.matmul %95, %102, %cst_36 {dimension_numbers = #tpu.dot_dimension_numbers<[2], [2], [1], [1], [0, 0, 0, 1, 1, 1], [0], [0]>} : vector<8x8x8xf32>, vector<8x8x8xf32>, vector<8x8x8xf32> -> vector<8x8x8xf32>
    %cst_37 = arith.constant 0.353553385 : f32
    %111 = vector.broadcast %cst_37 : f32 to vector<8x8x8xf32>
    %112 = arith.mulf %110, %111 : vector<8x8x8xf32>
    %cst_38 = arith.constant dense<0xFF800000> : vector<8x8xf32>
    %113 = vector.multi_reduction <maximumf>, %112, %cst_38 [2] : vector<8x8x8xf32> to vector<8x8xf32>
    %114 = vector.shape_cast %113 : vector<8x8xf32> to vector<8x8x1xf32>
    %115 = vector.broadcast %114 : vector<8x8x1xf32> to vector<8x8x8xf32>
    %116 = arith.subf %112, %115 : vector<8x8x8xf32>
    %117 = math.exp %116 : vector<8x8x8xf32>
    %cst_39 = arith.constant dense<0.000000e+00> : vector<8x8xf32>
    %118 = vector.multi_reduction <add>, %117, %cst_39 [2] : vector<8x8x8xf32> to vector<8x8xf32>
    %119 = vector.shape_cast %118 : vector<8x8xf32> to vector<8x8x1xf32>
    %120 = tpu.reciprocal %119 : vector<8x8x1xf32> -> vector<8x8x1xf32>
    %121 = vector.broadcast %120 : vector<8x8x1xf32> to vector<8x8x8xf32>
    %122 = arith.mulf %117, %121 : vector<8x8x8xf32>
    %cst_40 = arith.constant dense<0.000000e+00> : vector<8x8x8xf32>
    %123 = tpu.matmul %122, %109, %cst_40 {dimension_numbers = #tpu.dot_dimension_numbers<[2], [1], [1], [2], [0, 0, 0, 1, 1, 2], [0], [0]>} : vector<8x8x8xf32>, vector<8x8x8xf32>, vector<8x8x8xf32> -> vector<8x8x8xf32>
    %124 = vector.extract_strided_slice %123 {offsets = [0, 0, 0], sizes = [2, 8, 8], strides = [1, 1, 1]} : vector<8x8x8xf32> to vector<2x8x8xf32>
    %125 = vector.extract_strided_slice %123 {offsets = [2, 0, 0], sizes = [2, 8, 8], strides = [1, 1, 1]} : vector<8x8x8xf32> to vector<2x8x8xf32>
    %126 = vector.extract_strided_slice %123 {offsets = [4, 0, 0], sizes = [2, 8, 8], strides = [1, 1, 1]} : vector<8x8x8xf32> to vector<2x8x8xf32>
    %127 = vector.extract_strided_slice %123 {offsets = [6, 0, 0], sizes = [2, 8, 8], strides = [1, 1, 1]} : vector<8x8x8xf32> to vector<2x8x8xf32>
    %128 = tpu.concatenate %124, %125, %126, %127 in 2 : vector<2x8x8xf32>, vector<2x8x8xf32>, vector<2x8x8xf32>, vector<2x8x8xf32> -> vector<2x8x32xf32>
    %129 = vector.shape_cast %128 : vector<2x8x32xf32> to vector<16x32xf32>
    %c0_41 = arith.constant 0 : index
    %c0_42 = arith.constant 0 : index
    %130 = vector.load %arg10[%c0_41, %c0_42] : memref<32x32xbf16, #tpu.memory_space<vmem>>, vector<32x32xbf16>
    %c0_43 = arith.constant 0 : index
    %c0_44 = arith.constant 0 : index
    %131 = vector.load %arg11[%c0_43, %c0_44] : memref<1x32xf32, #tpu.memory_space<vmem>>, vector<1x32xf32>
    %132 = arith.truncf %129 : vector<16x32xf32> to vector<16x32xbf16>
    %cst_45 = arith.constant dense<0.000000e+00> : vector<16x32xf32>
    %133 = tpu.matmul %132, %130, %cst_45 {dimension_numbers = #tpu.dot_dimension_numbers<[1], [0], [0], [1], [0, 0, 1, 1], [], []>} : vector<16x32xbf16>, vector<32x32xbf16>, vector<16x32xf32> -> vector<16x32xf32>
    %134 = vector.broadcast %131 : vector<1x32xf32> to vector<16x32xf32>
    %135 = arith.addf %133, %134 : vector<16x32xf32>
    %136 = arith.addf %77, %135 : vector<16x32xf32>
    %c0_46 = arith.constant 0 : index
    %c0_47 = arith.constant 0 : index
    %137 = vector.load %arg18[%c0_46, %c0_47] : memref<1x32xf32, #tpu.memory_space<vmem>>, vector<1x32xf32>
    %c0_48 = arith.constant 0 : index
    %c0_49 = arith.constant 0 : index
    %138 = vector.load %arg19[%c0_48, %c0_49] : memref<1x32xf32, #tpu.memory_space<vmem>>, vector<1x32xf32>
    %cst_50 = arith.constant dense<0.000000e+00> : vector<16xf32>
    %139 = vector.multi_reduction <add>, %136, %cst_50 [1] : vector<16x32xf32> to vector<16xf32>
    %140 = vector.shape_cast %139 : vector<16xf32> to vector<16x1xf32>
    %cst_51 = arith.constant 3.200000e+01 : f32
    %141 = vector.broadcast %cst_51 : f32 to vector<16x1xf32>
    %142 = arith.divf %140, %141 : vector<16x1xf32>
    %143 = vector.broadcast %142 : vector<16x1xf32> to vector<16x32xf32>
    %144 = arith.subf %136, %143 : vector<16x32xf32>
    %145 = arith.mulf %144, %144 : vector<16x32xf32>
    %cst_52 = arith.constant dense<0.000000e+00> : vector<16xf32>
    %146 = vector.multi_reduction <add>, %145, %cst_52 [1] : vector<16x32xf32> to vector<16xf32>
    %147 = vector.shape_cast %146 : vector<16xf32> to vector<16x1xf32>
    %cst_53 = arith.constant 3.200000e+01 : f32
    %148 = vector.broadcast %cst_53 : f32 to vector<16x1xf32>
    %149 = arith.divf %147, %148 : vector<16x1xf32>
    %cst_54 = arith.constant 9.99999974E-6 : f32
    %150 = vector.broadcast %cst_54 : f32 to vector<16x1xf32>
    %151 = arith.addf %149, %150 : vector<16x1xf32>
    %152 = math.rsqrt %151 : vector<16x1xf32>
    %153 = vector.broadcast %152 : vector<16x1xf32> to vector<16x32xf32>
    %154 = arith.mulf %144, %153 : vector<16x32xf32>
    %155 = vector.broadcast %137 : vector<1x32xf32> to vector<16x32xf32>
    %156 = arith.mulf %154, %155 : vector<16x32xf32>
    %157 = vector.broadcast %138 : vector<1x32xf32> to vector<16x32xf32>
    %158 = arith.addf %156, %157 : vector<16x32xf32>
    %c0_55 = arith.constant 0 : index
    %c0_56 = arith.constant 0 : index
    %159 = vector.load %arg12[%c0_55, %c0_56] : memref<32x64xbf16, #tpu.memory_space<vmem>>, vector<32x64xbf16>
    %c0_57 = arith.constant 0 : index
    %c0_58 = arith.constant 0 : index
    %160 = vector.load %arg13[%c0_57, %c0_58] : memref<1x64xf32, #tpu.memory_space<vmem>>, vector<1x64xf32>
    %161 = arith.truncf %158 : vector<16x32xf32> to vector<16x32xbf16>
    %cst_59 = arith.constant dense<0.000000e+00> : vector<16x64xf32>
    %162 = tpu.matmul %161, %159, %cst_59 {dimension_numbers = #tpu.dot_dimension_numbers<[1], [0], [0], [1], [0, 0, 1, 1], [], []>} : vector<16x32xbf16>, vector<32x64xbf16>, vector<16x64xf32> -> vector<16x64xf32>
    %163 = vector.broadcast %160 : vector<1x64xf32> to vector<16x64xf32>
    %164 = arith.addf %162, %163 : vector<16x64xf32>
    %cst_60 = arith.constant 0.000000e+00 : f32
    %165 = vector.broadcast %cst_60 : f32 to vector<16x64xf32>
    %166 = arith.maximumf %164, %165 : vector<16x64xf32>
    %c0_61 = arith.constant 0 : index
    %c0_62 = arith.constant 0 : index
    %167 = vector.load %arg14[%c0_61, %c0_62] : memref<64x32xbf16, #tpu.memory_space<vmem>>, vector<64x32xbf16>
    %c0_63 = arith.constant 0 : index
    %c0_64 = arith.constant 0 : index
    %168 = vector.load %arg15[%c0_63, %c0_64] : memref<1x32xf32, #tpu.memory_space<vmem>>, vector<1x32xf32>
    %169 = arith.truncf %166 : vector<16x64xf32> to vector<16x64xbf16>
    %cst_65 = arith.constant dense<0.000000e+00> : vector<16x32xf32>
    %170 = tpu.matmul %169, %167, %cst_65 {dimension_numbers = #tpu.dot_dimension_numbers<[1], [0], [0], [1], [0, 0, 1, 1], [], []>} : vector<16x64xbf16>, vector<64x32xbf16>, vector<16x32xf32> -> vector<16x32xf32>
    %171 = vector.broadcast %168 : vector<1x32xf32> to vector<16x32xf32>
    %172 = arith.addf %170, %171 : vector<16x32xf32>
    %173 = arith.addf %158, %172 : vector<16x32xf32>
    %c0_66 = arith.constant 0 : index
    %c0_67 = arith.constant 0 : index
    %174 = vector.load %arg20[%c0_66, %c0_67] : memref<1x32xf32, #tpu.memory_space<vmem>>, vector<1x32xf32>
    %c0_68 = arith.constant 0 : index
    %c0_69 = arith.constant 0 : index
    %175 = vector.load %arg21[%c0_68, %c0_69] : memref<1x32xf32, #tpu.memory_space<vmem>>, vector<1x32xf32>
    %cst_70 = arith.constant dense<0.000000e+00> : vector<16xf32>
    %176 = vector.multi_reduction <add>, %173, %cst_70 [1] : vector<16x32xf32> to vector<16xf32>
    %177 = vector.shape_cast %176 : vector<16xf32> to vector<16x1xf32>
    %cst_71 = arith.constant 3.200000e+01 : f32
    %178 = vector.broadcast %cst_71 : f32 to vector<16x1xf32>
    %179 = arith.divf %177, %178 : vector<16x1xf32>
    %180 = vector.broadcast %179 : vector<16x1xf32> to vector<16x32xf32>
    %181 = arith.subf %173, %180 : vector<16x32xf32>
    %182 = arith.mulf %181, %181 : vector<16x32xf32>
    %cst_72 = arith.constant dense<0.000000e+00> : vector<16xf32>
    %183 = vector.multi_reduction <add>, %182, %cst_72 [1] : vector<16x32xf32> to vector<16xf32>
    %184 = vector.shape_cast %183 : vector<16xf32> to vector<16x1xf32>
    %cst_73 = arith.constant 3.200000e+01 : f32
    %185 = vector.broadcast %cst_73 : f32 to vector<16x1xf32>
    %186 = arith.divf %184, %185 : vector<16x1xf32>
    %cst_74 = arith.constant 9.99999974E-6 : f32
    %187 = vector.broadcast %cst_74 : f32 to vector<16x1xf32>
    %188 = arith.addf %186, %187 : vector<16x1xf32>
    %189 = math.rsqrt %188 : vector<16x1xf32>
    %190 = vector.broadcast %189 : vector<16x1xf32> to vector<16x32xf32>
    %191 = arith.mulf %181, %190 : vector<16x32xf32>
    %192 = vector.broadcast %174 : vector<1x32xf32> to vector<16x32xf32>
    %193 = arith.mulf %191, %192 : vector<16x32xf32>
    %194 = vector.broadcast %175 : vector<1x32xf32> to vector<16x32xf32>
    %195 = arith.addf %193, %194 : vector<16x32xf32>
    %c0_75 = arith.constant 0 : index
    %c0_76 = arith.constant 0 : index
    %196 = vector.load %arg22[%c0_75, %c0_76] : memref<16x32xf32, #tpu.memory_space<vmem>>, vector<16x32xf32>
    tpu.vector_store %arg22[%c0_75, %c0_76], %195 {strides = array<i32>} : memref<16x32xf32, #tpu.memory_space<vmem>>, vector<16x32xf32>,
    return
  }
}

module attributes {stable_mosaic.version = 11 : i64} {
  func.func @_layernorm_kernel(%arg0: memref<16x32xf32, #tpu.memory_space<vmem>>, %arg1: memref<1x32xf32, #tpu.memory_space<vmem>>, %arg2: memref<1x32xf32, #tpu.memory_space<vmem>>, %arg3: memref<16x32xf32, #tpu.memory_space<vmem>>) attributes {dimension_semantics = [], scalar_prefetch = 0 : i64, scratch_operands = 0 : i64, tpu.core_type = #tpu.core_type<tc>} {
    %c0 = arith.constant 0 : index
    %c0_0 = arith.constant 0 : index
    %0 = vector.load %arg0[%c0, %c0_0] : memref<16x32xf32, #tpu.memory_space<vmem>>, vector<16x32xf32>
    %c0_1 = arith.constant 0 : index
    %c0_2 = arith.constant 0 : index
    %1 = vector.load %arg1[%c0_1, %c0_2] : memref<1x32xf32, #tpu.memory_space<vmem>>, vector<1x32xf32>
    %c0_3 = arith.constant 0 : index
    %c0_4 = arith.constant 0 : index
    %2 = vector.load %arg2[%c0_3, %c0_4] : memref<1x32xf32, #tpu.memory_space<vmem>>, vector<1x32xf32>
    %cst = arith.constant dense<0.000000e+00> : vector<16xf32>
    %3 = vector.multi_reduction <add>, %0, %cst [1] : vector<16x32xf32> to vector<16xf32>
    %4 = vector.shape_cast %3 : vector<16xf32> to vector<16x1xf32>
    %cst_5 = arith.constant 3.200000e+01 : f32
    %5 = vector.broadcast %cst_5 : f32 to vector<16x1xf32>
    %6 = arith.divf %4, %5 : vector<16x1xf32>
    %7 = vector.broadcast %6 : vector<16x1xf32> to vector<16x32xf32>
    %8 = arith.subf %0, %7 : vector<16x32xf32>
    %9 = arith.mulf %8, %8 : vector<16x32xf32>
    %cst_6 = arith.constant dense<0.000000e+00> : vector<16xf32>
    %10 = vector.multi_reduction <add>, %9, %cst_6 [1] : vector<16x32xf32> to vector<16xf32>
    %11 = vector.shape_cast %10 : vector<16xf32> to vector<16x1xf32>
    %cst_7 = arith.constant 3.200000e+01 : f32
    %12 = vector.broadcast %cst_7 : f32 to vector<16x1xf32>
    %13 = arith.divf %11, %12 : vector<16x1xf32>
    %cst_8 = arith.constant 9.99999974E-6 : f32
    %14 = vector.broadcast %cst_8 : f32 to vector<16x1xf32>
    %15 = arith.addf %13, %14 : vector<16x1xf32>
    %16 = math.rsqrt %15 : vector<16x1xf32>
    %17 = vector.broadcast %16 : vector<16x1xf32> to vector<16x32xf32>
    %18 = arith.mulf %8, %17 : vector<16x32xf32>
    %19 = vector.broadcast %1 : vector<1x32xf32> to vector<16x32xf32>
    %20 = arith.mulf %18, %19 : vector<16x32xf32>
    %21 = vector.broadcast %2 : vector<1x32xf32> to vector<16x32xf32>
    %22 = arith.addf %20, %21 : vector<16x32xf32>
    %c0_9 = arith.constant 0 : index
    %c0_10 = arith.constant 0 : index
    %23 = vector.load %arg3[%c0_9, %c0_10] : memref<16x32xf32, #tpu.memory_space<vmem>>, vector<16x32xf32>
    tpu.vector_store %arg3[%c0_9, %c0_10], %22 {strides = array<i32>} : memref<16x32xf32, #tpu.memory_space<vmem>>, vector<16x32xf32>,
    return
  }
}

module attributes {stable_mosaic.version = 11 : i64} {
  func.func @_decoder_layer_kernel(%arg0: memref<16x32xf32, #tpu.memory_space<vmem>>, %arg1: memref<16x32xf32, #tpu.memory_space<vmem>>, %arg2: memref<32x96xbf16, #tpu.memory_space<vmem>>, %arg3: memref<1x96xf32, #tpu.memory_space<vmem>>, %arg4: memref<32x32xbf16, #tpu.memory_space<vmem>>, %arg5: memref<1x32xf32, #tpu.memory_space<vmem>>, %arg6: memref<32x32xbf16, #tpu.memory_space<vmem>>, %arg7: memref<1x32xf32, #tpu.memory_space<vmem>>, %arg8: memref<32x64xbf16, #tpu.memory_space<vmem>>, %arg9: memref<1x64xf32, #tpu.memory_space<vmem>>, %arg10: memref<32x32xbf16, #tpu.memory_space<vmem>>, %arg11: memref<1x32xf32, #tpu.memory_space<vmem>>, %arg12: memref<32x64xbf16, #tpu.memory_space<vmem>>, %arg13: memref<1x64xf32, #tpu.memory_space<vmem>>, %arg14: memref<64x32xbf16, #tpu.memory_space<vmem>>, %arg15: memref<1x32xf32, #tpu.memory_space<vmem>>, %arg16: memref<1x32xf32, #tpu.memory_space<vmem>>, %arg17: memref<1x32xf32, #tpu.memory_space<vmem>>, %arg18: memref<1x32xf32, #tpu.memory_space<vmem>>, %arg19: memref<1x32xf32, #tpu.memory_space<vmem>>, %arg20: memref<1x32xf32, #tpu.memory_space<vmem>>, %arg21: memref<1x32xf32, #tpu.memory_space<vmem>>, %arg22: memref<16x32xf32, #tpu.memory_space<vmem>>) attributes {dimension_semantics = [], scalar_prefetch = 0 : i64, scratch_operands = 0 : i64, tpu.core_type = #tpu.core_type<tc>} {
    %c0 = arith.constant 0 : index
    %c0_0 = arith.constant 0 : index
    %0 = vector.load %arg0[%c0, %c0_0] : memref<16x32xf32, #tpu.memory_space<vmem>>, vector<16x32xf32>
    %c0_1 = arith.constant 0 : index
    %c0_2 = arith.constant 0 : index
    %1 = vector.load %arg1[%c0_1, %c0_2] : memref<16x32xf32, #tpu.memory_space<vmem>>, vector<16x32xf32>
    %c0_3 = arith.constant 0 : index
    %c0_4 = arith.constant 0 : index
    %2 = vector.load %arg2[%c0_3, %c0_4] : memref<32x96xbf16, #tpu.memory_space<vmem>>, vector<32x96xbf16>
    %c0_5 = arith.constant 0 : index
    %c0_6 = arith.constant 0 : index
    %3 = vector.load %arg3[%c0_5, %c0_6] : memref<1x96xf32, #tpu.memory_space<vmem>>, vector<1x96xf32>
    %4 = arith.truncf %0 : vector<16x32xf32> to vector<16x32xbf16>
    %cst = arith.constant dense<0.000000e+00> : vector<16x96xf32>
    %5 = tpu.matmul %4, %2, %cst {dimension_numbers = #tpu.dot_dimension_numbers<[1], [0], [0], [1], [0, 0, 1, 1], [], []>} : vector<16x32xbf16>, vector<32x96xbf16>, vector<16x96xf32> -> vector<16x96xf32>
    %6 = vector.broadcast %3 : vector<1x96xf32> to vector<16x96xf32>
    %7 = arith.addf %5, %6 : vector<16x96xf32>
    %8 = vector.extract_strided_slice %7 {offsets = [0, 0], sizes = [16, 32], strides = [1, 1]} : vector<16x96xf32> to vector<16x32xf32>
    %9 = vector.shape_cast %8 : vector<16x32xf32> to vector<2x8x32xf32>
    %10 = vector.extract_strided_slice %9 {offsets = [0, 0, 0], sizes = [2, 8, 8], strides = [1, 1, 1]} : vector<2x8x32xf32> to vector<2x8x8xf32>
    %11 = vector.extract_strided_slice %9 {offsets = [0, 0, 8], sizes = [2, 8, 8], strides = [1, 1, 1]} : vector<2x8x32xf32> to vector<2x8x8xf32>
    %12 = vector.extract_strided_slice %9 {offsets = [0, 0, 16], sizes = [2, 8, 8], strides = [1, 1, 1]} : vector<2x8x32xf32> to vector<2x8x8xf32>
    %13 = vector.extract_strided_slice %9 {offsets = [0, 0, 24], sizes = [2, 8, 8], strides = [1, 1, 1]} : vector<2x8x32xf32> to vector<2x8x8xf32>
    %14 = tpu.concatenate %10, %11, %12, %13 in 0 : vector<2x8x8xf32>, vector<2x8x8xf32>, vector<2x8x8xf32>, vector<2x8x8xf32> -> vector<8x8x8xf32>
    %15 = vector.extract_strided_slice %7 {offsets = [0, 32], sizes = [16, 32], strides = [1, 1]} : vector<16x96xf32> to vector<16x32xf32>
    %16 = vector.shape_cast %15 : vector<16x32xf32> to vector<2x8x32xf32>
    %17 = vector.extract_strided_slice %16 {offsets = [0, 0, 0], sizes = [2, 8, 8], strides = [1, 1, 1]} : vector<2x8x32xf32> to vector<2x8x8xf32>
    %18 = vector.extract_strided_slice %16 {offsets = [0, 0, 8], sizes = [2, 8, 8], strides = [1, 1, 1]} : vector<2x8x32xf32> to vector<2x8x8xf32>
    %19 = vector.extract_strided_slice %16 {offsets = [0, 0, 16], sizes = [2, 8, 8], strides = [1, 1, 1]} : vector<2x8x32xf32> to vector<2x8x8xf32>
    %20 = vector.extract_strided_slice %16 {offsets = [0, 0, 24], sizes = [2, 8, 8], strides = [1, 1, 1]} : vector<2x8x32xf32> to vector<2x8x8xf32>
    %21 = tpu.concatenate %17, %18, %19, %20 in 0 : vector<2x8x8xf32>, vector<2x8x8xf32>, vector<2x8x8xf32>, vector<2x8x8xf32> -> vector<8x8x8xf32>
    %22 = vector.extract_strided_slice %7 {offsets = [0, 64], sizes = [16, 32], strides = [1, 1]} : vector<16x96xf32> to vector<16x32xf32>
    %23 = vector.shape_cast %22 : vector<16x32xf32> to vector<2x8x32xf32>
    %24 = vector.extract_strided_slice %23 {offsets = [0, 0, 0], sizes = [2, 8, 8], strides = [1, 1, 1]} : vector<2x8x32xf32> to vector<2x8x8xf32>
    %25 = vector.extract_strided_slice %23 {offsets = [0, 0, 8], sizes = [2, 8, 8], strides = [1, 1, 1]} : vector<2x8x32xf32> to vector<2x8x8xf32>
    %26 = vector.extract_strided_slice %23 {offsets = [0, 0, 16], sizes = [2, 8, 8], strides = [1, 1, 1]} : vector<2x8x32xf32> to vector<2x8x8xf32>
    %27 = vector.extract_strided_slice %23 {offsets = [0, 0, 24], sizes = [2, 8, 8], strides = [1, 1, 1]} : vector<2x8x32xf32> to vector<2x8x8xf32>
    %28 = tpu.concatenate %24, %25, %26, %27 in 0 : vector<2x8x8xf32>, vector<2x8x8xf32>, vector<2x8x8xf32>, vector<2x8x8xf32> -> vector<8x8x8xf32>
    %cst_7 = arith.constant dense<0.000000e+00> : vector<8x8x8xf32>
    %29 = tpu.matmul %14, %21, %cst_7 {dimension_numbers = #tpu.dot_dimension_numbers<[2], [2], [1], [1], [0, 0, 0, 1, 1, 1], [0], [0]>} : vector<8x8x8xf32>, vector<8x8x8xf32>, vector<8x8x8xf32> -> vector<8x8x8xf32>
    %cst_8 = arith.constant 0.353553385 : f32
    %30 = vector.broadcast %cst_8 : f32 to vector<8x8x8xf32>
    %31 = arith.mulf %29, %30 : vector<8x8x8xf32>
    %cst_9 = arith.constant dense<0xFF800000> : vector<8x8xf32>
    %32 = vector.multi_reduction <maximumf>, %31, %cst_9 [2] : vector<8x8x8xf32> to vector<8x8xf32>
    %33 = vector.shape_cast %32 : vector<8x8xf32> to vector<8x8x1xf32>
    %34 = vector.broadcast %33 : vector<8x8x1xf32> to vector<8x8x8xf32>
    %35 = arith.subf %31, %34 : vector<8x8x8xf32>
    %36 = math.exp %35 : vector<8x8x8xf32>
    %cst_10 = arith.constant dense<0.000000e+00> : vector<8x8xf32>
    %37 = vector.multi_reduction <add>, %36, %cst_10 [2] : vector<8x8x8xf32> to vector<8x8xf32>
    %38 = vector.shape_cast %37 : vector<8x8xf32> to vector<8x8x1xf32>
    %39 = tpu.reciprocal %38 : vector<8x8x1xf32> -> vector<8x8x1xf32>
    %40 = vector.broadcast %39 : vector<8x8x1xf32> to vector<8x8x8xf32>
    %41 = arith.mulf %36, %40 : vector<8x8x8xf32>
    %cst_11 = arith.constant dense<0.000000e+00> : vector<8x8x8xf32>
    %42 = tpu.matmul %41, %28, %cst_11 {dimension_numbers = #tpu.dot_dimension_numbers<[2], [1], [1], [2], [0, 0, 0, 1, 1, 2], [0], [0]>} : vector<8x8x8xf32>, vector<8x8x8xf32>, vector<8x8x8xf32> -> vector<8x8x8xf32>
    %43 = vector.extract_strided_slice %42 {offsets = [0, 0, 0], sizes = [2, 8, 8], strides = [1, 1, 1]} : vector<8x8x8xf32> to vector<2x8x8xf32>
    %44 = vector.extract_strided_slice %42 {offsets = [2, 0, 0], sizes = [2, 8, 8], strides = [1, 1, 1]} : vector<8x8x8xf32> to vector<2x8x8xf32>
    %45 = vector.extract_strided_slice %42 {offsets = [4, 0, 0], sizes = [2, 8, 8], strides = [1, 1, 1]} : vector<8x8x8xf32> to vector<2x8x8xf32>
    %46 = vector.extract_strided_slice %42 {offsets = [6, 0, 0], sizes = [2, 8, 8], strides = [1, 1, 1]} : vector<8x8x8xf32> to vector<2x8x8xf32>
    %47 = tpu.concatenate %43, %44, %45, %46 in 2 : vector<2x8x8xf32>, vector<2x8x8xf32>, vector<2x8x8xf32>, vector<2x8x8xf32> -> vector<2x8x32xf32>
    %48 = vector.shape_cast %47 : vector<2x8x32xf32> to vector<16x32xf32>
    %c0_12 = arith.constant 0 : index
    %c0_13 = arith.constant 0 : index
    %49 = vector.load %arg4[%c0_12, %c0_13] : memref<32x32xbf16, #tpu.memory_space<vmem>>, vector<32x32xbf16>
    %c0_14 = arith.constant 0 : index
    %c0_15 = arith.constant 0 : index
    %50 = vector.load %arg5[%c0_14, %c0_15] : memref<1x32xf32, #tpu.memory_space<vmem>>, vector<1x32xf32>
    %51 = arith.truncf %48 : vector<16x32xf32> to vector<16x32xbf16>
    %cst_16 = arith.constant dense<0.000000e+00> : vector<16x32xf32>
    %52 = tpu.matmul %51, %49, %cst_16 {dimension_numbers = #tpu.dot_dimension_numbers<[1], [0], [0], [1], [0, 0, 1, 1], [], []>} : vector<16x32xbf16>, vector<32x32xbf16>, vector<16x32xf32> -> vector<16x32xf32>
    %53 = vector.broadcast %50 : vector<1x32xf32> to vector<16x32xf32>
    %54 = arith.addf %52, %53 : vector<16x32xf32>
    %55 = arith.addf %0, %54 : vector<16x32xf32>
    %c0_17 = arith.constant 0 : index
    %c0_18 = arith.constant 0 : index
    %56 = vector.load %arg16[%c0_17, %c0_18] : memref<1x32xf32, #tpu.memory_space<vmem>>, vector<1x32xf32>
    %c0_19 = arith.constant 0 : index
    %c0_20 = arith.constant 0 : index
    %57 = vector.load %arg17[%c0_19, %c0_20] : memref<1x32xf32, #tpu.memory_space<vmem>>, vector<1x32xf32>
    %cst_21 = arith.constant dense<0.000000e+00> : vector<16xf32>
    %58 = vector.multi_reduction <add>, %55, %cst_21 [1] : vector<16x32xf32> to vector<16xf32>
    %59 = vector.shape_cast %58 : vector<16xf32> to vector<16x1xf32>
    %cst_22 = arith.constant 3.200000e+01 : f32
    %60 = vector.broadcast %cst_22 : f32 to vector<16x1xf32>
    %61 = arith.divf %59, %60 : vector<16x1xf32>
    %62 = vector.broadcast %61 : vector<16x1xf32> to vector<16x32xf32>
    %63 = arith.subf %55, %62 : vector<16x32xf32>
    %64 = arith.mulf %63, %63 : vector<16x32xf32>
    %cst_23 = arith.constant dense<0.000000e+00> : vector<16xf32>
    %65 = vector.multi_reduction <add>, %64, %cst_23 [1] : vector<16x32xf32> to vector<16xf32>
    %66 = vector.shape_cast %65 : vector<16xf32> to vector<16x1xf32>
    %cst_24 = arith.constant 3.200000e+01 : f32
    %67 = vector.broadcast %cst_24 : f32 to vector<16x1xf32>
    %68 = arith.divf %66, %67 : vector<16x1xf32>
    %cst_25 = arith.constant 9.99999974E-6 : f32
    %69 = vector.broadcast %cst_25 : f32 to vector<16x1xf32>
    %70 = arith.addf %68, %69 : vector<16x1xf32>
    %71 = math.rsqrt %70 : vector<16x1xf32>
    %72 = vector.broadcast %71 : vector<16x1xf32> to vector<16x32xf32>
    %73 = arith.mulf %63, %72 : vector<16x32xf32>
    %74 = vector.broadcast %56 : vector<1x32xf32> to vector<16x32xf32>
    %75 = arith.mulf %73, %74 : vector<16x32xf32>
    %76 = vector.broadcast %57 : vector<1x32xf32> to vector<16x32xf32>
    %77 = arith.addf %75, %76 : vector<16x32xf32>
    %c0_26 = arith.constant 0 : index
    %c0_27 = arith.constant 0 : index
    %78 = vector.load %arg6[%c0_26, %c0_27] : memref<32x32xbf16, #tpu.memory_space<vmem>>, vector<32x32xbf16>
    %c0_28 = arith.constant 0 : index
    %c0_29 = arith.constant 0 : index
    %79 = vector.load %arg7[%c0_28, %c0_29] : memref<1x32xf32, #tpu.memory_space<vmem>>, vector<1x32xf32>
    %80 = arith.truncf %77 : vector<16x32xf32> to vector<16x32xbf16>
    %cst_30 = arith.constant dense<0.000000e+00> : vector<16x32xf32>
    %81 = tpu.matmul %80, %78, %cst_30 {dimension_numbers = #tpu.dot_dimension_numbers<[1], [0], [0], [1], [0, 0, 1, 1], [], []>} : vector<16x32xbf16>, vector<32x32xbf16>, vector<16x32xf32> -> vector<16x32xf32>
    %82 = vector.broadcast %79 : vector<1x32xf32> to vector<16x32xf32>
    %83 = arith.addf %81, %82 : vector<16x32xf32>
    %c0_31 = arith.constant 0 : index
    %c0_32 = arith.constant 0 : index
    %84 = vector.load %arg8[%c0_31, %c0_32] : memref<32x64xbf16, #tpu.memory_space<vmem>>, vector<32x64xbf16>
    %c0_33 = arith.constant 0 : index
    %c0_34 = arith.constant 0 : index
    %85 = vector.load %arg9[%c0_33, %c0_34] : memref<1x64xf32, #tpu.memory_space<vmem>>, vector<1x64xf32>
    %86 = arith.truncf %1 : vector<16x32xf32> to vector<16x32xbf16>
    %cst_35 = arith.constant dense<0.000000e+00> : vector<16x64xf32>
    %87 = tpu.matmul %86, %84, %cst_35 {dimension_numbers = #tpu.dot_dimension_numbers<[1], [0], [0], [1], [0, 0, 1, 1], [], []>} : vector<16x32xbf16>, vector<32x64xbf16>, vector<16x64xf32> -> vector<16x64xf32>
    %88 = vector.broadcast %85 : vector<1x64xf32> to vector<16x64xf32>
    %89 = arith.addf %87, %88 : vector<16x64xf32>
    %90 = vector.shape_cast %83 : vector<16x32xf32> to vector<2x8x32xf32>
    %91 = vector.extract_strided_slice %90 {offsets = [0, 0, 0], sizes = [2, 8, 8], strides = [1, 1, 1]} : vector<2x8x32xf32> to vector<2x8x8xf32>
    %92 = vector.extract_strided_slice %90 {offsets = [0, 0, 8], sizes = [2, 8, 8], strides = [1, 1, 1]} : vector<2x8x32xf32> to vector<2x8x8xf32>
    %93 = vector.extract_strided_slice %90 {offsets = [0, 0, 16], sizes = [2, 8, 8], strides = [1, 1, 1]} : vector<2x8x32xf32> to vector<2x8x8xf32>
    %94 = vector.extract_strided_slice %90 {offsets = [0, 0, 24], sizes = [2, 8, 8], strides = [1, 1, 1]} : vector<2x8x32xf32> to vector<2x8x8xf32>
    %95 = tpu.concatenate %91, %92, %93, %94 in 0 : vector<2x8x8xf32>, vector<2x8x8xf32>, vector<2x8x8xf32>, vector<2x8x8xf32> -> vector<8x8x8xf32>
    %96 = vector.extract_strided_slice %89 {offsets = [0, 0], sizes = [16, 32], strides = [1, 1]} : vector<16x64xf32> to vector<16x32xf32>
    %97 = vector.shape_cast %96 : vector<16x32xf32> to vector<2x8x32xf32>
    %98 = vector.extract_strided_slice %97 {offsets = [0, 0, 0], sizes = [2, 8, 8], strides = [1, 1, 1]} : vector<2x8x32xf32> to vector<2x8x8xf32>
    %99 = vector.extract_strided_slice %97 {offsets = [0, 0, 8], sizes = [2, 8, 8], strides = [1, 1, 1]} : vector<2x8x32xf32> to vector<2x8x8xf32>
    %100 = vector.extract_strided_slice %97 {offsets = [0, 0, 16], sizes = [2, 8, 8], strides = [1, 1, 1]} : vector<2x8x32xf32> to vector<2x8x8xf32>
    %101 = vector.extract_strided_slice %97 {offsets = [0, 0, 24], sizes = [2, 8, 8], strides = [1, 1, 1]} : vector<2x8x32xf32> to vector<2x8x8xf32>
    %102 = tpu.concatenate %98, %99, %100, %101 in 0 : vector<2x8x8xf32>, vector<2x8x8xf32>, vector<2x8x8xf32>, vector<2x8x8xf32> -> vector<8x8x8xf32>
    %103 = vector.extract_strided_slice %89 {offsets = [0, 32], sizes = [16, 32], strides = [1, 1]} : vector<16x64xf32> to vector<16x32xf32>
    %104 = vector.shape_cast %103 : vector<16x32xf32> to vector<2x8x32xf32>
    %105 = vector.extract_strided_slice %104 {offsets = [0, 0, 0], sizes = [2, 8, 8], strides = [1, 1, 1]} : vector<2x8x32xf32> to vector<2x8x8xf32>
    %106 = vector.extract_strided_slice %104 {offsets = [0, 0, 8], sizes = [2, 8, 8], strides = [1, 1, 1]} : vector<2x8x32xf32> to vector<2x8x8xf32>
    %107 = vector.extract_strided_slice %104 {offsets = [0, 0, 16], sizes = [2, 8, 8], strides = [1, 1, 1]} : vector<2x8x32xf32> to vector<2x8x8xf32>
    %108 = vector.extract_strided_slice %104 {offsets = [0, 0, 24], sizes = [2, 8, 8], strides = [1, 1, 1]} : vector<2x8x32xf32> to vector<2x8x8xf32>
    %109 = tpu.concatenate %105, %106, %107, %108 in 0 : vector<2x8x8xf32>, vector<2x8x8xf32>, vector<2x8x8xf32>, vector<2x8x8xf32> -> vector<8x8x8xf32>
    %cst_36 = arith.constant dense<0.000000e+00> : vector<8x8x8xf32>
    %110 = tpu.matmul %95, %102, %cst_36 {dimension_numbers = #tpu.dot_dimension_numbers<[2], [2], [1], [1], [0, 0, 0, 1, 1, 1], [0], [0]>} : vector<8x8x8xf32>, vector<8x8x8xf32>, vector<8x8x8xf32> -> vector<8x8x8xf32>
    %cst_37 = arith.constant 0.353553385 : f32
    %111 = vector.broadcast %cst_37 : f32 to vector<8x8x8xf32>
    %112 = arith.mulf %110, %111 : vector<8x8x8xf32>
    %cst_38 = arith.constant dense<0xFF800000> : vector<8x8xf32>
    %113 = vector.multi_reduction <maximumf>, %112, %cst_38 [2] : vector<8x8x8xf32> to vector<8x8xf32>
    %114 = vector.shape_cast %113 : vector<8x8xf32> to vector<8x8x1xf32>
    %115 = vector.broadcast %114 : vector<8x8x1xf32> to vector<8x8x8xf32>
    %116 = arith.subf %112, %115 : vector<8x8x8xf32>
    %117 = math.exp %116 : vector<8x8x8xf32>
    %cst_39 = arith.constant dense<0.000000e+00> : vector<8x8xf32>
    %118 = vector.multi_reduction <add>, %117, %cst_39 [2] : vector<8x8x8xf32> to vector<8x8xf32>
    %119 = vector.shape_cast %118 : vector<8x8xf32> to vector<8x8x1xf32>
    %120 = tpu.reciprocal %119 : vector<8x8x1xf32> -> vector<8x8x1xf32>
    %121 = vector.broadcast %120 : vector<8x8x1xf32> to vector<8x8x8xf32>
    %122 = arith.mulf %117, %121 : vector<8x8x8xf32>
    %cst_40 = arith.constant dense<0.000000e+00> : vector<8x8x8xf32>
    %123 = tpu.matmul %122, %109, %cst_40 {dimension_numbers = #tpu.dot_dimension_numbers<[2], [1], [1], [2], [0, 0, 0, 1, 1, 2], [0], [0]>} : vector<8x8x8xf32>, vector<8x8x8xf32>, vector<8x8x8xf32> -> vector<8x8x8xf32>
    %124 = vector.extract_strided_slice %123 {offsets = [0, 0, 0], sizes = [2, 8, 8], strides = [1, 1, 1]} : vector<8x8x8xf32> to vector<2x8x8xf32>
    %125 = vector.extract_strided_slice %123 {offsets = [2, 0, 0], sizes = [2, 8, 8], strides = [1, 1, 1]} : vector<8x8x8xf32> to vector<2x8x8xf32>
    %126 = vector.extract_strided_slice %123 {offsets = [4, 0, 0], sizes = [2, 8, 8], strides = [1, 1, 1]} : vector<8x8x8xf32> to vector<2x8x8xf32>
    %127 = vector.extract_strided_slice %123 {offsets = [6, 0, 0], sizes = [2, 8, 8], strides = [1, 1, 1]} : vector<8x8x8xf32> to vector<2x8x8xf32>
    %128 = tpu.concatenate %124, %125, %126, %127 in 2 : vector<2x8x8xf32>, vector<2x8x8xf32>, vector<2x8x8xf32>, vector<2x8x8xf32> -> vector<2x8x32xf32>
    %129 = vector.shape_cast %128 : vector<2x8x32xf32> to vector<16x32xf32>
    %c0_41 = arith.constant 0 : index
    %c0_42 = arith.constant 0 : index
    %130 = vector.load %arg10[%c0_41, %c0_42] : memref<32x32xbf16, #tpu.memory_space<vmem>>, vector<32x32xbf16>
    %c0_43 = arith.constant 0 : index
    %c0_44 = arith.constant 0 : index
    %131 = vector.load %arg11[%c0_43, %c0_44] : memref<1x32xf32, #tpu.memory_space<vmem>>, vector<1x32xf32>
    %132 = arith.truncf %129 : vector<16x32xf32> to vector<16x32xbf16>
    %cst_45 = arith.constant dense<0.000000e+00> : vector<16x32xf32>
    %133 = tpu.matmul %132, %130, %cst_45 {dimension_numbers = #tpu.dot_dimension_numbers<[1], [0], [0], [1], [0, 0, 1, 1], [], []>} : vector<16x32xbf16>, vector<32x32xbf16>, vector<16x32xf32> -> vector<16x32xf32>
    %134 = vector.broadcast %131 : vector<1x32xf32> to vector<16x32xf32>
    %135 = arith.addf %133, %134 : vector<16x32xf32>
    %136 = arith.addf %77, %135 : vector<16x32xf32>
    %c0_46 = arith.constant 0 : index
    %c0_47 = arith.constant 0 : index
    %137 = vector.load %arg18[%c0_46, %c0_47] : memref<1x32xf32, #tpu.memory_space<vmem>>, vector<1x32xf32>
    %c0_48 = arith.constant 0 : index
    %c0_49 = arith.constant 0 : index
    %138 = vector.load %arg19[%c0_48, %c0_49] : memref<1x32xf32, #tpu.memory_space<vmem>>, vector<1x32xf32>
    %cst_50 = arith.constant dense<0.000000e+00> : vector<16xf32>
    %139 = vector.multi_reduction <add>, %136, %cst_50 [1] : vector<16x32xf32> to vector<16xf32>
    %140 = vector.shape_cast %139 : vector<16xf32> to vector<16x1xf32>
    %cst_51 = arith.constant 3.200000e+01 : f32
    %141 = vector.broadcast %cst_51 : f32 to vector<16x1xf32>
    %142 = arith.divf %140, %141 : vector<16x1xf32>
    %143 = vector.broadcast %142 : vector<16x1xf32> to vector<16x32xf32>
    %144 = arith.subf %136, %143 : vector<16x32xf32>
    %145 = arith.mulf %144, %144 : vector<16x32xf32>
    %cst_52 = arith.constant dense<0.000000e+00> : vector<16xf32>
    %146 = vector.multi_reduction <add>, %145, %cst_52 [1] : vector<16x32xf32> to vector<16xf32>
    %147 = vector.shape_cast %146 : vector<16xf32> to vector<16x1xf32>
    %cst_53 = arith.constant 3.200000e+01 : f32
    %148 = vector.broadcast %cst_53 : f32 to vector<16x1xf32>
    %149 = arith.divf %147, %148 : vector<16x1xf32>
    %cst_54 = arith.constant 9.99999974E-6 : f32
    %150 = vector.broadcast %cst_54 : f32 to vector<16x1xf32>
    %151 = arith.addf %149, %150 : vector<16x1xf32>
    %152 = math.rsqrt %151 : vector<16x1xf32>
    %153 = vector.broadcast %152 : vector<16x1xf32> to vector<16x32xf32>
    %154 = arith.mulf %144, %153 : vector<16x32xf32>
    %155 = vector.broadcast %137 : vector<1x32xf32> to vector<16x32xf32>
    %156 = arith.mulf %154, %155 : vector<16x32xf32>
    %157 = vector.broadcast %138 : vector<1x32xf32> to vector<16x32xf32>
    %158 = arith.addf %156, %157 : vector<16x32xf32>
    %c0_55 = arith.constant 0 : index
    %c0_56 = arith.constant 0 : index
    %159 = vector.load %arg12[%c0_55, %c0_56] : memref<32x64xbf16, #tpu.memory_space<vmem>>, vector<32x64xbf16>
    %c0_57 = arith.constant 0 : index
    %c0_58 = arith.constant 0 : index
    %160 = vector.load %arg13[%c0_57, %c0_58] : memref<1x64xf32, #tpu.memory_space<vmem>>, vector<1x64xf32>
    %161 = arith.truncf %158 : vector<16x32xf32> to vector<16x32xbf16>
    %cst_59 = arith.constant dense<0.000000e+00> : vector<16x64xf32>
    %162 = tpu.matmul %161, %159, %cst_59 {dimension_numbers = #tpu.dot_dimension_numbers<[1], [0], [0], [1], [0, 0, 1, 1], [], []>} : vector<16x32xbf16>, vector<32x64xbf16>, vector<16x64xf32> -> vector<16x64xf32>
    %163 = vector.broadcast %160 : vector<1x64xf32> to vector<16x64xf32>
    %164 = arith.addf %162, %163 : vector<16x64xf32>
    %cst_60 = arith.constant 0.000000e+00 : f32
    %165 = vector.broadcast %cst_60 : f32 to vector<16x64xf32>
    %166 = arith.maximumf %164, %165 : vector<16x64xf32>
    %c0_61 = arith.constant 0 : index
    %c0_62 = arith.constant 0 : index
    %167 = vector.load %arg14[%c0_61, %c0_62] : memref<64x32xbf16, #tpu.memory_space<vmem>>, vector<64x32xbf16>
    %c0_63 = arith.constant 0 : index
    %c0_64 = arith.constant 0 : index
    %168 = vector.load %arg15[%c0_63, %c0_64] : memref<1x32xf32, #tpu.memory_space<vmem>>, vector<1x32xf32>
    %169 = arith.truncf %166 : vector<16x64xf32> to vector<16x64xbf16>
    %cst_65 = arith.constant dense<0.000000e+00> : vector<16x32xf32>
    %170 = tpu.matmul %169, %167, %cst_65 {dimension_numbers = #tpu.dot_dimension_numbers<[1], [0], [0], [1], [0, 0, 1, 1], [], []>} : vector<16x64xbf16>, vector<64x32xbf16>, vector<16x32xf32> -> vector<16x32xf32>
    %171 = vector.broadcast %168 : vector<1x32xf32> to vector<16x32xf32>
    %172 = arith.addf %170, %171 : vector<16x32xf32>
    %173 = arith.addf %158, %172 : vector<16x32xf32>
    %c0_66 = arith.constant 0 : index
    %c0_67 = arith.constant 0 : index
    %174 = vector.load %arg20[%c0_66, %c0_67] : memref<1x32xf32, #tpu.memory_space<vmem>>, vector<1x32xf32>
    %c0_68 = arith.constant 0 : index
    %c0_69 = arith.constant 0 : index
    %175 = vector.load %arg21[%c0_68, %c0_69] : memref<1x32xf32, #tpu.memory_space<vmem>>, vector<1x32xf32>
    %cst_70 = arith.constant dense<0.000000e+00> : vector<16xf32>
    %176 = vector.multi_reduction <add>, %173, %cst_70 [1] : vector<16x32xf32> to vector<16xf32>
    %177 = vector.shape_cast %176 : vector<16xf32> to vector<16x1xf32>
    %cst_71 = arith.constant 3.200000e+01 : f32
    %178 = vector.broadcast %cst_71 : f32 to vector<16x1xf32>
    %179 = arith.divf %177, %178 : vector<16x1xf32>
    %180 = vector.broadcast %179 : vector<16x1xf32> to vector<16x32xf32>
    %181 = arith.subf %173, %180 : vector<16x32xf32>
    %182 = arith.mulf %181, %181 : vector<16x32xf32>
    %cst_72 = arith.constant dense<0.000000e+00> : vector<16xf32>
    %183 = vector.multi_reduction <add>, %182, %cst_72 [1] : vector<16x32xf32> to vector<16xf32>
    %184 = vector.shape_cast %183 : vector<16xf32> to vector<16x1xf32>
    %cst_73 = arith.constant 3.200000e+01 : f32
    %185 = vector.broadcast %cst_73 : f32 to vector<16x1xf32>
    %186 = arith.divf %184, %185 : vector<16x1xf32>
    %cst_74 = arith.constant 9.99999974E-6 : f32
    %187 = vector.broadcast %cst_74 : f32 to vector<16x1xf32>
    %188 = arith.addf %186, %187 : vector<16x1xf32>
    %189 = math.rsqrt %188 : vector<16x1xf32>
    %190 = vector.broadcast %189 : vector<16x1xf32> to vector<16x32xf32>
    %191 = arith.mulf %181, %190 : vector<16x32xf32>
    %192 = vector.broadcast %174 : vector<1x32xf32> to vector<16x32xf32>
    %193 = arith.mulf %191, %192 : vector<16x32xf32>
    %194 = vector.broadcast %175 : vector<1x32xf32> to vector<16x32xf32>
    %195 = arith.addf %193, %194 : vector<16x32xf32>
    %c0_75 = arith.constant 0 : index
    %c0_76 = arith.constant 0 : index
    %196 = vector.load %arg22[%c0_75, %c0_76] : memref<16x32xf32, #tpu.memory_space<vmem>>, vector<16x32xf32>
    tpu.vector_store %arg22[%c0_75, %c0_76], %195 {strides = array<i32>} : memref<16x32xf32, #tpu.memory_space<vmem>>, vector<16x32xf32>,
    return
  }
}

module attributes {stable_mosaic.version = 11 : i64} {
  func.func @_final_norm_fc_kernel(%arg0: memref<16x32xf32, #tpu.memory_space<vmem>>, %arg1: memref<1x32xf32, #tpu.memory_space<vmem>>, %arg2: memref<1x32xf32, #tpu.memory_space<vmem>>, %arg3: memref<32x128xbf16, #tpu.memory_space<vmem>>, %arg4: memref<1x128xf32, #tpu.memory_space<vmem>>, %arg5: memref<16x128xf32, #tpu.memory_space<vmem>>) attributes {dimension_semantics = [], scalar_prefetch = 0 : i64, scratch_operands = 0 : i64, tpu.core_type = #tpu.core_type<tc>} {
    %c0 = arith.constant 0 : index
    %c0_0 = arith.constant 0 : index
    %0 = vector.load %arg0[%c0, %c0_0] : memref<16x32xf32, #tpu.memory_space<vmem>>, vector<16x32xf32>
    %c0_1 = arith.constant 0 : index
    %c0_2 = arith.constant 0 : index
    %1 = vector.load %arg1[%c0_1, %c0_2] : memref<1x32xf32, #tpu.memory_space<vmem>>, vector<1x32xf32>
    %c0_3 = arith.constant 0 : index
    %c0_4 = arith.constant 0 : index
    %2 = vector.load %arg2[%c0_3, %c0_4] : memref<1x32xf32, #tpu.memory_space<vmem>>, vector<1x32xf32>
    %cst = arith.constant dense<0.000000e+00> : vector<16xf32>
    %3 = vector.multi_reduction <add>, %0, %cst [1] : vector<16x32xf32> to vector<16xf32>
    %4 = vector.shape_cast %3 : vector<16xf32> to vector<16x1xf32>
    %cst_5 = arith.constant 3.200000e+01 : f32
    %5 = vector.broadcast %cst_5 : f32 to vector<16x1xf32>
    %6 = arith.divf %4, %5 : vector<16x1xf32>
    %7 = vector.broadcast %6 : vector<16x1xf32> to vector<16x32xf32>
    %8 = arith.subf %0, %7 : vector<16x32xf32>
    %9 = arith.mulf %8, %8 : vector<16x32xf32>
    %cst_6 = arith.constant dense<0.000000e+00> : vector<16xf32>
    %10 = vector.multi_reduction <add>, %9, %cst_6 [1] : vector<16x32xf32> to vector<16xf32>
    %11 = vector.shape_cast %10 : vector<16xf32> to vector<16x1xf32>
    %cst_7 = arith.constant 3.200000e+01 : f32
    %12 = vector.broadcast %cst_7 : f32 to vector<16x1xf32>
    %13 = arith.divf %11, %12 : vector<16x1xf32>
    %cst_8 = arith.constant 9.99999974E-6 : f32
    %14 = vector.broadcast %cst_8 : f32 to vector<16x1xf32>
    %15 = arith.addf %13, %14 : vector<16x1xf32>
    %16 = math.rsqrt %15 : vector<16x1xf32>
    %17 = vector.broadcast %16 : vector<16x1xf32> to vector<16x32xf32>
    %18 = arith.mulf %8, %17 : vector<16x32xf32>
    %19 = vector.broadcast %1 : vector<1x32xf32> to vector<16x32xf32>
    %20 = arith.mulf %18, %19 : vector<16x32xf32>
    %21 = vector.broadcast %2 : vector<1x32xf32> to vector<16x32xf32>
    %22 = arith.addf %20, %21 : vector<16x32xf32>
    %23 = arith.truncf %22 : vector<16x32xf32> to vector<16x32xbf16>
    %c0_9 = arith.constant 0 : index
    %c0_10 = arith.constant 0 : index
    %24 = vector.load %arg3[%c0_9, %c0_10] : memref<32x128xbf16, #tpu.memory_space<vmem>>, vector<32x128xbf16>
    %cst_11 = arith.constant dense<0.000000e+00> : vector<16x128xf32>
    %25 = tpu.matmul %23, %24, %cst_11 {dimension_numbers = #tpu.dot_dimension_numbers<[1], [0], [0], [1], [0, 0, 1, 1], [], []>} : vector<16x32xbf16>, vector<32x128xbf16>, vector<16x128xf32> -> vector<16x128xf32>
    %c0_12 = arith.constant 0 : index
    %c0_13 = arith.constant 0 : index
    %26 = vector.load %arg4[%c0_12, %c0_13] : memref<1x128xf32, #tpu.memory_space<vmem>>, vector<1x128xf32>
    %27 = vector.broadcast %26 : vector<1x128xf32> to vector<16x128xf32>
    %28 = arith.addf %25, %27 : vector<16x128xf32>
    %c0_14 = arith.constant 0 : index
    %c0_15 = arith.constant 0 : index
    %29 = vector.load %arg5[%c0_14, %c0_15] : memref<16x128xf32, #tpu.memory_space<vmem>>, vector<16x128xf32>
    tpu.vector_store %arg5[%c0_14, %c0_15], %28 {strides = array<i32>} : memref<16x128xf32, #tpu.memory_space<vmem>>, vector<16x128xf32>,
    return
  }
}

</mosaic_0001>

<bundles_post_ra>
// kernel: transformer_forward.8
= control target key start
LH: loop header
LB: loop body
LE: loop exit
PB: predicated region body
PF: predicated region fallthrough
CT: control target
= control target key end

     0   :  { %vm18_vm0 = vcmask 261120   ;;  %s118_s0 = inlined_call_operand.vmem [shape: f32[16,32], index: 0, kind: input, shape index: {}]   ;;  %s119_s1 = inlined_call_operand.vmem [shape: f32[1,32], index: 1, kind: input, shape index: {}]   ;;  %s120_s2 = inlined_call_operand.vmem [shape: f32[1,32], index: 2, kind: input, shape index: {}]   ;;  %s121_s3 = inlined_call_operand.vmem [shape: f32[16,32], index: 3, kind: output, shape index: {}]  }
   0x1   :  { %v14_v0 = vld [vmem:[%s118_s0] sm:$0xff]  ;;  %v15_v1 = vld [vmem:[%s118_s0 + $0x8] sm:$0xff] }
   0x2   :  { %v19_v2 = vsel %vm18_vm0, %v14_v0, 0.0  ;;  %v22_v3 = vsel %vm18_vm0, %v15_v1, 0.0  ;;  %v68_v21 = vld [vmem:[%s119_s1] ss:$0 sm:$0xff] }
   0x3   :  { %20 = vadd.xlane.f32.xlu0 %v19_v2  ;;  %v69_v23 = vld [vmem:[%s120_s2] ss:$0 sm:$0xff] }
   0x7   :  { %23 = vadd.xlane.f32.xlu0 %v22_v3 }
  0x8c   :  { %v21_v4 = vpop.xlane.xlu0 %20 }
  0x8d   :  { %v26_v5 = vmul.f32 0.03125, %v21_v4 }
  0x8f   :  { %v28_v6 = vsub.f32 %v14_v0, %v26_v5 }
  0x90   :  { %v24_v7 = vpop.xlane.xlu0 %23 }
  0x91   :  { %v27_v8 = vmul.f32 0.03125, %v24_v7  ;;  %v30_v9 = vmul.f32 %v28_v6, %v28_v6 }
  0x93   :  { %v29_v10 = vsub.f32 %v15_v1, %v27_v8  ;;  %v32_v11 = vsel %vm18_vm0, %v30_v9, 0.0 }
  0x94   :  { %33 = vadd.xlane.f32.xlu1 %v32_v11 }
  0x95   :  { %v31_v12 = vmul.f32 %v29_v10, %v29_v10 }
  0x97   :  { %v35_v13 = vsel %vm18_vm0, %v31_v12, 0.0 }
  0x98   :  { %36 = vadd.xlane.f32.xlu1 %v35_v13 }
 0x11d   :  { %v34_v14 = vpop.xlane.xlu1 %33 }
 0x11e   :  { %v38_v15 = vmul.f32 0.03125, %v34_v14 }
 0x120   :  { %v40_v16 = vadd.f32 1e-05, %v38_v15 }
 0x121   :  { %v37_v17 = vpop.xlane.xlu1 %36 }
 0x122   :  { %70 = vrsqrt.f32 %v40_v16  ;;  %v39_v18 = vmul.f32 0.03125, %v37_v17 }
 0x124   :  { %v41_v19 = vadd.f32 1e-05, %v39_v18 }
 0x126   :  { %72 = vrsqrt.f32 %v41_v19 }
 0x12f   :  { %v71_v20 = vpop.eup %70 }
 0x130   :  { %v44_v22 = vmul.f32 %v71_v20, %v28_v6 }
 0x132   :  { %v52_v24 = vmul.f32 %v68_v21, %v44_v22 }
 0x133   :  { %v73_v25 = vpop.eup %72 }
 0x134   :  { %v60_v26 = vadd.f32 %v69_v23, %v52_v24  ;;  %v45_v27 = vmul.f32 %v73_v25, %v29_v10 }
 0x136   :  { %62 = vst.msk [vmem:[%s121_s3] sm:$0xff] %vm18_vm0, %v60_v26  ;;  %v53_v28 = vmul.f32 %v68_v21, %v45_v27 }
 0x138   :  { %v61_v29 = vadd.f32 %v69_v23, %v53_v28 }
 0x13a   :  { %63 = vst.msk [vmem:[%s121_s3 + $0x8] sm:$0xff] %vm18_vm0, %v61_v29 }

// kernel: transformer_forward.11
= control target key start
LH: loop header
LB: loop body
LE: loop exit
PB: predicated region body
PF: predicated region fallthrough
CT: control target
= control target key end

     0   :  { %vm25_vm0 = vcmask 261120   ;;  %v168_v14 = vmov 0.0   ;;  %vm169_vm1 = vmmov 0   ;;  %s232_s0 = inlined_call_operand.vmem [shape: f32[16,32], index: 0, kind: input, shape index: {}]   ;;  %s233_s3 = inlined_call_operand.vmem [shape: bf16[32,128], index: 3, kind: input, shape index: {}]   ;;  %s234_s1 = inlined_call_operand.vmem [shape: f32[1,32], index: 1, kind: input, shape index: {}]   ;;  %s235_s2 = inlined_call_operand.vmem [shape: f32[1,32], index: 2, kind: input, shape index: {}]   ;;  %s236_s4 = inlined_call_operand.vmem [shape: f32[1,128], index: 4, kind: input, shape index: {}]   ;;  %s237_s5 = inlined_call_operand.vmem [shape: f32[16,128], index: 5, kind: output, shape index: {}]  }
   0x1   :  { %v21_v0 = vld [vmem:[%s232_s0] sm:$0xff]  ;;  %v22_v1 = vld [vmem:[%s232_s0 + $0x8] sm:$0xff]  ;;  %152 = vmatprep.subr.bf16.mxu0 %v168_v14  ;;  %156 = vmatprep.mubr.msk.bf16.mxu0 %vm169_vm1, %v168_v14 }
   0x2   :  { %v26_v2 = vsel %vm25_vm0, %v21_v0, 0.0  ;;  %v29_v3 = vsel %vm25_vm0, %v22_v1, 0.0  ;;  %v162_v15 = vld [vmem:[%s233_s3 + $0x8] sm:$0xff]   ;;  %v163_v16 = vld [vmem:[%s233_s3] sm:$0xff]  }
   0x3   :  { %27 = vadd.xlane.f32.xlu0 %v26_v2  ;;  %153 = vmatpush3.bf16.msra.mxu0 %v162_v15  ;;  %v143_v25 = vld [vmem:[%s234_s1] ss:$0 sm:$0xff] }
   0x4   :  { %154 = vmatprep.subr.bf16.mxu0 %v168_v14  ;;  %v144_v29 = vld [vmem:[%s235_s2] ss:$0 sm:$0xff] }
   0x5   :  { %v145_v34 = vld [vmem:[%s236_s4] ss:$0 sm:$0xff] }
   0x7   :  { %30 = vadd.xlane.f32.xlu0 %v29_v3  ;;  %155 = vmatpush3.bf16.msra.mxu0 %v163_v16 }
  0x8c   :  { %v28_v4 = vpop.xlane.xlu0 %27 }
  0x8d   :  { %v33_v5 = vmul.f32 0.03125, %v28_v4 }
  0x8f   :  { %v35_v6 = vsub.f32 %v21_v0, %v33_v5 }
  0x90   :  { %v31_v7 = vpop.xlane.xlu0 %30 }
  0x91   :  { %v34_v8 = vmul.f32 0.03125, %v31_v7  ;;  %v37_v9 = vmul.f32 %v35_v6, %v35_v6 }
  0x93   :  { %v36_v10 = vsub.f32 %v22_v1, %v34_v8  ;;  %v39_v11 = vsel %vm25_vm0, %v37_v9, 0.0 }
  0x94   :  { %40 = vadd.xlane.f32.xlu1 %v39_v11 }
  0x95   :  { %v38_v12 = vmul.f32 %v36_v10, %v36_v10 }
  0x97   :  { %v42_v13 = vsel %vm25_vm0, %v38_v12, 0.0 }
  0x98   :  { %43 = vadd.xlane.f32.xlu1 %v42_v13 }
 0x11d   :  { %v41_v17 = vpop.xlane.xlu1 %40 }
 0x11e   :  { %v45_v18 = vmul.f32 0.03125, %v41_v17 }
 0x120   :  { %v47_v19 = vadd.f32 1e-05, %v45_v18 }
 0x121   :  { %v44_v20 = vpop.xlane.xlu1 %43 }
 0x122   :  { %164 = vrsqrt.f32 %v47_v19  ;;  %v46_v21 = vmul.f32 0.03125, %v44_v20 }
 0x124   :  { %v48_v22 = vadd.f32 1e-05, %v46_v21 }
 0x126   :  { %166 = vrsqrt.f32 %v48_v22 }
 0x12f   :  { %v165_v23 = vpop.eup %164 }
 0x130   :  { %v51_v24 = vmul.f32 %v165_v23, %v35_v6 }
 0x132   :  { %v59_v28 = vmul.f32 %v143_v25, %v51_v24 }
 0x133   :  { %v167_v26 = vpop.eup %166 }
 0x134   :  { %v52_v27 = vmul.f32 %v167_v26, %v36_v10  ;;  %v67_v31 = vadd.f32 %v144_v29, %v59_v28 }
 0x136   :  { %v60_v30 = vmul.f32 %v143_v25, %v52_v27 }
 0x138   :  { %v68_v32 = vadd.f32 %v144_v29, %v60_v30 }
 0x13a   :  { %v69_v33 = vpack.c.bf16 %v68_v32, %v67_v31 }
 0x13c   :  { %157 = vmatmul.mubr.msk.bf16.vlgmr.msra.gmra.mxu0 %vm25_vm0, %v69_v33 }
 0x1fc   :  { %v130_v35 = vpop.f32.mrf.mxu0 }
 0x1fd   :  { %v131_v36 = vadd.f32 %v145_v34, %v130_v35 }
 0x1fe   :  { %v158_v37 = vpop.f32.mrf.mxu0 }
 0x1ff   :  { %137 = vst [vmem:[%s237_s5] sm:$0xff] %v131_v36 }
 0x200   :  { %v133_v38 = vpop.f32.mrf.mxu0 }
 0x201   :  { %v134_v39 = vadd.f32 %v145_v34, %v133_v38 }
 0x202   :  { %v159_v40 = vpop.f32.mrf.mxu0 }
 0x203   :  { %138 = vst [vmem:[%s237_s5 + $0x8] sm:$0xff] %v134_v39 }

// kernel: transformer_forward.6
= control target key start
LH: loop header
LB: loop body
LE: loop exit
PB: predicated region body
PF: predicated region fallthrough
CT: control target
= control target key end

     0   :  { %v2080_v0 = vmov 0.0   ;;  %vm2081_vm0 = vmmov 0   ;;  %vm71_vm1 = vcmask 261120   ;;  %s2083_s17 = smov 120   ;;  %s2084_s18 = smov 104   ;;  %vm132_vm2 = vcmask 64512   ;;  %s2425_s1 = inlined_call_operand.vmem [shape: bf16[32,96], index: 1, kind: input, shape index: {}]   ;;  %s2426_s0 = inlined_call_operand.vmem [shape: f32[16,32], index: 0, kind: input, shape index: {}]   ;;  %s2427_s2 = inlined_call_operand.vmem [shape: f32[1,96], index: 2, kind: input, shape index: {}]   ;;  %s2428_s3 = inlined_call_operand.vmem [shape: bf16[32,32], index: 3, kind: input, shape index: {}]   ;;  %s2429_s4 = inlined_call_operand.vmem [shape: f32[1,32], index: 4, kind: input, shape index: {}]   ;;  %s2430_s5 = inlined_call_operand.vmem [shape: bf16[32,64], index: 5, kind: input, shape index: {}]   ;;  %s2431_s7 = inlined_call_operand.vmem [shape: bf16[64,32], index: 7, kind: input, shape index: {}]   ;;  %s2432_s9 = inlined_call_operand.vmem [shape: f32[1,32], index: 9, kind: input, shape index: {}]   ;;  %s2433_s10 = inlined_call_operand.vmem [shape: f32[1,32], index: 10, kind: input, shape index: {}]   ;;  %s2434_s6 = inlined_call_operand.vmem [shape: f32[1,64], index: 6, kind: input, shape index: {}]   ;;  %s2435_s8 = inlined_call_operand.vmem [shape: f32[1,32], index: 8, kind: input, shape index: {}]   ;;  %s2436_s11 = inlined_call_operand.vmem [shape: f32[1,32], index: 11, kind: input, shape index: {}]   ;;  %s2437_s12 = inlined_call_operand.vmem [shape: f32[1,32], index: 12, kind: input, shape index: {}]   ;;  %s2438_s13 = inlined_call_operand.vmem [shape: f32[16,32], index: 13, kind: output, shape index: {}]  }
   0x1   :  { %1889 = vmatprep.subr.bf16.mxu0 %v2080_v0  ;;  %v2030_v1 = vld [vmem:[%s2425_s1 + $0x8] sm:$0xff]   ;;  %1893 = vmatprep.mubr.msk.bf16.mxu0 %vm2081_vm0, %v2080_v0  ;;  %v2031_v2 = vld [vmem:[%s2425_s1] sm:$0xff]   ;;  %s2086_s19 = smov 64   ;;  %s2087_s24 = smov 8   ;;  %vm1469_vm3 = vcmask 130048   ;;  %vm1472_vm4 = vcmask 195584  }
   0x2   :  { %1902 = vmatprep.subr.mxu1 %v2080_v0  ;;  %1904 = vmatprep.mubr.msk.f32.mxu1 %vm2081_vm0, %v2080_v0  ;;  %v2175_v3 = vld [vmem:[%s2426_s0] sm:$0xff]  ;;  %v2180_v4 = vld [vmem:[%s2426_s0 + $0x8] sm:$0xff]  ;;  %s2082_s0 = smov 112   ;;  %s2088_s25 = smov 16   ;;  %vm1700_vm5 = vcmask 523264  }
   0x3   :  { %1890 = vmatpush3.bf16.msra.mxu0 %v2030_v1  ;;  %v52_v5 = vpack.c.bf16 %v2180_v4, %v2175_v3  ;;  %v1797_v6 = vld [vmem:[%s2427_s2] ss:$0 sm:$0xff]  ;;  %s2085_s2 = smov 96  }
   0x4   :  { %1891 = vmatprep.subr.bf16.mxu0 %v2080_v0 }
   0x7   :  { %1892 = vmatpush3.bf16.msra.mxu0 %v2031_v2 }
   0x8   :  { %1897 = vmatprep.subr.mxu0 %v2080_v0 }
   0xa   :  { %1894 = vmatmul.mubr.msk.bf16.vlgmr.msra.gmra.mxu0 %vm71_vm1, %v52_v5 }
   0xb   :  { %1899 = vmatprep.mubr.msk.f32.mxu0 %vm2081_vm0, %v2080_v0 }
  0xca   :  { %v109_v7 = vpop.f32.mrf.mxu0 }
  0xcb   :  { %v2192_v8 = vadd.f32 %v1797_v6, %v109_v7 }
  0xcc   :  { %v1895_v9 = vpop.f32.mrf.mxu0 }
  0xcd   :  { %122 = vrot.lane.b32.xlu1 %v2192_v8, %s2082_s0  ;;  %118 = vrot.lane.b32.xlu0 %v2192_v8, %s2083_s17 }
  0xce   :  { %v112_v10 = vpop.f32.mrf.mxu0 }
  0xcf   :  { %v2196_v11 = vadd.f32 %v1797_v6, %v112_v10 }
  0xd0   :  { %v1896_v12 = vpop.f32.mrf.mxu0 }
  0xd1   :  { %124 = vrot.lane.b32.xlu1 %v2196_v11, %s2082_s0  ;;  %120 = vrot.lane.b32.xlu0 %v2196_v11, %s2083_s17 }
  0xd5   :  { %128 = vrot.lane.b32.xlu1 %v2196_v11, %s2084_s18  ;;  %126 = vrot.lane.b32.xlu0 %v2192_v8, %s2084_s18 }
  0xd9   :  { %207 = vrot.lane.b32.xlu1 %v2196_v11, %s2085_s2  ;;  %130 = vrot.lane.b32.xlu0 %v2192_v8, %s2085_s2 }
 0x13f   :  { %v2204_v13 = vpop.permute.xlu1 %122  ;;  %v2206_v14 = vpop.permute.xlu0 %118 }
 0x140   :  { %283 = vrot.lane.b32.xlu0 %v2206_v14, %s2085_s2 }
 0x143   :  { %v2209_v15 = vpop.permute.xlu1 %124  ;;  %v2211_v16 = vpop.permute.xlu0 %120 }
 0x144   :  { %435 = vrot.lane.b32.xlu0 %v2204_v13, %s2085_s2  ;;  %359 = vrot.lane.b32.xlu1 %v2211_v16, %s2085_s2 }
 0x147   :  { %v2215_v17 = vpop.permute.xlu1 %128  ;;  %v2217_v18 = vpop.permute.xlu0 %126 }
 0x148   :  { %511 = vrot.lane.b32.xlu1 %v2209_v15, %s2085_s2  ;;  %587 = vrot.lane.b32.xlu0 %v2217_v18, %s2085_s2 }
 0x14b   :  { %v208_v19 = vpop.permute.xlu1 %207  ;;  %v131_v20 = vpop.permute.xlu0 %130 }
 0x14c   :  { %1903 = vmatpush3.xpose.msk.msra.mxu1 %vm132_vm2, %v208_v19  ;;  %663 = vrot.lane.b32.xlu1 %v2215_v17, %s2085_s2 }
 0x14d   :  { %1898 = vmatpush3.xpose.msk.msra.mxu0 %vm132_vm2, %v131_v20  ;;  %1907 = vmatprep.subr.mxu1 %v2080_v0 }
 0x14e   :  { %1912 = vmatprep.subr.mxu0 %v2080_v0 }
 0x14f   :  { %1905 = vmatmul.mubr.msk.f32.vlgmr.msra.gmra.mxu1 %vm132_vm2, %v2196_v11 }
 0x150   :  { %1900 = vmatmul.mubr.msk.f32.vlgmr.msra.gmra.mxu0 %vm132_vm2, %v2192_v8  ;;  %1909 = vmatprep.mubr.msk.f32.mxu1 %vm2081_vm0, %v2080_v0 }
 0x151   :  { %1914 = vmatprep.mubr.msk.f32.mxu0 %vm2081_vm0, %v2080_v0 }
 0x1b2   :  { %v284_v21 = vpop.permute.xlu0 %283 }
 0x1b3   :  { %1908 = vmatpush3.xpose.msk.msra.mxu1 %vm132_vm2, %v284_v21 }
 0x1b4   :  { %1917 = vmatprep.subr.mxu1 %v2080_v0 }
 0x1b6   :  { %v360_v22 = vpop.permute.xlu1 %359  ;;  %1910 = vmatmul.mubr.msk.f32.vlgmr.msra.gmra.mxu1 %vm132_vm2, %v2206_v14  ;;  %v436_v23 = vpop.permute.xlu0 %435 }
 0x1b7   :  { %1913 = vmatpush3.xpose.msk.msra.mxu0 %vm132_vm2, %v360_v22  ;;  %1918 = vmatpush3.xpose.msk.msra.mxu1 %vm132_vm2, %v436_v23 }
 0x1b8   :  { %1919 = vmatprep.mubr.msk.f32.mxu1 %vm2081_vm0, %v2080_v0  ;;  %1922 = vmatprep.subr.mxu0 %v2080_v0 }
 0x1b9   :  { %1927 = vmatprep.subr.mxu1 %v2080_v0 }
 0x1ba   :  { %v512_v24 = vpop.permute.xlu1 %511  ;;  %1915 = vmatmul.mubr.msk.f32.vlgmr.msra.gmra.mxu0 %vm132_vm2, %v2211_v16  ;;  %1920 = vmatmul.mubr.msk.f32.vlgmr.msra.gmra.mxu1 %vm132_vm2, %v2204_v13  ;;  %v588_v25 = vpop.permute.xlu0 %587 }
 0x1bb   :  { %1923 = vmatpush3.xpose.msk.msra.mxu0 %vm132_vm2, %v512_v24  ;;  %1928 = vmatpush3.xpose.msk.msra.mxu1 %vm132_vm2, %v588_v25 }
 0x1bc   :  { %1924 = vmatprep.mubr.msk.f32.mxu0 %vm2081_vm0, %v2080_v0  ;;  %1929 = vmatprep.mubr.msk.f32.mxu1 %vm2081_vm0, %v2080_v0 }
 0x1bd   :  { %1932 = vmatprep.subr.mxu0 %v2080_v0  ;;  %1937 = vmatprep.subr.mxu1 %v2080_v0 }
 0x1be   :  { %v664_v26 = vpop.permute.xlu1 %663  ;;  %1925 = vmatmul.mubr.msk.f32.vlgmr.msra.gmra.mxu0 %vm132_vm2, %v2209_v15  ;;  %1930 = vmatmul.mubr.msk.f32.vlgmr.msra.gmra.mxu1 %vm132_vm2, %v2217_v18 }
 0x1bf   :  { %1933 = vmatpush3.xpose.msk.msra.mxu0 %vm132_vm2, %v664_v26  ;;  %1934 = vmatprep.mubr.msk.f32.mxu0 %vm2081_vm0, %v2080_v0 }
 0x1c0   :  { %1942 = vmatprep.subr.mxu0 %v2080_v0  ;;  %1939 = vmatprep.mubr.msk.f32.mxu1 %vm2081_vm0, %v2080_v0 }
 0x1c2   :  { %1935 = vmatmul.mubr.msk.f32.vlgmr.msra.gmra.mxu0 %vm132_vm2, %v2215_v17 }
 0x1c3   :  { %1944 = vmatprep.mubr.msk.f32.mxu0 %vm2081_vm0, %v2080_v0 }
 0x20f   :  { %v279_v27 = vpop.f32.mrf.mxu1 }
 0x210   :  { %v203_v28 = vpop.f32.mrf.mxu0  ;;  %v740_v29 = vmul.f32 0.35355338, %v279_v27 }
 0x211   :  { %v739_v30 = vmul.f32 0.35355338, %v203_v28  ;;  %v1906_v31 = vpop.f32.mrf.mxu1 }
 0x212   :  { %v1901_v32 = vpop.f32.mrf.mxu0  ;;  %v750_v33 = vsel %vm132_vm2, %v740_v29, -inf }
 0x213   :  { %751 = vmax.xlane.f32.xlu1 %v750_v33  ;;  %v747_v34 = vsel %vm132_vm2, %v739_v30, -inf }
 0x214   :  { %748 = vmax.xlane.f32.xlu0 %v747_v34 }
 0x276   :  { %v355_v35 = vpop.f32.mrf.mxu1 }
 0x277   :  { %v741_v36 = vmul.f32 0.35355338, %v355_v35 }
 0x278   :  { %v1911_v37 = vpop.f32.mrf.mxu1 }
 0x279   :  { %v753_v38 = vsel %vm132_vm2, %v741_v36, -inf }
 0x27a   :  { %v507_v39 = vpop.f32.mrf.mxu1  ;;  %754 = vmax.xlane.f32.xlu0 %v753_v38  ;;  %v431_v40 = vpop.f32.mrf.mxu0 }
 0x27b   :  { %v743_v41 = vmul.f32 0.35355338, %v507_v39  ;;  %v742_v42 = vmul.f32 0.35355338, %v431_v40 }
 0x27c   :  { %v1916_v43 = vpop.f32.mrf.mxu0  ;;  %v1921_v44 = vpop.f32.mrf.mxu1 }
 0x27d   :  { %v759_v45 = vsel %vm132_vm2, %v743_v41, -inf  ;;  %v756_v46 = vsel %vm132_vm2, %v742_v42, -inf }
 0x27e   :  { %760 = vmax.xlane.f32.xlu1 %v759_v45  ;;  %v659_v47 = vpop.f32.mrf.mxu1  ;;  %757 = vmax.xlane.f32.xlu0 %v756_v46  ;;  %v583_v48 = vpop.f32.mrf.mxu0 }
 0x27f   :  { %v745_v49 = vmul.f32 0.35355338, %v659_v47  ;;  %v744_v50 = vmul.f32 0.35355338, %v583_v48 }
 0x280   :  { %v1926_v51 = vpop.f32.mrf.mxu0  ;;  %v1931_v52 = vpop.f32.mrf.mxu1 }
 0x281   :  { %v765_v53 = vsel %vm132_vm2, %v745_v49, -inf  ;;  %v762_v54 = vsel %vm132_vm2, %v744_v50, -inf }
 0x282   :  { %766 = vmax.xlane.f32.xlu1 %v765_v53  ;;  %763 = vmax.xlane.f32.xlu0 %v762_v54  ;;  %v735_v55 = vpop.f32.mrf.mxu0 }
 0x283   :  { %v746_v56 = vmul.f32 0.35355338, %v735_v55 }
 0x284   :  { %v1936_v57 = vpop.f32.mrf.mxu0 }
 0x285   :  { %v768_v58 = vsel %vm132_vm2, %v746_v56, -inf }
 0x286   :  { %769 = vmax.xlane.f32.xlu0 %v768_v58 }
 0x293   :  { %835 = vrot.lane.b32.xlu1 %v2192_v8, %s2086_s19 }
 0x297   :  { %987 = vrot.lane.b32.xlu1 %v2206_v14, %s2086_s19 }
 0x29b   :  { %1063 = vrot.lane.b32.xlu1 %v2211_v16, %s2086_s19 }
 0x29c   :  { %911 = vrot.lane.b32.xlu0 %v2196_v11, %s2086_s19  ;;  %v752_v59 = vpop.xlane.xlu1 %751 }
 0x29d   :  { %v772_v60 = vsub.f32 %v740_v29, %v752_v59  ;;  %v749_v61 = vpop.xlane.xlu0 %748 }
 0x29e   :  { %v771_v63 = vsub.f32 %v739_v30, %v749_v61 }
 0x29f   :  { %1215 = vrot.lane.b32.xlu1 %v2209_v15, %s2086_s19  ;;  %v781_v62 = vmul.f32 1.442695, %v772_v60 }
 0x2a0   :  { %1139 = vrot.lane.b32.xlu0 %v2204_v13, %s2086_s19  ;;  %v779_v1 = vmul.f32 1.442695, %v771_v63 }
 0x2a1   :  { %2040 = vpow2.f32 %v781_v62 }
 0x2a2   :  { %2042 = vpow2.f32 %v779_v1 }
 0x2ae   :  { %v2290_v2 = vpop.eup %2040 }
 0x2af   :  { %v798_v5 = vsel %vm132_vm2, %v2290_v2, 0.0  ;;  %v2294_v6 = vpop.eup %2042 }
 0x2b0   :  { %v795_v7 = vsel %vm132_vm2, %v2294_v6, 0.0 }
 0x2bf   :  { %799 = vadd.xlane.f32.xlu0 %v798_v5 }
 0x2c3   :  { %796 = vadd.xlane.f32.xlu1 %v795_v7 }
 0x303   :  { %v755_v8 = vpop.xlane.xlu0 %754 }
 0x304   :  { %v773_v9 = vsub.f32 %v741_v36, %v755_v8 }
 0x306   :  { %v783_v10 = vmul.f32 1.442695, %v773_v9 }
 0x307   :  { %v761_v11 = vpop.xlane.xlu1 %760  ;;  %v758_v12 = vpop.xlane.xlu0 %757 }
 0x308   :  { %2044 = vpow2.f32 %v783_v10  ;;  %v775_v13 = vsub.f32 %v743_v41, %v761_v11  ;;  %v774_v14 = vsub.f32 %v742_v42, %v758_v12 }
 0x30a   :  { %v787_v15 = vmul.f32 1.442695, %v775_v13  ;;  %v785_v16 = vmul.f32 1.442695, %v774_v14  ;;  %v2032_v14 = vld [vmem:[%s2428_s3 + $0x8] sm:$0xff]  }
 0x30b   :  { %v767_v19 = vpop.xlane.xlu1 %766  ;;  %v764_v20 = vpop.xlane.xlu0 %763 }
 0x30c   :  { %2046 = vpow2.f32 %v787_v15  ;;  %v777_v21 = vsub.f32 %v745_v49, %v767_v19  ;;  %v776_v22 = vsub.f32 %v744_v50, %v764_v20  ;;  %v2033_v19 = vld [vmem:[%s2428_s3] sm:$0xff]   ;;  %s2089_s3 = smov 24  }
 0x30d   :  { %2048 = vpow2.f32 %v785_v16 }
 0x30e   :  { %v791_v23 = vmul.f32 1.442695, %v777_v21  ;;  %v789_v24 = vmul.f32 1.442695, %v776_v22 }
 0x30f   :  { %v836_v25 = vpop.permute.xlu1 %835  ;;  %v770_v26 = vpop.xlane.xlu0 %769 }
 0x310   :  { %2050 = vpow2.f32 %v791_v23  ;;  %v778_v27 = vsub.f32 %v746_v56, %v770_v26  ;;  %1938 = vmatpush3.msra.mxu1 %v836_v25 }
 0x311   :  { %2052 = vpow2.f32 %v789_v24  ;;  %1947 = vmatprep.subr.mxu1 %v2080_v0 }
 0x312   :  { %v793_v28 = vmul.f32 1.442695, %v778_v27 }
 0x313   :  { %v912_v29 = vpop.permute.xlu0 %911  ;;  %v988_v42 = vpop.permute.xlu1 %987 }
 0x314   :  { %2054 = vpow2.f32 %v793_v28  ;;  %1943 = vmatpush3.msra.mxu0 %v912_v29 }
 0x315   :  { %v2045_v30 = vpop.eup %2044  ;;  %1952 = vmatprep.subr.mxu0 %v2080_v0 }
 0x316   :  { %v801_v31 = vsel %vm132_vm2, %v2045_v30, 0.0 }
 0x317   :  { %802 = vadd.xlane.f32.xlu1 %v801_v31  ;;  %v1064_v43 = vpop.permute.xlu1 %1063  ;;  %v1140_v44 = vpop.permute.xlu0 %1139 }
 0x319   :  { %v2047_v32 = vpop.eup %2046 }
 0x31a   :  { %v2049_v33 = vpop.eup %2048  ;;  %v807_v34 = vsel %vm132_vm2, %v2047_v32, 0.0 }
 0x31b   :  { %808 = vadd.xlane.f32.xlu1 %v807_v34  ;;  %v804_v35 = vsel %vm132_vm2, %v2049_v33, 0.0  ;;  %v1216_v45 = vpop.permute.xlu1 %1215 }
 0x31c   :  { %805 = vadd.xlane.f32.xlu0 %v804_v35 }
 0x31d   :  { %v2051_v36 = vpop.eup %2050 }
 0x31e   :  { %v2303_v37 = vpop.eup %2052  ;;  %v813_v38 = vsel %vm132_vm2, %v2051_v36, 0.0 }
 0x31f   :  { %814 = vadd.xlane.f32.xlu1 %v813_v38  ;;  %v810_v39 = vsel %vm132_vm2, %v2303_v37, 0.0 }
 0x320   :  { %811 = vadd.xlane.f32.xlu0 %v810_v39 }
 0x321   :  { %v2308_v40 = vpop.eup %2054 }
 0x322   :  { %v816_v41 = vsel %vm132_vm2, %v2308_v40, 0.0 }
 0x324   :  { %817 = vadd.xlane.f32.xlu0 %v816_v41 }
 0x330   :  { %1367 = vrot.lane.b32.xlu1 %v2215_v17, %s2086_s19 }
 0x33a   :  { %1291 = vrot.lane.b32.xlu0 %v2217_v18, %s2086_s19 }
 0x348   :  { %v800_v46 = vpop.xlane.xlu0 %799 }
 0x349   :  { %2056 = vrcp.f32 %v800_v46 }
 0x34c   :  { %v797_v47 = vpop.xlane.xlu1 %796 }
 0x34d   :  { %2058 = vrcp.f32 %v797_v47 }
 0x356   :  { %v2057_v48 = vpop.eup %2056 }
 0x357   :  { %v828_v49 = vmul.f32 %v2057_v48, %v2290_v2  ;;  %v1825_v48 = vld [vmem:[%s2429_s4] ss:$0 sm:$0xff] }
 0x359   :  { %1945 = vmatmul.mubr.msk.f32.vlgmr.msra.gmra.mxu0 %vm132_vm2, %v828_v49 }
 0x35a   :  { %v2059_v50 = vpop.eup %2058  ;;  %1953 = vmatpush3.msra.mxu0 %v1064_v43  ;;  %1954 = vmatprep.mubr.msk.f32.mxu0 %vm2081_vm0, %v2080_v0 }
 0x35b   :  { %v827_v17 = vmul.f32 %v2059_v50, %v2294_v6  ;;  %1962 = vmatprep.subr.mxu0 %v2080_v0 }
 0x35d   :  { %1940 = vmatmul.mubr.msk.f32.vlgmr.msra.gmra.mxu1 %vm132_vm2, %v827_v17 }
 0x35e   :  { %1948 = vmatpush3.msra.mxu1 %v988_v42  ;;  %1949 = vmatprep.mubr.msk.f32.mxu1 %vm2081_vm0, %v2080_v0 }
 0x35f   :  { %1957 = vmatprep.subr.mxu1 %v2080_v0 }
 0x3a0   :  { %v803_v18 = vpop.xlane.xlu1 %802 }
 0x3a1   :  { %2060 = vrcp.f32 %v803_v18 }
 0x3a4   :  { %v809_v51 = vpop.xlane.xlu1 %808 }
 0x3a5   :  { %2062 = vrcp.f32 %v809_v51  ;;  %v806_v52 = vpop.xlane.xlu0 %805 }
 0x3a6   :  { %2064 = vrcp.f32 %v806_v52 }
 0x3a8   :  { %v815_v53 = vpop.xlane.xlu1 %814 }
 0x3a9   :  { %2066 = vrcp.f32 %v815_v53  ;;  %v812_v54 = vpop.xlane.xlu0 %811 }
 0x3aa   :  { %2068 = vrcp.f32 %v812_v54 }
 0x3ac   :  { %v1368_v6 = vpop.permute.xlu1 %1367 }
 0x3ad   :  { %v818_v55 = vpop.xlane.xlu0 %817 }
 0x3ae   :  { %v2061_v56 = vpop.eup %2060  ;;  %2070 = vrcp.f32 %v818_v55 }
 0x3af   :  { %v829_v57 = vmul.f32 %v2061_v56, %v2045_v30 }
 0x3b1   :  { %1950 = vmatmul.mubr.msk.f32.vlgmr.msra.gmra.mxu1 %vm132_vm2, %v829_v57  ;;  %v1292_v62 = vpop.permute.xlu0 %1291 }
 0x3b2   :  { %v2063_v58 = vpop.eup %2062  ;;  %1958 = vmatpush3.msra.mxu1 %v1140_v44  ;;  %1959 = vmatprep.mubr.msk.f32.mxu1 %vm2081_vm0, %v2080_v0 }
 0x3b3   :  { %v2065_v59 = vpop.eup %2064  ;;  %1967 = vmatprep.subr.mxu1 %v2080_v0  ;;  %v831_v60 = vmul.f32 %v2063_v58, %v2047_v32 }
 0x3b4   :  { %v830_v61 = vmul.f32 %v2065_v59, %v2049_v33 }
 0x3b5   :  { %1960 = vmatmul.mubr.msk.f32.vlgmr.msra.gmra.mxu1 %vm132_vm2, %v831_v60 }
 0x3b6   :  { %v2067_v63 = vpop.eup %2066  ;;  %1955 = vmatmul.mubr.msk.f32.vlgmr.msra.gmra.mxu0 %vm132_vm2, %v830_v61  ;;  %1968 = vmatpush3.msra.mxu1 %v1292_v62 }
 0x3b7   :  { %v2069_v1 = vpop.eup %2068  ;;  %1963 = vmatpush3.msra.mxu0 %v1216_v45  ;;  %1964 = vmatprep.mubr.msk.f32.mxu0 %vm2081_vm0, %v2080_v0  ;;  %v833_v2 = vmul.f32 %v2067_v63, %v2051_v36 }
 0x3b8   :  { %1969 = vmatprep.mubr.msk.f32.mxu1 %vm2081_vm0, %v2080_v0  ;;  %1972 = vmatprep.subr.mxu0 %v2080_v0  ;;  %v832_v5 = vmul.f32 %v2069_v1, %v2303_v37 }
 0x3b9   :  { %1970 = vmatmul.mubr.msk.f32.vlgmr.msra.gmra.mxu1 %vm132_vm2, %v833_v2  ;;  %1977 = vmatprep.subr.bf16.mxu1 %v2080_v0 }
 0x3ba   :  { %1965 = vmatmul.mubr.msk.f32.vlgmr.msra.gmra.mxu0 %vm132_vm2, %v832_v5  ;;  %1981 = vmatprep.mubr.msk.bf16.mxu1 %vm2081_vm0, %v2080_v0  ;;  %v2035_v5 = vld [vmem:[%s2430_s5] sm:$0xff]  }
 0x3bb   :  { %v2071_v7 = vpop.eup %2070  ;;  %1973 = vmatpush3.msra.mxu0 %v1368_v6  ;;  %1974 = vmatprep.mubr.msk.f32.mxu0 %vm2081_vm0, %v2080_v0  ;;  %v2036_v6 = vld [vmem:[%s2431_s7 + $0x18] sm:$0xff]  }
 0x3bc   :  { %v834_v8 = vmul.f32 %v2071_v7, %v2308_v40  ;;  %1985 = vmatprep.subr.bf16.mxu0 %v2080_v0  ;;  %1978 = vmatpush3.bf16.msra.mxu1 %v2032_v14 }
 0x3bd   :  { %1979 = vmatprep.subr.bf16.mxu1 %v2080_v0 }
 0x3be   :  { %1975 = vmatmul.mubr.msk.f32.vlgmr.msra.gmra.mxu0 %vm132_vm2, %v834_v8 }
 0x3bf   :  { %1989 = vmatprep.mubr.msk.bf16.mxu0 %vm2081_vm0, %v2080_v0 }
 0x3c0   :  { %1980 = vmatpush3.bf16.msra.mxu1 %v2033_v19 }
 0x3c1   :  { %1993 = vmatprep.subr.bf16.mxu1 %v2080_v0 }
 0x419   :  { %v983_v9 = vpop.f32.mrf.mxu0 }
 0x41b   :  { %v1946_v10 = vpop.f32.mrf.mxu0 }
 0x41d   :  { %v907_v11 = vpop.f32.mrf.mxu1 }
 0x41f   :  { %v1941_v12 = vpop.f32.mrf.mxu1 }
 0x471   :  { %v1059_v13 = vpop.f32.mrf.mxu1 }
 0x473   :  { %v1951_v15 = vpop.f32.mrf.mxu1 }
 0x474   :  { %v1829_v15 = vld [vmem:[%s2432_s9] ss:$0 sm:$0xff] }
 0x475   :  { %v1211_v16 = vpop.f32.mrf.mxu1 }
 0x476   :  { %v1135_v20 = vpop.f32.mrf.mxu0 }
 0x477   :  { %v2015_v21 = vpack.i.bf16 %v1135_v20, %v1059_v13  ;;  %v1961_v22 = vpop.f32.mrf.mxu1 }
 0x478   :  { %v1956_v23 = vpop.f32.mrf.mxu0 }
 0x479   :  { %2016 = vrot.lane.b32.xlu0 %v2015_v21, %s2087_s24  ;;  %v1363_v24 = vpop.f32.mrf.mxu1  ;;  %v1830_v21 = vld [vmem:[%s2433_s10] ss:$0 sm:$0xff] }
 0x47a   :  { %v1287_v25 = vpop.f32.mrf.mxu0 }
 0x47b   :  { %v2020_v26 = vpack.i.bf16 %v1287_v25, %v1211_v16  ;;  %v1971_v27 = vpop.f32.mrf.mxu1 }
 0x47c   :  { %v1966_v28 = vpop.f32.mrf.mxu0  ;;  %v2038_v27 = vld [vmem:[%s2431_s7 + $0x8] sm:$0xff]  }
 0x47d   :  { %2021 = vrot.lane.b32.xlu1 %v2020_v26, %s2088_s25  ;;  %v2037_v26 = vld [vmem:[%s2431_s7 + $0x10] sm:$0xff]   ;;  %v2039_v28 = vld [vmem:[%s2431_s7] sm:$0xff]  }
 0x47e   :  { %v1439_v29 = vpop.f32.mrf.mxu0 }
 0x47f   :  { %v2025_v30 = vpack.i.bf16 %v1439_v29, %v1363_v24  ;;  %v1831_v29 = vld [vmem:[%s2434_s6] ss:$0 sm:$0xff] }
 0x480   :  { %v1976_v31 = vpop.f32.mrf.mxu0 }
 0x481   :  { %2026 = vrot.lane.b32.xlu0 %v2025_v30, %s2089_s3 }
 0x4eb   :  { %v2017_v32 = vpop.permute.xlu0 %2016 }
 0x4ec   :  { %v2019_v34 = vunpack.i.h.bf16 %v2017_v32  ;;  %v2018_v35 = vunpack.i.l.bf16 %v2017_v32 }
 0x4ee   :  { %v1468_v39 = vsel %vm132_vm2, %v983_v9, %v2019_v34  ;;  %v1467_v40 = vsel %vm132_vm2, %v907_v11, %v2018_v35 }
 0x4ef   :  { %v2022_v33 = vpop.permute.xlu1 %2021 }
 0x4f0   :  { %v2024_v36 = vunpack.i.h.bf16 %v2022_v33  ;;  %v2023_v37 = vunpack.i.l.bf16 %v2022_v33 }
 0x4f2   :  { %v1471_v43 = vsel %vm1469_vm3, %v1468_v39, %v2024_v36  ;;  %v1470_v44 = vsel %vm1469_vm3, %v1467_v40, %v2023_v37 }
 0x4f3   :  { %v2027_v38 = vpop.permute.xlu0 %2026 }
 0x4f4   :  { %v2029_v41 = vunpack.i.h.bf16 %v2027_v38  ;;  %v2028_v42 = vunpack.i.l.bf16 %v2027_v38 }
 0x4f6   :  { %v1474_v45 = vsel %vm1472_vm4, %v1471_v43, %v2029_v41  ;;  %v1473_v46 = vsel %vm1472_vm4, %v1470_v44, %v2028_v42 }
 0x4f7   :  { %v1480_v47 = vpack.c.bf16 %v1474_v45, %v1473_v46 }
 0x4f9   :  { %1982 = vmatmul.mubr.msk.bf16.vlgmr.msra.gmra.mxu1 %vm71_vm1, %v1480_v47 }
 0x4fa   :  { %2001 = vmatprep.mubr.msk.bf16.mxu1 %vm2081_vm0, %v2080_v0  ;;  %1994 = vmatpush3.bf16.msra.mxu1 %v2036_v6 }
 0x4fb   :  { %1995 = vmatprep.subr.bf16.mxu1 %v2080_v0 }
 0x4fe   :  { %1996 = vmatpush3.bf16.msra.mxu1 %v2037_v26 }
 0x4ff   :  { %1997 = vmatprep.subr.bf16.mxu1 %v2080_v0 }
 0x502   :  { %1998 = vmatpush3.bf16.msra.mxu1 %v2038_v27 }
 0x503   :  { %1999 = vmatprep.subr.bf16.mxu1 %v2080_v0 }
 0x506   :  { %2000 = vmatpush3.bf16.msra.mxu1 %v2039_v28 }
 0x5b9   :  { %v1536_v49 = vpop.f32.mrf.mxu1 }
 0x5ba   :  { %v1537_v50 = vadd.f32 %v1825_v48, %v1536_v49 }
 0x5bb   :  { %v1983_v17 = vpop.f32.mrf.mxu1 }
 0x5bc   :  { %v1543_v18 = vadd.f32 %v1537_v50, %v2175_v3 }
 0x5bd   :  { %v1539_v51 = vpop.f32.mrf.mxu1 }
 0x5be   :  { %v1540_v52 = vadd.f32 %v1825_v48, %v1539_v51  ;;  %v1547_v53 = vsel %vm71_vm1, %v1543_v18, 0.0 }
 0x5bf   :  { %1548 = vadd.xlane.f32.xlu1 %v1547_v53  ;;  %v1984_v54 = vpop.f32.mrf.mxu1 }
 0x5c0   :  { %v1544_v55 = vadd.f32 %v1540_v52, %v2180_v4  ;;  %v2034_v4 = vld [vmem:[%s2430_s5 + $0x8] sm:$0xff]  }
 0x5c1   :  { %1986 = vmatpush3.bf16.msra.mxu0 %v2034_v4 }
 0x5c2   :  { %v1550_v56 = vsel %vm71_vm1, %v1544_v55, 0.0  ;;  %1987 = vmatprep.subr.bf16.mxu0 %v2080_v0  ;;  %v1835_v0 = vld [vmem:[%s2435_s8] ss:$0 sm:$0xff] }
 0x5c3   :  { %1551 = vadd.xlane.f32.xlu0 %v1550_v56 }
 0x5c5   :  { %1988 = vmatpush3.bf16.msra.mxu0 %v2035_v5 }
 0x648   :  { %v1549_v57 = vpop.xlane.xlu1 %1548 }
 0x649   :  { %v1554_v58 = vmul.f32 0.03125, %v1549_v57 }
 0x64b   :  { %v1556_v59 = vsub.f32 %v1543_v18, %v1554_v58 }
 0x64c   :  { %v1552_v60 = vpop.xlane.xlu0 %1551 }
 0x64d   :  { %v1555_v61 = vmul.f32 0.03125, %v1552_v60  ;;  %v1558_v62 = vmul.f32 %v1556_v59, %v1556_v59 }
 0x64f   :  { %v1557_v63 = vsub.f32 %v1544_v55, %v1555_v61  ;;  %v1560_v3 = vsel %vm71_vm1, %v1558_v62, 0.0 }
 0x650   :  { %1561 = vadd.xlane.f32.xlu0 %v1560_v3  ;;  %v1841_v3 = vld [vmem:[%s2436_s11] ss:$0 sm:$0xff] }
 0x651   :  { %v1559_v1 = vmul.f32 %v1557_v63, %v1557_v63 }
 0x653   :  { %v1563_v2 = vsel %vm71_vm1, %v1559_v1, 0.0 }
 0x654   :  { %1564 = vadd.xlane.f32.xlu1 %v1563_v2  ;;  %v1842_v2 = vld [vmem:[%s2437_s12] ss:$0 sm:$0xff] }
 0x6d9   :  { %v1562_v7 = vpop.xlane.xlu0 %1561 }
 0x6da   :  { %v1566_v8 = vmul.f32 0.03125, %v1562_v7 }
 0x6dc   :  { %v1568_v9 = vadd.f32 1e-05, %v1566_v8 }
 0x6dd   :  { %v1565_v10 = vpop.xlane.xlu1 %1564 }
 0x6de   :  { %2072 = vrsqrt.f32 %v1568_v9  ;;  %v1567_v11 = vmul.f32 0.03125, %v1565_v10 }
 0x6e0   :  { %v1569_v12 = vadd.f32 1e-05, %v1567_v11 }
 0x6e2   :  { %2074 = vrsqrt.f32 %v1569_v12 }
 0x6eb   :  { %v2073_v13 = vpop.eup %2072 }
 0x6ec   :  { %v1572_v14 = vmul.f32 %v2073_v13, %v1556_v59 }
 0x6ee   :  { %v1580_v20 = vmul.f32 %v1829_v15, %v1572_v14 }
 0x6ef   :  { %v2075_v16 = vpop.eup %2074 }
 0x6f0   :  { %v1573_v19 = vmul.f32 %v2075_v16, %v1557_v63  ;;  %v1588_v23 = vadd.f32 %v1830_v21, %v1580_v20 }
 0x6f2   :  { %v1581_v22 = vmul.f32 %v1829_v15, %v1573_v19 }
 0x6f4   :  { %v1589_v24 = vadd.f32 %v1830_v21, %v1581_v22 }
 0x6f6   :  { %v1595_v25 = vpack.c.bf16 %v1589_v24, %v1588_v23 }
 0x6f8   :  { %1990 = vmatmul.mubr.msk.bf16.vlgmr.msra.gmra.mxu0 %vm71_vm1, %v1595_v25 }
 0x7b8   :  { %v1651_v30 = vpop.f32.mrf.mxu0 }
 0x7b9   :  { %v1652_v32 = vadd.f32 %v1831_v29, %v1651_v30 }
 0x7ba   :  { %v1991_v31 = vpop.f32.mrf.mxu0 }
 0x7bb   :  { %v1658_v36 = vmax.f32 %v1652_v32, 0.0 }
 0x7bc   :  { %v1654_v33 = vpop.f32.mrf.mxu0 }
 0x7bd   :  { %v1655_v34 = vadd.f32 %v1831_v29, %v1654_v33 }
 0x7be   :  { %v1992_v35 = vpop.f32.mrf.mxu0 }
 0x7bf   :  { %v1659_v37 = vmax.f32 %v1655_v34, 0.0 }
 0x7c1   :  { %v1669_v38 = vpack.c.bf16 %v1659_v37, %v1658_v36 }
 0x7c3   :  { %2002 = vmatmul.mubr.msk.bf16.vlgmr.msra.gmra.mxu1 %vm1700_vm5, %v1669_v38 }
 0x883   :  { %v1738_v39 = vpop.f32.mrf.mxu1 }
 0x884   :  { %v1739_v40 = vadd.f32 %v1835_v0, %v1738_v39 }
 0x885   :  { %v2003_v41 = vpop.f32.mrf.mxu1 }
 0x886   :  { %v1745_v42 = vadd.f32 %v1739_v40, %v1588_v23 }
 0x887   :  { %v1741_v43 = vpop.f32.mrf.mxu1 }
 0x888   :  { %v1742_v44 = vadd.f32 %v1835_v0, %v1741_v43  ;;  %v1749_v45 = vsel %vm71_vm1, %v1745_v42, 0.0 }
 0x889   :  { %1750 = vadd.xlane.f32.xlu0 %v1749_v45  ;;  %v2004_v46 = vpop.f32.mrf.mxu1 }
 0x88a   :  { %v1746_v47 = vadd.f32 %v1742_v44, %v1589_v24 }
 0x88c   :  { %v1752_v48 = vsel %vm71_vm1, %v1746_v47, 0.0 }
 0x88d   :  { %1753 = vadd.xlane.f32.xlu1 %v1752_v48 }
 0x912   :  { %v1751_v49 = vpop.xlane.xlu0 %1750 }
 0x913   :  { %v1755_v50 = vmul.f32 0.03125, %v1751_v49 }
 0x915   :  { %v1757_v17 = vsub.f32 %v1745_v42, %v1755_v50 }
 0x916   :  { %v1754_v18 = vpop.xlane.xlu1 %1753 }
 0x917   :  { %v1756_v51 = vmul.f32 0.03125, %v1754_v18  ;;  %v1759_v52 = vmul.f32 %v1757_v17, %v1757_v17 }
 0x919   :  { %v1758_v53 = vsub.f32 %v1746_v47, %v1756_v51  ;;  %v1761_v54 = vsel %vm71_vm1, %v1759_v52, 0.0 }
 0x91a   :  { %1762 = vadd.xlane.f32.xlu0 %v1761_v54 }
 0x91b   :  { %v1760_v55 = vmul.f32 %v1758_v53, %v1758_v53 }
 0x91d   :  { %v1764_v56 = vsel %vm71_vm1, %v1760_v55, 0.0 }
 0x91e   :  { %1765 = vadd.xlane.f32.xlu1 %v1764_v56 }
 0x9a3   :  { %v1763_v57 = vpop.xlane.xlu0 %1762 }
 0x9a4   :  { %v1767_v58 = vmul.f32 0.03125, %v1763_v57 }
 0x9a6   :  { %v1769_v59 = vadd.f32 1e-05, %v1767_v58 }
 0x9a7   :  { %v1766_v60 = vpop.xlane.xlu1 %1765 }
 0x9a8   :  { %2076 = vrsqrt.f32 %v1769_v59  ;;  %v1768_v61 = vmul.f32 0.03125, %v1766_v60 }
 0x9aa   :  { %v1770_v62 = vadd.f32 1e-05, %v1768_v61 }
 0x9ac   :  { %2078 = vrsqrt.f32 %v1770_v62 }
 0x9b5   :  { %v2077_v63 = vpop.eup %2076 }
 0x9b6   :  { %v1773_v1 = vmul.f32 %v2077_v63, %v1757_v17 }
 0x9b8   :  { %v1781_v4 = vmul.f32 %v1841_v3, %v1773_v1 }
 0x9b9   :  { %v2079_v5 = vpop.eup %2078 }
 0x9ba   :  { %v1789_v6 = vadd.f32 %v1842_v2, %v1781_v4  ;;  %v1774_v7 = vmul.f32 %v2079_v5, %v1758_v53 }
 0x9bc   :  { %1791 = vst.msk [vmem:[%s2438_s13] sm:$0xff] %vm71_vm1, %v1789_v6  ;;  %v1782_v8 = vmul.f32 %v1841_v3, %v1774_v7 }
 0x9be   :  { %v1790_v9 = vadd.f32 %v1842_v2, %v1782_v8 }
 0x9c0   :  { %1792 = vst.msk [vmem:[%s2438_s13 + $0x8] sm:$0xff] %vm71_vm1, %v1790_v9 }

// kernel: transformer_forward.10
= control target key start
LH: loop header
LB: loop body
LE: loop exit
PB: predicated region body
PF: predicated region fallthrough
CT: control target
= control target key end

     0   :  { %s4638_s0 = inlined_call_operand.vmem [shape: f32[16,32], index: 0, kind: input, shape index: {}]   ;;  %s4639_s1 = inlined_call_operand.vmem [shape: f32[16,32], index: 1, kind: input, shape index: {}]   ;;  %s4640_s2 = inlined_call_operand.vmem [shape: bf16[32,96], index: 2, kind: input, shape index: {}]   ;;  %s4641_s3 = inlined_call_operand.vmem [shape: f32[1,96], index: 3, kind: input, shape index: {}]   ;;  %s4642_s4 = inlined_call_operand.vmem [shape: bf16[32,32], index: 4, kind: input, shape index: {}]   ;;  %s4643_s5 = inlined_call_operand.vmem [shape: f32[1,32], index: 5, kind: input, shape index: {}]   ;;  %s4644_s6 = inlined_call_operand.vmem [shape: bf16[32,32], index: 6, kind: input, shape index: {}]   ;;  %s4645_s7 = inlined_call_operand.vmem [shape: f32[1,32], index: 7, kind: input, shape index: {}]   ;;  %s4646_s8 = inlined_call_operand.vmem [shape: bf16[32,64], index: 8, kind: input, shape index: {}]   ;;  %s4647_s9 = inlined_call_operand.vmem [shape: f32[1,64], index: 9, kind: input, shape index: {}]   ;;  %s4648_s10 = inlined_call_operand.vmem [shape: bf16[32,32], index: 10, kind: input, shape index: {}]   ;;  %s4649_s11 = inlined_call_operand.vmem [shape: f32[1,32], index: 11, kind: input, shape index: {}]   ;;  %s4650_s12 = inlined_call_operand.vmem [shape: bf16[32,64], index: 12, kind: input, shape index: {}]   ;;  %s4651_s13 = inlined_call_operand.vmem [shape: f32[1,64], index: 13, kind: input, shape index: {}]   ;;  %s4652_s14 = inlined_call_operand.vmem [shape: bf16[64,32], index: 14, kind: input, shape index: {}]   ;;  %s4653_s15 = inlined_call_operand.vmem [shape: f32[1,32], index: 15, kind: input, shape index: {}]   ;;  %s4654_s16 = inlined_call_operand.vmem [shape: f32[1,32], index: 16, kind: input, shape index: {}]   ;;  %s4655_s17 = inlined_call_operand.vmem [shape: f32[1,32], index: 17, kind: input, shape index: {}]   ;;  %s4656_s18 = inlined_call_operand.vmem [shape: f32[1,32], index: 18, kind: input, shape index: {}]   ;;  %s4657_s19 = inlined_call_operand.vmem [shape: f32[1,32], index: 19, kind: input, shape index: {}]   ;;  %s4658_s20 = inlined_call_operand.vmem [shape: f32[1,32], index: 20, kind: input, shape index: {}]   ;;  %s4659_s21 = inlined_call_operand.hbm [shape: f32[1,32], index: 21, kind: input, shape index: {}]   ;;  %s4660_s22 = inlined_call_operand.vmem [shape: f32[16,32], index: 22, kind: output, shape index: {}]  }
   0x1   :  { %4666 = sst [smem:[#allocation5_spill]] %s4638_s0 }
   0x2   :  { %4667 = sst [smem:[#allocation6_spill]] %s4639_s1 }
   0x3   :  { %4668 = sst [smem:[#allocation7_spill]] %s4640_s2 }
   0x4   :  { %4669 = sst [smem:[#allocation8_spill]] %s4641_s3 }
   0x5   :  { %4670 = sst [smem:[#allocation9_spill]] %s4642_s4 }
   0x6   :  { %4671 = sst [smem:[#allocation10_spill]] %s4643_s5 }
   0x7   :  { %4672 = sst [smem:[#allocation11_spill]] %s4644_s6 }
   0x8   :  { %27 = vsyncpa [#allocation3], 0  ;;  %s3989_s3 = smov [#allocation2]  }
   0x9   :  { %s76_s28 = sshll.u32 %s3989_s3, 4  ;;  %s77_s28 = int_to_ptr.vmem [resolvable:$true] %s76_s28 }
   0xa   :  { %s3975_s29 = scalar_lea.vmem %s77_s28, 16  ;;  %s3979_s30 = scalar_lea.vmem %s77_s28, 32 }
   0xb   :  { %p3976_p0 = scmp.ne.s32.totalorder %s77_s28, %s3975_s29  ;;  %p3980_p1 = scmp.lt.s32.totalorder %s77_s28, %s77_s28 }
   0xc   :  { %p3981_p2 = scmp.lt.s32.totalorder %s3979_s30, %s3975_s29 }
   0xe   :  { %p3982_p3 = por %p3981_p2, %p3980_p1 }
  0x10   :  { %p3983_p4 = pnand %p3982_p3, %p3976_p0 }
  0x12   :  { %3986 = shalt.err (!%p3983_p4)
}
  0x13   :  { %79 = dma.hbm_to_vmem [thread:$0]  %s4659_s21, 16, %s77_s28, [#allocation3]  }
  0x14   :  { %3987 = dma.done.wait [#allocation3], 16  }
  0x15   :  { %3988 = vsyncadd [#allocation3], 4294967280  ;;  %v3990_v0 = vmov 0.0   ;;  %vm3991_vm0 = vmmov 0   ;;  %s4673_s5 = sld [smem:[#allocation7_spill]]  ;;  %vm112_vm1 = vcmask 261120  }
  0x16   :  { %3614 = vmatprep.subr.bf16.mxu0 %v3990_v0  ;;  %3618 = vmatprep.mubr.msk.bf16.mxu0 %vm3991_vm0, %v3990_v0  ;;  %s4674_s26 = sld [smem:[#allocation5_spill]]  ;;  %s3992_s30 = smov 112   ;;  %vm173_vm2 = vcmask 64512   ;;  %vm1510_vm3 = vcmask 130048   ;;  %vm1513_vm4 = vcmask 195584   ;;  %vm3345_vm5 = vcmask 523264  }
  0x17   :  { %3627 = vmatprep.subr.mxu1 %v3990_v0  ;;  %3629 = vmatprep.mubr.msk.f32.mxu1 %vm3991_vm0, %v3990_v0  ;;  %s4675_s29 = sld [smem:[#allocation8_spill]]  ;;  %s3993_s4 = smov 120  }
  0x18   :  { %s3994_s0 = smov 104   ;;  %s3995_s23 = smov 96  }
  0x19   :  { %s3996_s1 = smov 64   ;;  %s4676_s24 = sld [smem:[#allocation9_spill]] }
  0x1a   :  { %s3998_s2 = smov 16   ;;  %s3999_s27 = smov 24  }
  0x1b   :  { %v3875_v1 = vld [vmem:[%s4673_s5 + $0x8] sm:$0xff]   ;;  %v3876_v2 = vld [vmem:[%s4673_s5] sm:$0xff]   ;;  %s4678_s3 = sld [smem:[#allocation6_spill]] }
  0x1c   :  { %3615 = vmatpush3.bf16.msra.mxu0 %v3875_v1  ;;  %v4133_v3 = vld [vmem:[%s4674_s26] sm:$0xff]  ;;  %v4138_v4 = vld [vmem:[%s4674_s26 + $0x8] sm:$0xff]  ;;  %s3997_s26 = smov 8  }
  0x1d   :  { %3616 = vmatprep.subr.bf16.mxu0 %v3990_v0  ;;  %v93_v5 = vpack.c.bf16 %v4138_v4, %v4133_v3  ;;  %v3443_v6 = vld [vmem:[%s4675_s29] ss:$0 sm:$0xff]  ;;  %s4677_s29 = sld [smem:[#allocation10_spill]] }
  0x20   :  { %3617 = vmatpush3.bf16.msra.mxu0 %v3876_v2 }
  0x21   :  { %3622 = vmatprep.subr.mxu0 %v3990_v0 }
  0x23   :  { %3619 = vmatmul.mubr.msk.bf16.vlgmr.msra.gmra.mxu0 %vm112_vm1, %v93_v5 }
  0x24   :  { %3624 = vmatprep.mubr.msk.f32.mxu0 %vm3991_vm0, %v3990_v0 }
  0xe3   :  { %v150_v7 = vpop.f32.mrf.mxu0 }
  0xe4   :  { %v4150_v8 = vadd.f32 %v3443_v6, %v150_v7 }
  0xe5   :  { %v3620_v9 = vpop.f32.mrf.mxu0 }
  0xe6   :  { %163 = vrot.lane.b32.xlu1 %v4150_v8, %s3992_s30  ;;  %159 = vrot.lane.b32.xlu0 %v4150_v8, %s3993_s4 }
  0xe7   :  { %v153_v10 = vpop.f32.mrf.mxu0 }
  0xe8   :  { %v4156_v11 = vadd.f32 %v3443_v6, %v153_v10 }
  0xe9   :  { %v3621_v12 = vpop.f32.mrf.mxu0 }
  0xea   :  { %165 = vrot.lane.b32.xlu1 %v4156_v11, %s3992_s30  ;;  %161 = vrot.lane.b32.xlu0 %v4156_v11, %s3993_s4 }
  0xee   :  { %169 = vrot.lane.b32.xlu1 %v4156_v11, %s3994_s0  ;;  %167 = vrot.lane.b32.xlu0 %v4150_v8, %s3994_s0 }
  0xf2   :  { %248 = vrot.lane.b32.xlu1 %v4156_v11, %s3995_s23  ;;  %171 = vrot.lane.b32.xlu0 %v4150_v8, %s3995_s23 }
 0x158   :  { %v4170_v13 = vpop.permute.xlu1 %163  ;;  %v4172_v14 = vpop.permute.xlu0 %159 }
 0x159   :  { %324 = vrot.lane.b32.xlu0 %v4172_v14, %s3995_s23 }
 0x15c   :  { %v4176_v15 = vpop.permute.xlu1 %165  ;;  %v4178_v16 = vpop.permute.xlu0 %161 }
 0x15d   :  { %476 = vrot.lane.b32.xlu0 %v4170_v13, %s3995_s23  ;;  %400 = vrot.lane.b32.xlu1 %v4178_v16, %s3995_s23 }
 0x160   :  { %v4184_v17 = vpop.permute.xlu1 %169  ;;  %v4186_v18 = vpop.permute.xlu0 %167 }
 0x161   :  { %552 = vrot.lane.b32.xlu1 %v4176_v15, %s3995_s23  ;;  %628 = vrot.lane.b32.xlu0 %v4186_v18, %s3995_s23 }
 0x164   :  { %v249_v19 = vpop.permute.xlu1 %248  ;;  %v172_v20 = vpop.permute.xlu0 %171 }
 0x165   :  { %3628 = vmatpush3.xpose.msk.msra.mxu1 %vm173_vm2, %v249_v19  ;;  %704 = vrot.lane.b32.xlu1 %v4184_v17, %s3995_s23 }
 0x166   :  { %3623 = vmatpush3.xpose.msk.msra.mxu0 %vm173_vm2, %v172_v20  ;;  %3632 = vmatprep.subr.mxu1 %v3990_v0 }
 0x167   :  { %3637 = vmatprep.subr.mxu0 %v3990_v0 }
 0x168   :  { %3630 = vmatmul.mubr.msk.f32.vlgmr.msra.gmra.mxu1 %vm173_vm2, %v4156_v11 }
 0x169   :  { %3625 = vmatmul.mubr.msk.f32.vlgmr.msra.gmra.mxu0 %vm173_vm2, %v4150_v8  ;;  %3634 = vmatprep.mubr.msk.f32.mxu1 %vm3991_vm0, %v3990_v0 }
 0x16a   :  { %3639 = vmatprep.mubr.msk.f32.mxu0 %vm3991_vm0, %v3990_v0 }
 0x1cb   :  { %v325_v21 = vpop.permute.xlu0 %324 }
 0x1cc   :  { %3633 = vmatpush3.xpose.msk.msra.mxu1 %vm173_vm2, %v325_v21 }
 0x1cd   :  { %3642 = vmatprep.subr.mxu1 %v3990_v0 }
 0x1cf   :  { %v401_v22 = vpop.permute.xlu1 %400  ;;  %3635 = vmatmul.mubr.msk.f32.vlgmr.msra.gmra.mxu1 %vm173_vm2, %v4172_v14  ;;  %v477_v23 = vpop.permute.xlu0 %476 }
 0x1d0   :  { %3638 = vmatpush3.xpose.msk.msra.mxu0 %vm173_vm2, %v401_v22  ;;  %3643 = vmatpush3.xpose.msk.msra.mxu1 %vm173_vm2, %v477_v23 }
 0x1d1   :  { %3644 = vmatprep.mubr.msk.f32.mxu1 %vm3991_vm0, %v3990_v0  ;;  %3647 = vmatprep.subr.mxu0 %v3990_v0 }
 0x1d2   :  { %3652 = vmatprep.subr.mxu1 %v3990_v0 }
 0x1d3   :  { %v553_v24 = vpop.permute.xlu1 %552  ;;  %3640 = vmatmul.mubr.msk.f32.vlgmr.msra.gmra.mxu0 %vm173_vm2, %v4178_v16  ;;  %3645 = vmatmul.mubr.msk.f32.vlgmr.msra.gmra.mxu1 %vm173_vm2, %v4170_v13  ;;  %v629_v25 = vpop.permute.xlu0 %628 }
 0x1d4   :  { %3648 = vmatpush3.xpose.msk.msra.mxu0 %vm173_vm2, %v553_v24  ;;  %3653 = vmatpush3.xpose.msk.msra.mxu1 %vm173_vm2, %v629_v25 }
 0x1d5   :  { %3649 = vmatprep.mubr.msk.f32.mxu0 %vm3991_vm0, %v3990_v0  ;;  %3654 = vmatprep.mubr.msk.f32.mxu1 %vm3991_vm0, %v3990_v0 }
 0x1d6   :  { %3657 = vmatprep.subr.mxu0 %v3990_v0  ;;  %3662 = vmatprep.subr.mxu1 %v3990_v0 }
 0x1d7   :  { %v705_v26 = vpop.permute.xlu1 %704  ;;  %3650 = vmatmul.mubr.msk.f32.vlgmr.msra.gmra.mxu0 %vm173_vm2, %v4176_v15  ;;  %3655 = vmatmul.mubr.msk.f32.vlgmr.msra.gmra.mxu1 %vm173_vm2, %v4186_v18 }
 0x1d8   :  { %3658 = vmatpush3.xpose.msk.msra.mxu0 %vm173_vm2, %v705_v26  ;;  %3659 = vmatprep.mubr.msk.f32.mxu0 %vm3991_vm0, %v3990_v0 }
 0x1d9   :  { %3667 = vmatprep.subr.mxu0 %v3990_v0  ;;  %3664 = vmatprep.mubr.msk.f32.mxu1 %vm3991_vm0, %v3990_v0 }
 0x1db   :  { %3660 = vmatmul.mubr.msk.f32.vlgmr.msra.gmra.mxu0 %vm173_vm2, %v4184_v17 }
 0x1dc   :  { %3669 = vmatprep.mubr.msk.f32.mxu0 %vm3991_vm0, %v3990_v0 }
 0x228   :  { %v320_v27 = vpop.f32.mrf.mxu1 }
 0x229   :  { %v244_v28 = vpop.f32.mrf.mxu0  ;;  %v781_v29 = vmul.f32 0.35355338, %v320_v27 }
 0x22a   :  { %v780_v30 = vmul.f32 0.35355338, %v244_v28  ;;  %v3631_v31 = vpop.f32.mrf.mxu1 }
 0x22b   :  { %v3626_v32 = vpop.f32.mrf.mxu0  ;;  %v791_v33 = vsel %vm173_vm2, %v781_v29, -inf }
 0x22c   :  { %792 = vmax.xlane.f32.xlu1 %v791_v33  ;;  %v788_v34 = vsel %vm173_vm2, %v780_v30, -inf }
 0x22d   :  { %789 = vmax.xlane.f32.xlu0 %v788_v34 }
 0x28f   :  { %v396_v35 = vpop.f32.mrf.mxu1 }
 0x290   :  { %v782_v36 = vmul.f32 0.35355338, %v396_v35 }
 0x291   :  { %v3636_v37 = vpop.f32.mrf.mxu1 }
 0x292   :  { %v794_v38 = vsel %vm173_vm2, %v782_v36, -inf }
 0x293   :  { %v548_v39 = vpop.f32.mrf.mxu1  ;;  %795 = vmax.xlane.f32.xlu0 %v794_v38  ;;  %v472_v40 = vpop.f32.mrf.mxu0 }
 0x294   :  { %v784_v41 = vmul.f32 0.35355338, %v548_v39  ;;  %v783_v42 = vmul.f32 0.35355338, %v472_v40 }
 0x295   :  { %v3641_v43 = vpop.f32.mrf.mxu0  ;;  %v3646_v44 = vpop.f32.mrf.mxu1 }
 0x296   :  { %v800_v45 = vsel %vm173_vm2, %v784_v41, -inf  ;;  %v797_v46 = vsel %vm173_vm2, %v783_v42, -inf }
 0x297   :  { %801 = vmax.xlane.f32.xlu1 %v800_v45  ;;  %v700_v47 = vpop.f32.mrf.mxu1  ;;  %798 = vmax.xlane.f32.xlu0 %v797_v46  ;;  %v624_v48 = vpop.f32.mrf.mxu0 }
 0x298   :  { %v786_v49 = vmul.f32 0.35355338, %v700_v47  ;;  %v785_v50 = vmul.f32 0.35355338, %v624_v48 }
 0x299   :  { %v3651_v51 = vpop.f32.mrf.mxu0  ;;  %v3656_v52 = vpop.f32.mrf.mxu1 }
 0x29a   :  { %v806_v53 = vsel %vm173_vm2, %v786_v49, -inf  ;;  %v803_v54 = vsel %vm173_vm2, %v785_v50, -inf }
 0x29b   :  { %807 = vmax.xlane.f32.xlu1 %v806_v53  ;;  %804 = vmax.xlane.f32.xlu0 %v803_v54  ;;  %v776_v55 = vpop.f32.mrf.mxu0 }
 0x29c   :  { %v787_v56 = vmul.f32 0.35355338, %v776_v55 }
 0x29d   :  { %v3661_v57 = vpop.f32.mrf.mxu0 }
 0x29e   :  { %v809_v58 = vsel %vm173_vm2, %v787_v56, -inf }
 0x29f   :  { %810 = vmax.xlane.f32.xlu0 %v809_v58 }
 0x2ac   :  { %876 = vrot.lane.b32.xlu1 %v4150_v8, %s3996_s1 }
 0x2b0   :  { %1028 = vrot.lane.b32.xlu1 %v4172_v14, %s3996_s1 }
 0x2b4   :  { %1104 = vrot.lane.b32.xlu1 %v4178_v16, %s3996_s1 }
 0x2b5   :  { %952 = vrot.lane.b32.xlu0 %v4156_v11, %s3996_s1  ;;  %v793_v59 = vpop.xlane.xlu1 %792 }
 0x2b6   :  { %v813_v60 = vsub.f32 %v781_v29, %v793_v59  ;;  %v790_v61 = vpop.xlane.xlu0 %789 }
 0x2b7   :  { %v812_v63 = vsub.f32 %v780_v30, %v790_v61 }
 0x2b8   :  { %1256 = vrot.lane.b32.xlu1 %v4176_v15, %s3996_s1  ;;  %v822_v62 = vmul.f32 1.442695, %v813_v60 }
 0x2b9   :  { %1180 = vrot.lane.b32.xlu0 %v4170_v13, %s3996_s1  ;;  %v820_v1 = vmul.f32 1.442695, %v812_v63 }
 0x2ba   :  { %3891 = vpow2.f32 %v822_v62 }
 0x2bb   :  { %3893 = vpow2.f32 %v820_v1 }
 0x2c7   :  { %v4262_v2 = vpop.eup %3891 }
 0x2c8   :  { %v839_v5 = vsel %vm173_vm2, %v4262_v2, 0.0  ;;  %v4266_v6 = vpop.eup %3893 }
 0x2c9   :  { %v836_v7 = vsel %vm173_vm2, %v4266_v6, 0.0 }
 0x2d8   :  { %840 = vadd.xlane.f32.xlu0 %v839_v5 }
 0x2dc   :  { %837 = vadd.xlane.f32.xlu1 %v836_v7 }
 0x31c   :  { %v796_v8 = vpop.xlane.xlu0 %795 }
 0x31d   :  { %v814_v9 = vsub.f32 %v782_v36, %v796_v8 }
 0x31f   :  { %v824_v10 = vmul.f32 1.442695, %v814_v9 }
 0x320   :  { %v802_v11 = vpop.xlane.xlu1 %801  ;;  %v799_v12 = vpop.xlane.xlu0 %798 }
 0x321   :  { %3895 = vpow2.f32 %v824_v10  ;;  %v816_v13 = vsub.f32 %v784_v41, %v802_v11  ;;  %v815_v14 = vsub.f32 %v783_v42, %v799_v12 }
 0x323   :  { %v828_v15 = vmul.f32 1.442695, %v816_v13  ;;  %v826_v16 = vmul.f32 1.442695, %v815_v14  ;;  %v3877_v14 = vld [vmem:[%s4676_s24 + $0x8] sm:$0xff]  }
 0x324   :  { %v808_v19 = vpop.xlane.xlu1 %807  ;;  %v805_v20 = vpop.xlane.xlu0 %804 }
 0x325   :  { %3897 = vpow2.f32 %v828_v15  ;;  %v818_v21 = vsub.f32 %v786_v49, %v808_v19  ;;  %v817_v22 = vsub.f32 %v785_v50, %v805_v20  ;;  %v3878_v19 = vld [vmem:[%s4676_s24] sm:$0xff]  }
 0x326   :  { %3899 = vpow2.f32 %v826_v16 }
 0x327   :  { %v832_v23 = vmul.f32 1.442695, %v818_v21  ;;  %v830_v24 = vmul.f32 1.442695, %v817_v22 }
 0x328   :  { %v877_v25 = vpop.permute.xlu1 %876  ;;  %v811_v26 = vpop.xlane.xlu0 %810 }
 0x329   :  { %3901 = vpow2.f32 %v832_v23  ;;  %v819_v27 = vsub.f32 %v787_v56, %v811_v26  ;;  %3663 = vmatpush3.msra.mxu1 %v877_v25 }
 0x32a   :  { %3903 = vpow2.f32 %v830_v24  ;;  %3672 = vmatprep.subr.mxu1 %v3990_v0 }
 0x32b   :  { %v834_v28 = vmul.f32 1.442695, %v819_v27 }
 0x32c   :  { %v953_v29 = vpop.permute.xlu0 %952  ;;  %v1029_v42 = vpop.permute.xlu1 %1028 }
 0x32d   :  { %3905 = vpow2.f32 %v834_v28  ;;  %3668 = vmatpush3.msra.mxu0 %v953_v29 }
 0x32e   :  { %v3896_v30 = vpop.eup %3895  ;;  %3677 = vmatprep.subr.mxu0 %v3990_v0 }
 0x32f   :  { %v842_v31 = vsel %vm173_vm2, %v3896_v30, 0.0 }
 0x330   :  { %843 = vadd.xlane.f32.xlu1 %v842_v31  ;;  %v1105_v43 = vpop.permute.xlu1 %1104  ;;  %v1181_v44 = vpop.permute.xlu0 %1180 }
 0x332   :  { %v3898_v32 = vpop.eup %3897 }
 0x333   :  { %v3900_v33 = vpop.eup %3899  ;;  %v848_v34 = vsel %vm173_vm2, %v3898_v32, 0.0 }
 0x334   :  { %849 = vadd.xlane.f32.xlu1 %v848_v34  ;;  %v845_v35 = vsel %vm173_vm2, %v3900_v33, 0.0  ;;  %v1257_v45 = vpop.permute.xlu1 %1256 }
 0x335   :  { %846 = vadd.xlane.f32.xlu0 %v845_v35 }
 0x336   :  { %v3902_v36 = vpop.eup %3901 }
 0x337   :  { %v4275_v37 = vpop.eup %3903  ;;  %v854_v38 = vsel %vm173_vm2, %v3902_v36, 0.0 }
 0x338   :  { %855 = vadd.xlane.f32.xlu1 %v854_v38  ;;  %v851_v39 = vsel %vm173_vm2, %v4275_v37, 0.0 }
 0x339   :  { %852 = vadd.xlane.f32.xlu0 %v851_v39 }
 0x33a   :  { %v4280_v40 = vpop.eup %3905 }
 0x33b   :  { %v857_v41 = vsel %vm173_vm2, %v4280_v40, 0.0 }
 0x33d   :  { %858 = vadd.xlane.f32.xlu0 %v857_v41 }
 0x349   :  { %1408 = vrot.lane.b32.xlu1 %v4184_v17, %s3996_s1 }
 0x353   :  { %1332 = vrot.lane.b32.xlu0 %v4186_v18, %s3996_s1 }
 0x361   :  { %v841_v46 = vpop.xlane.xlu0 %840 }
 0x362   :  { %3907 = vrcp.f32 %v841_v46 }
 0x365   :  { %v838_v47 = vpop.xlane.xlu1 %837 }
 0x366   :  { %3909 = vrcp.f32 %v838_v47 }
 0x36f   :  { %v3908_v48 = vpop.eup %3907 }
 0x370   :  { %v869_v49 = vmul.f32 %v3908_v48, %v4262_v2  ;;  %v3471_v48 = vld [vmem:[%s4677_s29] ss:$0 sm:$0xff] }
 0x372   :  { %3670 = vmatmul.mubr.msk.f32.vlgmr.msra.gmra.mxu0 %vm173_vm2, %v869_v49 }
 0x373   :  { %v3910_v50 = vpop.eup %3909  ;;  %3678 = vmatpush3.msra.mxu0 %v1105_v43  ;;  %3679 = vmatprep.mubr.msk.f32.mxu0 %vm3991_vm0, %v3990_v0 }
 0x374   :  { %v868_v17 = vmul.f32 %v3910_v50, %v4266_v6  ;;  %3687 = vmatprep.subr.mxu0 %v3990_v0 }
 0x376   :  { %3665 = vmatmul.mubr.msk.f32.vlgmr.msra.gmra.mxu1 %vm173_vm2, %v868_v17 }
 0x377   :  { %3673 = vmatpush3.msra.mxu1 %v1029_v42  ;;  %3674 = vmatprep.mubr.msk.f32.mxu1 %vm3991_vm0, %v3990_v0 }
 0x378   :  { %3682 = vmatprep.subr.mxu1 %v3990_v0 }
 0x3b9   :  { %v844_v18 = vpop.xlane.xlu1 %843 }
 0x3ba   :  { %3911 = vrcp.f32 %v844_v18 }
 0x3bd   :  { %v850_v51 = vpop.xlane.xlu1 %849 }
 0x3be   :  { %3913 = vrcp.f32 %v850_v51  ;;  %v847_v52 = vpop.xlane.xlu0 %846 }
 0x3bf   :  { %3915 = vrcp.f32 %v847_v52 }
 0x3c1   :  { %v856_v53 = vpop.xlane.xlu1 %855 }
 0x3c2   :  { %3917 = vrcp.f32 %v856_v53  ;;  %v853_v54 = vpop.xlane.xlu0 %852 }
 0x3c3   :  { %3919 = vrcp.f32 %v853_v54 }
 0x3c5   :  { %v1409_v6 = vpop.permute.xlu1 %1408 }
 0x3c6   :  { %v859_v55 = vpop.xlane.xlu0 %858 }
 0x3c7   :  { %v3912_v56 = vpop.eup %3911  ;;  %3921 = vrcp.f32 %v859_v55 }
 0x3c8   :  { %v870_v57 = vmul.f32 %v3912_v56, %v3896_v30 }
 0x3ca   :  { %3675 = vmatmul.mubr.msk.f32.vlgmr.msra.gmra.mxu1 %vm173_vm2, %v870_v57  ;;  %v1333_v62 = vpop.permute.xlu0 %1332 }
 0x3cb   :  { %v3914_v58 = vpop.eup %3913  ;;  %3683 = vmatpush3.msra.mxu1 %v1181_v44  ;;  %3684 = vmatprep.mubr.msk.f32.mxu1 %vm3991_vm0, %v3990_v0 }
 0x3cc   :  { %v3916_v59 = vpop.eup %3915  ;;  %3692 = vmatprep.subr.mxu1 %v3990_v0  ;;  %v872_v60 = vmul.f32 %v3914_v58, %v3898_v32 }
 0x3cd   :  { %v871_v61 = vmul.f32 %v3916_v59, %v3900_v33 }
 0x3ce   :  { %3685 = vmatmul.mubr.msk.f32.vlgmr.msra.gmra.mxu1 %vm173_vm2, %v872_v60 }
 0x3cf   :  { %v3918_v63 = vpop.eup %3917  ;;  %3680 = vmatmul.mubr.msk.f32.vlgmr.msra.gmra.mxu0 %vm173_vm2, %v871_v61  ;;  %3693 = vmatpush3.msra.mxu1 %v1333_v62 }
 0x3d0   :  { %v3920_v1 = vpop.eup %3919  ;;  %3688 = vmatpush3.msra.mxu0 %v1257_v45  ;;  %3689 = vmatprep.mubr.msk.f32.mxu0 %vm3991_vm0, %v3990_v0  ;;  %v874_v2 = vmul.f32 %v3918_v63, %v3902_v36 }
 0x3d1   :  { %3694 = vmatprep.mubr.msk.f32.mxu1 %vm3991_vm0, %v3990_v0  ;;  %3697 = vmatprep.subr.mxu0 %v3990_v0  ;;  %v873_v5 = vmul.f32 %v3920_v1, %v4275_v37 }
 0x3d2   :  { %3695 = vmatmul.mubr.msk.f32.vlgmr.msra.gmra.mxu1 %vm173_vm2, %v874_v2  ;;  %3702 = vmatprep.subr.bf16.mxu1 %v3990_v0 }
 0x3d3   :  { %3690 = vmatmul.mubr.msk.f32.vlgmr.msra.gmra.mxu0 %vm173_vm2, %v873_v5  ;;  %3706 = vmatprep.mubr.msk.bf16.mxu1 %vm3991_vm0, %v3990_v0  ;;  %v3880_v5 = vld [vmem:[%s4646_s8] sm:$0xff]  }
 0x3d4   :  { %v3922_v7 = vpop.eup %3921  ;;  %3698 = vmatpush3.msra.mxu0 %v1409_v6  ;;  %3699 = vmatprep.mubr.msk.f32.mxu0 %vm3991_vm0, %v3990_v0  ;;  %v86_v6 = vld [vmem:[%s4678_s3] sm:$0xff] }
 0x3d5   :  { %v875_v8 = vmul.f32 %v3922_v7, %v4280_v40  ;;  %3710 = vmatprep.subr.bf16.mxu0 %v3990_v0  ;;  %3703 = vmatpush3.bf16.msra.mxu1 %v3877_v14  ;;  %v87_v7 = vld [vmem:[%s4678_s3 + $0x8] sm:$0xff] }
 0x3d6   :  { %3704 = vmatprep.subr.bf16.mxu1 %v3990_v0 }
 0x3d7   :  { %3700 = vmatmul.mubr.msk.f32.vlgmr.msra.gmra.mxu0 %vm173_vm2, %v875_v8  ;;  %v1704_v8 = vpack.c.bf16 %v87_v7, %v86_v6 }
 0x3d8   :  { %3714 = vmatprep.mubr.msk.bf16.mxu0 %vm3991_vm0, %v3990_v0 }
 0x3d9   :  { %3705 = vmatpush3.bf16.msra.mxu1 %v3878_v19 }
 0x3da   :  { %3718 = vmatprep.subr.bf16.mxu1 %v3990_v0 }
 0x432   :  { %v1024_v9 = vpop.f32.mrf.mxu0 }
 0x434   :  { %v3671_v10 = vpop.f32.mrf.mxu0 }
 0x436   :  { %v948_v11 = vpop.f32.mrf.mxu1 }
 0x438   :  { %v3666_v12 = vpop.f32.mrf.mxu1 }
 0x48a   :  { %v1100_v13 = vpop.f32.mrf.mxu1 }
 0x48c   :  { %v3676_v15 = vpop.f32.mrf.mxu1 }
 0x48e   :  { %v1252_v16 = vpop.f32.mrf.mxu1 }
 0x48f   :  { %v1176_v20 = vpop.f32.mrf.mxu0 }
 0x490   :  { %v3845_v21 = vpack.i.bf16 %v1176_v20, %v1100_v13  ;;  %v3686_v22 = vpop.f32.mrf.mxu1 }
 0x491   :  { %v3681_v23 = vpop.f32.mrf.mxu0 }
 0x492   :  { %3846 = vrot.lane.b32.xlu0 %v3845_v21, %s3997_s26  ;;  %v1404_v24 = vpop.f32.mrf.mxu1  ;;  %v3475_v21 = vld [vmem:[%s4654_s16] ss:$0 sm:$0xff] }
 0x493   :  { %v1328_v25 = vpop.f32.mrf.mxu0 }
 0x494   :  { %v3850_v26 = vpack.i.bf16 %v1328_v25, %v1252_v16  ;;  %v3696_v27 = vpop.f32.mrf.mxu1  ;;  %v3476_v25 = vld [vmem:[%s4655_s17] ss:$0 sm:$0xff] }
 0x495   :  { %v3691_v28 = vpop.f32.mrf.mxu0 }
 0x496   :  { %3851 = vrot.lane.b32.xlu1 %v3850_v26, %s3998_s2 }
 0x497   :  { %v1480_v29 = vpop.f32.mrf.mxu0 }
 0x498   :  { %v3855_v30 = vpack.i.bf16 %v1480_v29, %v1404_v24 }
 0x499   :  { %v3701_v31 = vpop.f32.mrf.mxu0 }
 0x49a   :  { %3856 = vrot.lane.b32.xlu0 %v3855_v30, %s3999_s27  ;;  %v3481_v30 = vld [vmem:[%s4647_s9] ss:$0 sm:$0xff] }
 0x504   :  { %v3847_v32 = vpop.permute.xlu0 %3846 }
 0x505   :  { %v3849_v34 = vunpack.i.h.bf16 %v3847_v32  ;;  %v3848_v35 = vunpack.i.l.bf16 %v3847_v32 }
 0x507   :  { %v1509_v39 = vsel %vm173_vm2, %v1024_v9, %v3849_v34  ;;  %v1508_v40 = vsel %vm173_vm2, %v948_v11, %v3848_v35 }
 0x508   :  { %v3852_v33 = vpop.permute.xlu1 %3851 }
 0x509   :  { %v3854_v36 = vunpack.i.h.bf16 %v3852_v33  ;;  %v3853_v37 = vunpack.i.l.bf16 %v3852_v33 }
 0x50b   :  { %v1512_v43 = vsel %vm1510_vm3, %v1509_v39, %v3854_v36  ;;  %v1511_v44 = vsel %vm1510_vm3, %v1508_v40, %v3853_v37 }
 0x50c   :  { %v3857_v38 = vpop.permute.xlu0 %3856 }
 0x50d   :  { %v3859_v41 = vunpack.i.h.bf16 %v3857_v38  ;;  %v3858_v42 = vunpack.i.l.bf16 %v3857_v38  ;;  %v3477_v38 = vld [vmem:[%s4645_s7] ss:$0 sm:$0xff] }
 0x50f   :  { %v1515_v45 = vsel %vm1513_vm4, %v1512_v43, %v3859_v41  ;;  %v1514_v46 = vsel %vm1513_vm4, %v1511_v44, %v3858_v42 }
 0x510   :  { %v1521_v47 = vpack.c.bf16 %v1515_v45, %v1514_v46 }
 0x512   :  { %3707 = vmatmul.mubr.msk.bf16.vlgmr.msra.gmra.mxu1 %vm112_vm1, %v1521_v47 }
 0x513   :  { %3722 = vmatprep.mubr.msk.bf16.mxu1 %vm3991_vm0, %v3990_v0 }
 0x5d2   :  { %v1577_v49 = vpop.f32.mrf.mxu1 }
 0x5d3   :  { %v1578_v50 = vadd.f32 %v3471_v48, %v1577_v49 }
 0x5d4   :  { %v3708_v17 = vpop.f32.mrf.mxu1 }
 0x5d5   :  { %v1584_v18 = vadd.f32 %v1578_v50, %v4133_v3 }
 0x5d6   :  { %v1580_v51 = vpop.f32.mrf.mxu1 }
 0x5d7   :  { %v1581_v52 = vadd.f32 %v3471_v48, %v1580_v51  ;;  %v1588_v53 = vsel %vm112_vm1, %v1584_v18, 0.0 }
 0x5d8   :  { %1589 = vadd.xlane.f32.xlu1 %v1588_v53  ;;  %v3709_v54 = vpop.f32.mrf.mxu1 }
 0x5d9   :  { %v1585_v55 = vadd.f32 %v1581_v52, %v4138_v4  ;;  %v3879_v4 = vld [vmem:[%s4646_s8 + $0x8] sm:$0xff]   ;;  %s4679_s8 = sld [smem:[#allocation11_spill]] }
 0x5da   :  { %3719 = vmatpush3.bf16.msra.mxu1 %v3879_v4 }
 0x5db   :  { %v1591_v56 = vsel %vm112_vm1, %v1585_v55, 0.0  ;;  %3720 = vmatprep.subr.bf16.mxu1 %v3990_v0 }
 0x5dc   :  { %1592 = vadd.xlane.f32.xlu0 %v1591_v56 }
 0x5de   :  { %3721 = vmatpush3.bf16.msra.mxu1 %v3880_v5 }
 0x5df   :  { %3736 = vmatprep.subr.mxu1 %v3990_v0  ;;  %v3881_v9 = vld [vmem:[%s4679_s8 + $0x8] sm:$0xff]   ;;  %v3882_v10 = vld [vmem:[%s4679_s8] sm:$0xff]  }
 0x5e0   :  { %3711 = vmatpush3.bf16.msra.mxu0 %v3881_v9 }
 0x5e1   :  { %3723 = vmatmul.mubr.msk.bf16.vlgmr.msra.gmra.mxu1 %vm112_vm1, %v1704_v8  ;;  %3712 = vmatprep.subr.bf16.mxu0 %v3990_v0 }
 0x5e2   :  { %3738 = vmatprep.mubr.msk.f32.mxu1 %vm3991_vm0, %v3990_v0 }
 0x5e4   :  { %3713 = vmatpush3.bf16.msra.mxu0 %v3882_v10 }
 0x5e5   :  { %3726 = vmatprep.subr.mxu0 %v3990_v0 }
 0x661   :  { %v1590_v57 = vpop.xlane.xlu1 %1589 }
 0x662   :  { %v1595_v58 = vmul.f32 0.03125, %v1590_v57 }
 0x664   :  { %v1597_v59 = vsub.f32 %v1584_v18, %v1595_v58 }
 0x665   :  { %v1593_v60 = vpop.xlane.xlu0 %1592 }
 0x666   :  { %v1596_v61 = vmul.f32 0.03125, %v1593_v60  ;;  %v1599_v62 = vmul.f32 %v1597_v59, %v1597_v59 }
 0x668   :  { %v1598_v63 = vsub.f32 %v1585_v55, %v1596_v61  ;;  %v1601_v3 = vsel %vm112_vm1, %v1599_v62, 0.0 }
 0x669   :  { %1602 = vadd.xlane.f32.xlu0 %v1601_v3 }
 0x66a   :  { %v1600_v1 = vmul.f32 %v1598_v63, %v1598_v63 }
 0x66c   :  { %v1604_v2 = vsel %vm112_vm1, %v1600_v1, 0.0 }
 0x66d   :  { %1605 = vadd.xlane.f32.xlu1 %v1604_v2 }
 0x6a1   :  { %v1760_v31 = vpop.f32.mrf.mxu1 }
 0x6a2   :  { %v4394_v32 = vadd.f32 %v3481_v30, %v1760_v31 }
 0x6a3   :  { %v3724_v33 = vpop.f32.mrf.mxu1 }
 0x6a4   :  { %1783 = vrot.lane.b32.xlu0 %v4394_v32, %s3993_s4 }
 0x6a5   :  { %v1763_v34 = vpop.f32.mrf.mxu1 }
 0x6a6   :  { %v4401_v35 = vadd.f32 %v3481_v30, %v1763_v34 }
 0x6a7   :  { %v3725_v36 = vpop.f32.mrf.mxu1 }
 0x6a8   :  { %1785 = vrot.lane.b32.xlu1 %v4401_v35, %s3993_s4  ;;  %1789 = vrot.lane.b32.xlu0 %v4401_v35, %s3992_s30 }
 0x6ac   :  { %1787 = vrot.lane.b32.xlu1 %v4394_v32, %s3992_s30  ;;  %1793 = vrot.lane.b32.xlu0 %v4401_v35, %s3994_s0 }
 0x6b0   :  { %1791 = vrot.lane.b32.xlu1 %v4394_v32, %s3994_s0 }
 0x6f2   :  { %v1603_v11 = vpop.xlane.xlu0 %1602 }
 0x6f3   :  { %v1607_v12 = vmul.f32 0.03125, %v1603_v11 }
 0x6f5   :  { %v1609_v13 = vadd.f32 1e-05, %v1607_v12 }
 0x6f6   :  { %v1606_v14 = vpop.xlane.xlu1 %1605 }
 0x6f7   :  { %3923 = vrsqrt.f32 %v1609_v13  ;;  %v1608_v15 = vmul.f32 0.03125, %v1606_v14 }
 0x6f9   :  { %v1610_v16 = vadd.f32 1e-05, %v1608_v15 }
 0x6fb   :  { %3925 = vrsqrt.f32 %v1610_v16 }
 0x704   :  { %v3924_v19 = vpop.eup %3923 }
 0x705   :  { %v1613_v20 = vmul.f32 %v3924_v19, %v1597_v59 }
 0x707   :  { %v1621_v24 = vmul.f32 %v3475_v21, %v1613_v20 }
 0x708   :  { %v3926_v22 = vpop.eup %3925 }
 0x709   :  { %v1614_v23 = vmul.f32 %v3926_v22, %v1598_v63  ;;  %v4382_v27 = vadd.f32 %v3476_v25, %v1621_v24 }
 0x70b   :  { %v1622_v26 = vmul.f32 %v3475_v21, %v1614_v23 }
 0x70d   :  { %v4384_v28 = vadd.f32 %v3476_v25, %v1622_v26 }
 0x70f   :  { %v1636_v29 = vpack.c.bf16 %v4384_v28, %v4382_v27 }
 0x711   :  { %3715 = vmatmul.mubr.msk.bf16.vlgmr.msra.gmra.mxu0 %vm112_vm1, %v1636_v29 }
 0x712   :  { %3728 = vmatprep.mubr.msk.f32.mxu0 %vm3991_vm0, %v3990_v0  ;;  %3727 = vmatpush3.xpose.msk.msra.mxu0 %vm173_vm2, %v4394_v32 }
 0x713   :  { %3731 = vmatprep.subr.mxu0 %v3990_v0 }
 0x716   :  { %v4413_v37 = vpop.permute.xlu0 %1783 }
 0x717   :  { %3737 = vmatpush3.xpose.msk.msra.mxu1 %vm173_vm2, %v4413_v37 }
 0x718   :  { %3746 = vmatprep.subr.mxu1 %v3990_v0 }
 0x71a   :  { %v4431_v45 = vpop.permute.xlu1 %1785  ;;  %v4443_v47 = vpop.permute.xlu0 %1789 }
 0x71e   :  { %v4441_v46 = vpop.permute.xlu1 %1787  ;;  %v4447_v49 = vpop.permute.xlu0 %1793 }
 0x722   :  { %v4445_v48 = vpop.permute.xlu1 %1791 }
 0x7d1   :  { %v1692_v39 = vpop.f32.mrf.mxu0 }
 0x7d2   :  { %v1693_v40 = vadd.f32 %v3477_v38, %v1692_v39 }
 0x7d3   :  { %v3716_v41 = vpop.f32.mrf.mxu0 }
 0x7d4   :  { %1769 = vrot.lane.b32.xlu1 %v1693_v40, %s3993_s4  ;;  %3729 = vmatmul.mubr.msk.f32.vlgmr.msra.gmra.mxu0 %vm173_vm2, %v1693_v40 }
 0x7d5   :  { %3732 = vmatpush3.xpose.msk.msra.mxu0 %vm173_vm2, %v4401_v35  ;;  %v1695_v42 = vpop.f32.mrf.mxu0  ;;  %3733 = vmatprep.mubr.msk.f32.mxu0 %vm3991_vm0, %v3990_v0 }
 0x7d6   :  { %v1696_v43 = vadd.f32 %v3477_v38, %v1695_v42  ;;  %3741 = vmatprep.subr.mxu0 %v3990_v0 }
 0x7d7   :  { %v3717_v44 = vpop.f32.mrf.mxu0 }
 0x7d8   :  { %1773 = vrot.lane.b32.xlu1 %v1693_v40, %s3992_s30  ;;  %1771 = vrot.lane.b32.xlu0 %v1696_v43, %s3993_s4 }
 0x7d9   :  { %3734 = vmatmul.mubr.msk.f32.vlgmr.msra.gmra.mxu0 %vm173_vm2, %v1696_v43 }
 0x7da   :  { %3742 = vmatpush3.xpose.msk.msra.mxu0 %vm173_vm2, %v4431_v45  ;;  %3743 = vmatprep.mubr.msk.f32.mxu0 %vm3991_vm0, %v3990_v0 }
 0x7db   :  { %3751 = vmatprep.subr.mxu0 %v3990_v0 }
 0x7dc   :  { %1777 = vrot.lane.b32.xlu1 %v1693_v40, %s3994_s0  ;;  %1775 = vrot.lane.b32.xlu0 %v1696_v43, %s3992_s30 }
 0x7e0   :  { %1779 = vrot.lane.b32.xlu0 %v1696_v43, %s3994_s0 }
 0x846   :  { %v1770_v50 = vpop.permute.xlu1 %1769 }
 0x847   :  { %3739 = vmatmul.mubr.msk.f32.vlgmr.msra.gmra.mxu1 %vm173_vm2, %v1770_v50 }
 0x848   :  { %3747 = vmatpush3.xpose.msk.msra.mxu1 %vm173_vm2, %v4441_v46  ;;  %3748 = vmatprep.mubr.msk.f32.mxu1 %vm3991_vm0, %v3990_v0 }
 0x849   :  { %3756 = vmatprep.subr.mxu1 %v3990_v0 }
 0x84a   :  { %v1774_v17 = vpop.permute.xlu1 %1773  ;;  %v1772_v18 = vpop.permute.xlu0 %1771 }
 0x84b   :  { %3744 = vmatmul.mubr.msk.f32.vlgmr.msra.gmra.mxu0 %vm173_vm2, %v1772_v18  ;;  %3749 = vmatmul.mubr.msk.f32.vlgmr.msra.gmra.mxu1 %vm173_vm2, %v1774_v17 }
 0x84c   :  { %3752 = vmatpush3.xpose.msk.msra.mxu0 %vm173_vm2, %v4443_v47  ;;  %3757 = vmatpush3.xpose.msk.msra.mxu1 %vm173_vm2, %v4445_v48 }
 0x84d   :  { %3758 = vmatprep.mubr.msk.f32.mxu1 %vm3991_vm0, %v3990_v0  ;;  %3753 = vmatprep.mubr.msk.f32.mxu0 %vm3991_vm0, %v3990_v0 }
 0x84e   :  { %v1778_v51 = vpop.permute.xlu1 %1777  ;;  %v1776_v52 = vpop.permute.xlu0 %1775  ;;  %3761 = vmatprep.subr.mxu0 %v3990_v0  ;;  %3766 = vmatprep.subr.mxu1 %v3990_v0 }
 0x84f   :  { %3754 = vmatmul.mubr.msk.f32.vlgmr.msra.gmra.mxu0 %vm173_vm2, %v1776_v52  ;;  %3759 = vmatmul.mubr.msk.f32.vlgmr.msra.gmra.mxu1 %vm173_vm2, %v1778_v51 }
 0x850   :  { %3762 = vmatpush3.xpose.msk.msra.mxu0 %vm173_vm2, %v4447_v49  ;;  %3763 = vmatprep.mubr.msk.f32.mxu0 %vm3991_vm0, %v3990_v0 }
 0x851   :  { %3771 = vmatprep.subr.mxu0 %v3990_v0  ;;  %3768 = vmatprep.mubr.msk.f32.mxu1 %vm3991_vm0, %v3990_v0 }
 0x852   :  { %v1780_v53 = vpop.permute.xlu0 %1779 }
 0x853   :  { %3764 = vmatmul.mubr.msk.f32.vlgmr.msra.gmra.mxu0 %vm173_vm2, %v1780_v53 }
 0x854   :  { %3773 = vmatprep.mubr.msk.f32.mxu0 %vm3991_vm0, %v3990_v0 }
 0x894   :  { %v1865_v54 = vpop.f32.mrf.mxu0 }
 0x895   :  { %v2387_v55 = vmul.f32 0.35355338, %v1865_v54 }
 0x896   :  { %v3730_v56 = vpop.f32.mrf.mxu0 }
 0x897   :  { %v2395_v57 = vsel %vm173_vm2, %v2387_v55, -inf }
 0x898   :  { %2396 = vmax.xlane.f32.xlu1 %v2395_v57 }
 0x899   :  { %v1939_v58 = vpop.f32.mrf.mxu0 }
 0x89a   :  { %v2388_v59 = vmul.f32 0.35355338, %v1939_v58 }
 0x89b   :  { %v3735_v60 = vpop.f32.mrf.mxu0 }
 0x89c   :  { %v2398_v61 = vsel %vm173_vm2, %v2388_v59, -inf }
 0x89d   :  { %2399 = vmax.xlane.f32.xlu0 %v2398_v61 }
 0x907   :  { %v2013_v62 = vpop.f32.mrf.mxu1 }
 0x908   :  { %v2389_v63 = vmul.f32 0.35355338, %v2013_v62 }
 0x909   :  { %v3740_v3 = vpop.f32.mrf.mxu1 }
 0x90a   :  { %v2401_v1 = vsel %vm173_vm2, %v2389_v63, -inf }
 0x90b   :  { %v2161_v2 = vpop.f32.mrf.mxu1  ;;  %2402 = vmax.xlane.f32.xlu0 %v2401_v1  ;;  %v2087_v4 = vpop.f32.mrf.mxu0 }
 0x90c   :  { %v2391_v5 = vmul.f32 0.35355338, %v2161_v2  ;;  %v2390_v6 = vmul.f32 0.35355338, %v2087_v4 }
 0x90d   :  { %v3745_v7 = vpop.f32.mrf.mxu0  ;;  %v3750_v8 = vpop.f32.mrf.mxu1 }
 0x90e   :  { %v2407_v9 = vsel %vm173_vm2, %v2391_v5, -inf  ;;  %v2404_v10 = vsel %vm173_vm2, %v2390_v6, -inf }
 0x90f   :  { %v2309_v11 = vpop.f32.mrf.mxu1  ;;  %2408 = vmax.xlane.f32.xlu0 %v2407_v9  ;;  %2405 = vmax.xlane.f32.xlu1 %v2404_v10  ;;  %v2235_v12 = vpop.f32.mrf.mxu0 }
 0x910   :  { %v2393_v13 = vmul.f32 0.35355338, %v2309_v11  ;;  %v2392_v14 = vmul.f32 0.35355338, %v2235_v12 }
 0x911   :  { %v3755_v15 = vpop.f32.mrf.mxu0  ;;  %v3760_v16 = vpop.f32.mrf.mxu1 }
 0x912   :  { %v2413_v19 = vsel %vm173_vm2, %v2393_v13, -inf  ;;  %v2410_v20 = vsel %vm173_vm2, %v2392_v14, -inf }
 0x913   :  { %2414 = vmax.xlane.f32.xlu0 %v2413_v19  ;;  %2411 = vmax.xlane.f32.xlu1 %v2410_v20  ;;  %v2383_v21 = vpop.f32.mrf.mxu0 }
 0x914   :  { %v2394_v22 = vmul.f32 0.35355338, %v2383_v21 }
 0x915   :  { %v3765_v23 = vpop.f32.mrf.mxu0 }
 0x916   :  { %v2416_v24 = vsel %vm173_vm2, %v2394_v22, -inf }
 0x917   :  { %2417 = vmax.xlane.f32.xlu1 %v2416_v24 }
 0x921   :  { %v2397_v25 = vpop.xlane.xlu1 %2396 }
 0x922   :  { %v2419_v26 = vsub.f32 %v2387_v55, %v2397_v25 }
 0x924   :  { %v2427_v30 = vmul.f32 1.442695, %v2419_v26 }
 0x926   :  { %v2400_v29 = vpop.xlane.xlu0 %2399  ;;  %3927 = vpow2.f32 %v2427_v30 }
 0x927   :  { %v2420_v31 = vsub.f32 %v2388_v59, %v2400_v29 }
 0x928   :  { %2559 = vrot.lane.b32.xlu1 %v4401_v35, %s3995_s23 }
 0x929   :  { %2483 = vrot.lane.b32.xlu0 %v4394_v32, %s3995_s23  ;;  %v2429_v33 = vmul.f32 1.442695, %v2420_v31 }
 0x92b   :  { %3929 = vpow2.f32 %v2429_v33 }
 0x92c   :  { %2635 = vrot.lane.b32.xlu1 %v4413_v37, %s3995_s23 }
 0x92d   :  { %2711 = vrot.lane.b32.xlu0 %v4431_v45, %s3995_s23 }
 0x930   :  { %2787 = vrot.lane.b32.xlu1 %v4441_v46, %s3995_s23 }
 0x931   :  { %2863 = vrot.lane.b32.xlu0 %v4443_v47, %s3995_s23 }
 0x933   :  { %v4499_v32 = vpop.eup %3927 }
 0x934   :  { %v2443_v34 = vsel %vm173_vm2, %v4499_v32, 0.0 }
 0x938   :  { %v4503_v35 = vpop.eup %3929 }
 0x939   :  { %v2446_v36 = vsel %vm173_vm2, %v4503_v35, 0.0 }
 0x950   :  { %2444 = vadd.xlane.f32.xlu0 %v2443_v34 }
 0x954   :  { %2447 = vadd.xlane.f32.xlu1 %v2446_v36 }
 0x994   :  { %v2403_v37 = vpop.xlane.xlu0 %2402 }
 0x995   :  { %v2421_v38 = vsub.f32 %v2389_v63, %v2403_v37 }
 0x997   :  { %v2431_v39 = vmul.f32 1.442695, %v2421_v38 }
 0x998   :  { %v2409_v40 = vpop.xlane.xlu0 %2408  ;;  %v2406_v41 = vpop.xlane.xlu1 %2405 }
 0x999   :  { %3931 = vpow2.f32 %v2431_v39  ;;  %v2423_v42 = vsub.f32 %v2391_v5, %v2409_v40  ;;  %v2422_v43 = vsub.f32 %v2390_v6, %v2406_v41 }
 0x99b   :  { %v2435_v44 = vmul.f32 1.442695, %v2423_v42  ;;  %v2433_v45 = vmul.f32 1.442695, %v2422_v43  ;;  %v3883_v43 = vld [vmem:[%s4648_s10 + $0x8] sm:$0xff]  }
 0x99c   :  { %v2415_v46 = vpop.xlane.xlu0 %2414  ;;  %v2412_v47 = vpop.xlane.xlu1 %2411 }
 0x99d   :  { %3933 = vpow2.f32 %v2435_v44  ;;  %v2425_v50 = vsub.f32 %v2393_v13, %v2415_v46  ;;  %v2424_v17 = vsub.f32 %v2392_v14, %v2412_v47  ;;  %v3884_v46 = vld [vmem:[%s4648_s10] sm:$0xff]  }
 0x99e   :  { %3935 = vpow2.f32 %v2433_v45 }
 0x99f   :  { %v2439_v18 = vmul.f32 1.442695, %v2425_v50  ;;  %v2437_v51 = vmul.f32 1.442695, %v2424_v17 }
 0x9a0   :  { %v2484_v52 = vpop.permute.xlu0 %2483  ;;  %v2418_v53 = vpop.xlane.xlu1 %2417 }
 0x9a1   :  { %3937 = vpow2.f32 %v2439_v18  ;;  %v2426_v54 = vsub.f32 %v2394_v22, %v2418_v53  ;;  %3767 = vmatpush3.msra.mxu1 %v2484_v52 }
 0x9a2   :  { %3939 = vpow2.f32 %v2437_v51  ;;  %3776 = vmatprep.subr.mxu1 %v3990_v0 }
 0x9a3   :  { %v2441_v55 = vmul.f32 1.442695, %v2426_v54 }
 0x9a4   :  { %v2560_v56 = vpop.permute.xlu1 %2559  ;;  %v2712_v6 = vpop.permute.xlu0 %2711 }
 0x9a5   :  { %3941 = vpow2.f32 %v2441_v55  ;;  %3772 = vmatpush3.msra.mxu0 %v2560_v56 }
 0x9a6   :  { %v3932_v57 = vpop.eup %3931  ;;  %3781 = vmatprep.subr.mxu0 %v3990_v0 }
 0x9a7   :  { %v2449_v58 = vsel %vm173_vm2, %v3932_v57, 0.0 }
 0x9a8   :  { %2450 = vadd.xlane.f32.xlu0 %v2449_v58  ;;  %v2636_v7 = vpop.permute.xlu1 %2635  ;;  %v2864_v8 = vpop.permute.xlu0 %2863 }
 0x9aa   :  { %v3934_v59 = vpop.eup %3933 }
 0x9ab   :  { %v3936_v60 = vpop.eup %3935  ;;  %v2455_v61 = vsel %vm173_vm2, %v3934_v59, 0.0 }
 0x9ac   :  { %2456 = vadd.xlane.f32.xlu0 %v2455_v61  ;;  %v2452_v62 = vsel %vm173_vm2, %v3936_v60, 0.0  ;;  %v2788_v9 = vpop.permute.xlu1 %2787 }
 0x9ad   :  { %2453 = vadd.xlane.f32.xlu1 %v2452_v62 }
 0x9ae   :  { %v3938_v63 = vpop.eup %3937 }
 0x9af   :  { %v4512_v3 = vpop.eup %3939  ;;  %v2461_v1 = vsel %vm173_vm2, %v3938_v63, 0.0 }
 0x9b0   :  { %2462 = vadd.xlane.f32.xlu0 %v2461_v1  ;;  %v2458_v2 = vsel %vm173_vm2, %v4512_v3, 0.0 }
 0x9b1   :  { %2459 = vadd.xlane.f32.xlu1 %v2458_v2 }
 0x9b2   :  { %v4517_v4 = vpop.eup %3941 }
 0x9b3   :  { %v2464_v5 = vsel %vm173_vm2, %v4517_v4, 0.0 }
 0x9b5   :  { %2465 = vadd.xlane.f32.xlu1 %v2464_v5 }
 0x9c6   :  { %2939 = vrot.lane.b32.xlu1 %v4445_v48, %s3995_s23  ;;  %3015 = vrot.lane.b32.xlu0 %v4447_v49, %s3995_s23 }
 0x9d9   :  { %v2445_v10 = vpop.xlane.xlu0 %2444 }
 0x9da   :  { %3943 = vrcp.f32 %v2445_v10 }
 0x9dd   :  { %v2448_v11 = vpop.xlane.xlu1 %2447 }
 0x9de   :  { %3945 = vrcp.f32 %v2448_v11 }
 0x9e7   :  { %v3944_v12 = vpop.eup %3943 }
 0x9e8   :  { %v2475_v13 = vmul.f32 %v3944_v12, %v4499_v32  ;;  %v3509_v12 = vld [vmem:[%s4649_s11] ss:$0 sm:$0xff] }
 0x9ea   :  { %3769 = vmatmul.mubr.msk.f32.vlgmr.msra.gmra.mxu1 %vm173_vm2, %v2475_v13 }
 0x9eb   :  { %v3946_v14 = vpop.eup %3945  ;;  %3777 = vmatpush3.msra.mxu1 %v2636_v7  ;;  %3778 = vmatprep.mubr.msk.f32.mxu1 %vm3991_vm0, %v3990_v0 }
 0x9ec   :  { %v2476_v48 = vmul.f32 %v3946_v14, %v4503_v35  ;;  %3786 = vmatprep.subr.mxu1 %v3990_v0 }
 0x9ee   :  { %3774 = vmatmul.mubr.msk.f32.vlgmr.msra.gmra.mxu0 %vm173_vm2, %v2476_v48 }
 0x9ef   :  { %3782 = vmatpush3.msra.mxu0 %v2712_v6  ;;  %3783 = vmatprep.mubr.msk.f32.mxu0 %vm3991_vm0, %v3990_v0 }
 0x9f0   :  { %3791 = vmatprep.subr.mxu0 %v3990_v0 }
 0xa31   :  { %v2451_v49 = vpop.xlane.xlu0 %2450 }
 0xa32   :  { %3947 = vrcp.f32 %v2451_v49 }
 0xa35   :  { %v2457_v15 = vpop.xlane.xlu0 %2456 }
 0xa36   :  { %3949 = vrcp.f32 %v2457_v15  ;;  %v2454_v16 = vpop.xlane.xlu1 %2453 }
 0xa37   :  { %3951 = vrcp.f32 %v2454_v16 }
 0xa39   :  { %v2463_v19 = vpop.xlane.xlu0 %2462 }
 0xa3a   :  { %3953 = vrcp.f32 %v2463_v19  ;;  %v2460_v20 = vpop.xlane.xlu1 %2459 }
 0xa3b   :  { %3955 = vrcp.f32 %v2460_v20 }
 0xa3d   :  { %v3016_v35 = vpop.permute.xlu0 %3015 }
 0xa3e   :  { %v2466_v21 = vpop.xlane.xlu1 %2465 }
 0xa3f   :  { %v3948_v22 = vpop.eup %3947  ;;  %3957 = vrcp.f32 %v2466_v21 }
 0xa40   :  { %v2477_v23 = vmul.f32 %v3948_v22, %v3932_v57 }
 0xa42   :  { %3779 = vmatmul.mubr.msk.f32.vlgmr.msra.gmra.mxu1 %vm173_vm2, %v2477_v23  ;;  %v2940_v30 = vpop.permute.xlu1 %2939 }
 0xa43   :  { %v3950_v24 = vpop.eup %3949  ;;  %3787 = vmatpush3.msra.mxu1 %v2788_v9  ;;  %3788 = vmatprep.mubr.msk.f32.mxu1 %vm3991_vm0, %v3990_v0 }
 0xa44   :  { %v3952_v25 = vpop.eup %3951  ;;  %3796 = vmatprep.subr.mxu1 %v3990_v0  ;;  %v2479_v26 = vmul.f32 %v3950_v24, %v3934_v59 }
 0xa45   :  { %v2478_v29 = vmul.f32 %v3952_v25, %v3936_v60 }
 0xa46   :  { %3789 = vmatmul.mubr.msk.f32.vlgmr.msra.gmra.mxu1 %vm173_vm2, %v2479_v26 }
 0xa47   :  { %v3954_v31 = vpop.eup %3953  ;;  %3784 = vmatmul.mubr.msk.f32.vlgmr.msra.gmra.mxu0 %vm173_vm2, %v2478_v29  ;;  %3797 = vmatpush3.msra.mxu1 %v2940_v30 }
 0xa48   :  { %v3956_v33 = vpop.eup %3955  ;;  %3792 = vmatpush3.msra.mxu0 %v2864_v8  ;;  %3793 = vmatprep.mubr.msk.f32.mxu0 %vm3991_vm0, %v3990_v0  ;;  %v2481_v32 = vmul.f32 %v3954_v31, %v3938_v63 }
 0xa49   :  { %3798 = vmatprep.mubr.msk.f32.mxu1 %vm3991_vm0, %v3990_v0  ;;  %3801 = vmatprep.subr.mxu0 %v3990_v0  ;;  %v2480_v34 = vmul.f32 %v3956_v33, %v4512_v3 }
 0xa4a   :  { %3799 = vmatmul.mubr.msk.f32.vlgmr.msra.gmra.mxu1 %vm173_vm2, %v2481_v32  ;;  %3806 = vmatprep.subr.bf16.mxu1 %v3990_v0 }
 0xa4b   :  { %3794 = vmatmul.mubr.msk.f32.vlgmr.msra.gmra.mxu0 %vm173_vm2, %v2480_v34  ;;  %3810 = vmatprep.mubr.msk.bf16.mxu1 %vm3991_vm0, %v3990_v0  ;;  %v3886_v34 = vld [vmem:[%s4650_s12] sm:$0xff]  }
 0xa4c   :  { %v3958_v36 = vpop.eup %3957  ;;  %3802 = vmatpush3.msra.mxu0 %v3016_v35  ;;  %3803 = vmatprep.mubr.msk.f32.mxu0 %vm3991_vm0, %v3990_v0  ;;  %v3887_v35 = vld [vmem:[%s4652_s14 + $0x18] sm:$0xff]  }
 0xa4d   :  { %v2482_v37 = vmul.f32 %v3958_v36, %v4517_v4  ;;  %3814 = vmatprep.subr.bf16.mxu0 %v3990_v0  ;;  %3807 = vmatpush3.bf16.msra.mxu1 %v3883_v43 }
 0xa4e   :  { %3808 = vmatprep.subr.bf16.mxu1 %v3990_v0 }
 0xa4f   :  { %3804 = vmatmul.mubr.msk.f32.vlgmr.msra.gmra.mxu0 %vm173_vm2, %v2482_v37 }
 0xa50   :  { %3818 = vmatprep.mubr.msk.bf16.mxu0 %vm3991_vm0, %v3990_v0 }
 0xa51   :  { %3809 = vmatpush3.bf16.msra.mxu1 %v3884_v46 }
 0xa52   :  { %3822 = vmatprep.subr.bf16.mxu1 %v3990_v0 }
 0xaaa   :  { %v2555_v38 = vpop.f32.mrf.mxu1 }
 0xaac   :  { %v3770_v39 = vpop.f32.mrf.mxu1 }
 0xaae   :  { %v2631_v40 = vpop.f32.mrf.mxu0 }
 0xab0   :  { %v3775_v41 = vpop.f32.mrf.mxu0 }
 0xb02   :  { %v2707_v42 = vpop.f32.mrf.mxu1 }
 0xb04   :  { %v3780_v44 = vpop.f32.mrf.mxu1 }
 0xb05   :  { %v3513_v44 = vld [vmem:[%s4656_s18] ss:$0 sm:$0xff] }
 0xb06   :  { %v2859_v45 = vpop.f32.mrf.mxu1 }
 0xb07   :  { %v2783_v47 = vpop.f32.mrf.mxu0 }
 0xb08   :  { %v3860_v50 = vpack.i.bf16 %v2783_v47, %v2707_v42  ;;  %v3790_v17 = vpop.f32.mrf.mxu1 }
 0xb09   :  { %v3785_v18 = vpop.f32.mrf.mxu0 }
 0xb0a   :  { %3861 = vrot.lane.b32.xlu1 %v3860_v50, %s3997_s26  ;;  %v3011_v51 = vpop.f32.mrf.mxu1  ;;  %v3514_v50 = vld [vmem:[%s4657_s19] ss:$0 sm:$0xff] }
 0xb0b   :  { %v2935_v52 = vpop.f32.mrf.mxu0 }
 0xb0c   :  { %v3865_v53 = vpack.i.bf16 %v2935_v52, %v2859_v45  ;;  %v3800_v54 = vpop.f32.mrf.mxu1 }
 0xb0d   :  { %v3795_v55 = vpop.f32.mrf.mxu0  ;;  %v3889_v54 = vld [vmem:[%s4652_s14 + $0x8] sm:$0xff]  }
 0xb0e   :  { %3866 = vrot.lane.b32.xlu0 %v3865_v53, %s3998_s2  ;;  %v3888_v53 = vld [vmem:[%s4652_s14 + $0x10] sm:$0xff]   ;;  %v3890_v55 = vld [vmem:[%s4652_s14] sm:$0xff]  }
 0xb0f   :  { %v3087_v56 = vpop.f32.mrf.mxu0 }
 0xb10   :  { %v3870_v57 = vpack.i.bf16 %v3087_v56, %v3011_v51  ;;  %v3515_v56 = vld [vmem:[%s4651_s13] ss:$0 sm:$0xff] }
 0xb11   :  { %v3805_v58 = vpop.f32.mrf.mxu0 }
 0xb12   :  { %3871 = vrot.lane.b32.xlu1 %v3870_v57, %s3999_s27 }
 0xb7c   :  { %v3862_v59 = vpop.permute.xlu1 %3861 }
 0xb7d   :  { %v3864_v61 = vunpack.i.h.bf16 %v3862_v59  ;;  %v3863_v62 = vunpack.i.l.bf16 %v3862_v59 }
 0xb7f   :  { %v3116_v2 = vsel %vm173_vm2, %v2631_v40, %v3864_v61  ;;  %v3115_v4 = vsel %vm173_vm2, %v2555_v38, %v3863_v62 }
 0xb80   :  { %v3867_v60 = vpop.permute.xlu0 %3866 }
 0xb81   :  { %v3869_v63 = vunpack.i.h.bf16 %v3867_v60  ;;  %v3868_v3 = vunpack.i.l.bf16 %v3867_v60 }
 0xb83   :  { %v3118_v7 = vsel %vm1510_vm3, %v3116_v2, %v3869_v63  ;;  %v3117_v8 = vsel %vm1510_vm3, %v3115_v4, %v3868_v3 }
 0xb84   :  { %v3872_v1 = vpop.permute.xlu1 %3871 }
 0xb85   :  { %v3874_v5 = vunpack.i.h.bf16 %v3872_v1  ;;  %v3873_v6 = vunpack.i.l.bf16 %v3872_v1 }
 0xb87   :  { %v3120_v9 = vsel %vm1513_vm4, %v3118_v7, %v3874_v5  ;;  %v3119_v10 = vsel %vm1513_vm4, %v3117_v8, %v3873_v6 }
 0xb88   :  { %v3126_v11 = vpack.c.bf16 %v3120_v9, %v3119_v10 }
 0xb8a   :  { %3811 = vmatmul.mubr.msk.bf16.vlgmr.msra.gmra.mxu1 %vm112_vm1, %v3126_v11 }
 0xb8b   :  { %3830 = vmatprep.mubr.msk.bf16.mxu1 %vm3991_vm0, %v3990_v0  ;;  %3823 = vmatpush3.bf16.msra.mxu1 %v3887_v35 }
 0xb8c   :  { %3824 = vmatprep.subr.bf16.mxu1 %v3990_v0 }
 0xb8f   :  { %3825 = vmatpush3.bf16.msra.mxu1 %v3888_v53 }
 0xb90   :  { %3826 = vmatprep.subr.bf16.mxu1 %v3990_v0 }
 0xb93   :  { %3827 = vmatpush3.bf16.msra.mxu1 %v3889_v54 }
 0xb94   :  { %3828 = vmatprep.subr.bf16.mxu1 %v3990_v0 }
 0xb97   :  { %3829 = vmatpush3.bf16.msra.mxu1 %v3890_v55 }
 0xc4a   :  { %v3182_v13 = vpop.f32.mrf.mxu1 }
 0xc4b   :  { %v3183_v14 = vadd.f32 %v3509_v12, %v3182_v13 }
 0xc4c   :  { %v3812_v48 = vpop.f32.mrf.mxu1 }
 0xc4d   :  { %v3189_v49 = vadd.f32 %v3183_v14, %v4382_v27 }
 0xc4e   :  { %v3185_v15 = vpop.f32.mrf.mxu1 }
 0xc4f   :  { %v3186_v16 = vadd.f32 %v3509_v12, %v3185_v15  ;;  %v3193_v19 = vsel %vm112_vm1, %v3189_v49, 0.0 }
 0xc50   :  { %3194 = vadd.xlane.f32.xlu0 %v3193_v19  ;;  %v3813_v20 = vpop.f32.mrf.mxu1 }
 0xc51   :  { %v3190_v21 = vadd.f32 %v3186_v16, %v4384_v28  ;;  %v3885_v28 = vld [vmem:[%s4650_s12 + $0x8] sm:$0xff]  }
 0xc52   :  { %3815 = vmatpush3.bf16.msra.mxu0 %v3885_v28 }
 0xc53   :  { %v3196_v22 = vsel %vm112_vm1, %v3190_v21, 0.0  ;;  %3816 = vmatprep.subr.bf16.mxu0 %v3990_v0  ;;  %v3519_v0 = vld [vmem:[%s4653_s15] ss:$0 sm:$0xff] }
 0xc54   :  { %3197 = vadd.xlane.f32.xlu1 %v3196_v22 }
 0xc56   :  { %3817 = vmatpush3.bf16.msra.mxu0 %v3886_v34 }
 0xcd9   :  { %v3195_v23 = vpop.xlane.xlu0 %3194 }
 0xcda   :  { %v3199_v24 = vmul.f32 0.03125, %v3195_v23 }
 0xcdc   :  { %v3201_v25 = vsub.f32 %v3189_v49, %v3199_v24 }
 0xcdd   :  { %v3198_v26 = vpop.xlane.xlu1 %3197 }
 0xcde   :  { %v3200_v29 = vmul.f32 0.03125, %v3198_v26  ;;  %v3203_v30 = vmul.f32 %v3201_v25, %v3201_v25 }
 0xce0   :  { %v3202_v31 = vsub.f32 %v3190_v21, %v3200_v29  ;;  %v3205_v27 = vsel %vm112_vm1, %v3203_v30, 0.0 }
 0xce1   :  { %3206 = vadd.xlane.f32.xlu0 %v3205_v27  ;;  %v3525_v27 = vld [vmem:[%s4658_s20] ss:$0 sm:$0xff] }
 0xce2   :  { %v3204_v33 = vmul.f32 %v3202_v31, %v3202_v31 }
 0xce4   :  { %v3208_v32 = vsel %vm112_vm1, %v3204_v33, 0.0 }
 0xce5   :  { %3209 = vadd.xlane.f32.xlu0 %v3208_v32  ;;  %v3526_v32 = vld [vmem:[#allocation2] ss:$0 sm:$0xff] }
 0xd6a   :  { %v3207_v36 = vpop.xlane.xlu0 %3206 }
 0xd6b   :  { %v3211_v37 = vmul.f32 0.03125, %v3207_v36 }
 0xd6d   :  { %v3213_v38 = vadd.f32 1e-05, %v3211_v37 }
 0xd6e   :  { %v3210_v39 = vpop.xlane.xlu0 %3209 }
 0xd6f   :  { %3959 = vrsqrt.f32 %v3213_v38  ;;  %v3212_v40 = vmul.f32 0.03125, %v3210_v39 }
 0xd71   :  { %v3214_v41 = vadd.f32 1e-05, %v3212_v40 }
 0xd73   :  { %3961 = vrsqrt.f32 %v3214_v41 }
 0xd7c   :  { %v3960_v42 = vpop.eup %3959 }
 0xd7d   :  { %v3217_v43 = vmul.f32 %v3960_v42, %v3201_v25 }
 0xd7f   :  { %v3225_v47 = vmul.f32 %v3513_v44, %v3217_v43 }
 0xd80   :  { %v3962_v45 = vpop.eup %3961 }
 0xd81   :  { %v3218_v46 = vmul.f32 %v3962_v45, %v3202_v31  ;;  %v3233_v18 = vadd.f32 %v3514_v50, %v3225_v47 }
 0xd83   :  { %v3226_v17 = vmul.f32 %v3513_v44, %v3218_v46 }
 0xd85   :  { %v3234_v51 = vadd.f32 %v3514_v50, %v3226_v17 }
 0xd87   :  { %v3240_v52 = vpack.c.bf16 %v3234_v51, %v3233_v18 }
 0xd89   :  { %3819 = vmatmul.mubr.msk.bf16.vlgmr.msra.gmra.mxu0 %vm112_vm1, %v3240_v52 }
 0xe49   :  { %v3296_v57 = vpop.f32.mrf.mxu0 }
 0xe4a   :  { %v3297_v59 = vadd.f32 %v3515_v56, %v3296_v57 }
 0xe4b   :  { %v3820_v58 = vpop.f32.mrf.mxu0 }
 0xe4c   :  { %v3303_v63 = vmax.f32 %v3297_v59, 0.0 }
 0xe4d   :  { %v3299_v60 = vpop.f32.mrf.mxu0 }
 0xe4e   :  { %v3300_v61 = vadd.f32 %v3515_v56, %v3299_v60 }
 0xe4f   :  { %v3821_v62 = vpop.f32.mrf.mxu0 }
 0xe50   :  { %v3304_v3 = vmax.f32 %v3300_v61, 0.0 }
 0xe52   :  { %v3314_v1 = vpack.c.bf16 %v3304_v3, %v3303_v63 }
 0xe54   :  { %3831 = vmatmul.mubr.msk.bf16.vlgmr.msra.gmra.mxu1 %vm3345_vm5, %v3314_v1 }
 0xf14   :  { %v3383_v2 = vpop.f32.mrf.mxu1 }
 0xf15   :  { %v3384_v4 = vadd.f32 %v3519_v0, %v3383_v2 }
 0xf16   :  { %v3832_v5 = vpop.f32.mrf.mxu1 }
 0xf17   :  { %v3390_v6 = vadd.f32 %v3384_v4, %v3233_v18 }
 0xf18   :  { %v3386_v7 = vpop.f32.mrf.mxu1 }
 0xf19   :  { %v3387_v8 = vadd.f32 %v3519_v0, %v3386_v7  ;;  %v3394_v9 = vsel %vm112_vm1, %v3390_v6, 0.0 }
 0xf1a   :  { %3395 = vadd.xlane.f32.xlu1 %v3394_v9  ;;  %v3833_v10 = vpop.f32.mrf.mxu1 }
 0xf1b   :  { %v3391_v11 = vadd.f32 %v3387_v8, %v3234_v51 }
 0xf1d   :  { %v3397_v12 = vsel %vm112_vm1, %v3391_v11, 0.0 }
 0xf1e   :  { %3398 = vadd.xlane.f32.xlu0 %v3397_v12 }
 0xfa3   :  { %v3396_v13 = vpop.xlane.xlu1 %3395 }
 0xfa4   :  { %v3400_v14 = vmul.f32 0.03125, %v3396_v13 }
 0xfa6   :  { %v3402_v48 = vsub.f32 %v3390_v6, %v3400_v14 }
 0xfa7   :  { %v3399_v49 = vpop.xlane.xlu0 %3398 }
 0xfa8   :  { %v3401_v15 = vmul.f32 0.03125, %v3399_v49  ;;  %v3404_v16 = vmul.f32 %v3402_v48, %v3402_v48 }
 0xfaa   :  { %v3403_v19 = vsub.f32 %v3391_v11, %v3401_v15  ;;  %v3406_v20 = vsel %vm112_vm1, %v3404_v16, 0.0 }
 0xfab   :  { %3407 = vadd.xlane.f32.xlu1 %v3406_v20 }
 0xfac   :  { %v3405_v21 = vmul.f32 %v3403_v19, %v3403_v19 }
 0xfae   :  { %v3409_v22 = vsel %vm112_vm1, %v3405_v21, 0.0 }
 0xfaf   :  { %3410 = vadd.xlane.f32.xlu0 %v3409_v22 }
0x1034   :  { %v3408_v23 = vpop.xlane.xlu1 %3407 }
0x1035   :  { %v3412_v24 = vmul.f32 0.03125, %v3408_v23 }
0x1037   :  { %v3414_v25 = vadd.f32 1e-05, %v3412_v24 }
0x1038   :  { %v3411_v26 = vpop.xlane.xlu0 %3410 }
0x1039   :  { %3963 = vrsqrt.f32 %v3414_v25  ;;  %v3413_v29 = vmul.f32 0.03125, %v3411_v26 }
0x103b   :  { %v3415_v30 = vadd.f32 1e-05, %v3413_v29 }
0x103d   :  { %3965 = vrsqrt.f32 %v3415_v30 }
0x1046   :  { %v3964_v31 = vpop.eup %3963 }
0x1047   :  { %v3418_v33 = vmul.f32 %v3964_v31, %v3402_v48 }
0x1049   :  { %v3426_v28 = vmul.f32 %v3525_v27, %v3418_v33 }
0x104a   :  { %v3966_v34 = vpop.eup %3965 }
0x104b   :  { %v3434_v35 = vadd.f32 %v3526_v32, %v3426_v28  ;;  %v3419_v36 = vmul.f32 %v3966_v34, %v3403_v19 }
0x104d   :  { %3436 = vst.msk [vmem:[%s4660_s22] sm:$0xff] %vm112_vm1, %v3434_v35  ;;  %v3427_v37 = vmul.f32 %v3525_v27, %v3419_v36 }
0x104f   :  { %v3435_v38 = vadd.f32 %v3526_v32, %v3427_v37 }
0x1051   :  { %3437 = vst.msk [vmem:[%s4660_s22 + $0x8] sm:$0xff] %vm112_vm1, %v3435_v38 }
0x1052   :  { %3442 = vsyncpa [#allocation3], 1 }

// kernel: transformer_forward.9
= control target key start
LH: loop header
LB: loop body
LE: loop exit
PB: predicated region body
PF: predicated region fallthrough
CT: control target
= control target key end

     0   :  { %v3953_v0 = vmov 0.0   ;;  %vm3954_vm0 = vmmov 0   ;;  %vm100_vm1 = vcmask 261120   ;;  %s3956_s27 = smov 120   ;;  %s3958_s28 = smov 96   ;;  %vm161_vm2 = vcmask 64512   ;;  %s4601_s2 = inlined_call_operand.vmem [shape: bf16[32,96], index: 2, kind: input, shape index: {}]   ;;  %s4602_s0 = inlined_call_operand.vmem [shape: f32[16,32], index: 0, kind: input, shape index: {}]   ;;  %s4603_s3 = inlined_call_operand.vmem [shape: f32[1,96], index: 3, kind: input, shape index: {}]   ;;  %s4604_s4 = inlined_call_operand.vmem [shape: bf16[32,32], index: 4, kind: input, shape index: {}]   ;;  %s4605_s5 = inlined_call_operand.vmem [shape: f32[1,32], index: 5, kind: input, shape index: {}]   ;;  %s4606_s8 = inlined_call_operand.vmem [shape: bf16[32,64], index: 8, kind: input, shape index: {}]   ;;  %s4607_s1 = inlined_call_operand.vmem [shape: f32[16,32], index: 1, kind: input, shape index: {}]   ;;  %s4608_s6 = inlined_call_operand.vmem [shape: bf16[32,32], index: 6, kind: input, shape index: {}]   ;;  %s4609_s16 = inlined_call_operand.vmem [shape: f32[1,32], index: 16, kind: input, shape index: {}]   ;;  %s4610_s17 = inlined_call_operand.vmem [shape: f32[1,32], index: 17, kind: input, shape index: {}]   ;;  %s4611_s9 = inlined_call_operand.vmem [shape: f32[1,64], index: 9, kind: input, shape index: {}]   ;;  %s4612_s7 = inlined_call_operand.vmem [shape: f32[1,32], index: 7, kind: input, shape index: {}]   ;;  %s4613_s10 = inlined_call_operand.vmem [shape: bf16[32,32], index: 10, kind: input, shape index: {}]   ;;  %s4614_s11 = inlined_call_operand.vmem [shape: f32[1,32], index: 11, kind: input, shape index: {}]   ;;  %s4615_s12 = inlined_call_operand.vmem [shape: bf16[32,64], index: 12, kind: input, shape index: {}]   ;;  %s4616_s14 = inlined_call_operand.vmem [shape: bf16[64,32], index: 14, kind: input, shape index: {}]   ;;  %s4617_s18 = inlined_call_operand.vmem [shape: f32[1,32], index: 18, kind: input, shape index: {}]   ;;  %s4618_s19 = inlined_call_operand.vmem [shape: f32[1,32], index: 19, kind: input, shape index: {}]   ;;  %s4619_s13 = inlined_call_operand.vmem [shape: f32[1,64], index: 13, kind: input, shape index: {}]   ;;  %s4620_s15 = inlined_call_operand.vmem [shape: f32[1,32], index: 15, kind: input, shape index: {}]   ;;  %s4621_s20 = inlined_call_operand.vmem [shape: f32[1,32], index: 20, kind: input, shape index: {}]   ;;  %s4622_s21 = inlined_call_operand.vmem [shape: f32[1,32], index: 21, kind: input, shape index: {}]   ;;  %s4623_s22 = inlined_call_operand.vmem [shape: f32[16,32], index: 22, kind: output, shape index: {}]  }
   0x1   :  { %4631 = sst [smem:[#allocation2_spill]] %s4601_s2  ;;  %3601 = vmatprep.subr.bf16.mxu0 %v3953_v0  ;;  %3605 = vmatprep.mubr.msk.bf16.mxu0 %vm3954_vm0, %v3953_v0  ;;  %s4630_s24 = smov 16   ;;  %vm1498_vm3 = vcmask 130048   ;;  %vm1501_vm4 = vcmask 195584   ;;  %vm3333_vm5 = vcmask 523264  }
   0x2   :  { %4632 = sst [smem:[#allocation3_spill]] %s4602_s0  ;;  %3614 = vmatprep.subr.mxu1 %v3953_v0  ;;  %3616 = vmatprep.mubr.msk.f32.mxu1 %vm3954_vm0, %v3953_v0 }
   0x3   :  { %4633 = sst [smem:[#allocation4_spill]] %s4603_s3  ;;  %s3955_s3 = smov 112  }
   0x4   :  { %4634 = sst [smem:[#allocation5_spill]] %s4604_s4  ;;  %s3957_s4 = smov 104  }
   0x5   :  { %4635 = sst [smem:[#allocation6_spill]] %s4605_s5 }
   0x6   :  { %4636 = sst [smem:[#allocation7_spill]] %s4606_s8  ;;  %s3960_s8 = smov 8  }
   0x7   :  { %4637 = sst [smem:[#allocation8_spill]] %s4607_s1  ;;  %s4629_s1 = smov 24  }
   0x8   :  { %s4638_s29 = sld [smem:[#allocation2_spill]] }
   0x9   :  { %s4639_s0 = sld [smem:[#allocation3_spill]] }
   0xa   :  { %s4640_s26 = sld [smem:[#allocation4_spill]] }
   0xb   :  { %s4641_s2 = sld [smem:[#allocation5_spill]] }
   0xe   :  { %v3861_v1 = vld [vmem:[%s4638_s29 + $0x8] sm:$0xff]   ;;  %v3862_v2 = vld [vmem:[%s4638_s29] sm:$0xff]   ;;  %s3959_s29 = smov 64  }
   0xf   :  { %3602 = vmatpush3.bf16.msra.mxu0 %v3861_v1  ;;  %v4093_v3 = vld [vmem:[%s4639_s0] sm:$0xff]  ;;  %v4098_v4 = vld [vmem:[%s4639_s0 + $0x8] sm:$0xff] }
  0x10   :  { %3603 = vmatprep.subr.bf16.mxu0 %v3953_v0  ;;  %v81_v5 = vpack.c.bf16 %v4098_v4, %v4093_v3  ;;  %v3430_v6 = vld [vmem:[%s4640_s26] ss:$0 sm:$0xff] }
  0x13   :  { %3604 = vmatpush3.bf16.msra.mxu0 %v3862_v2 }
  0x14   :  { %3609 = vmatprep.subr.mxu0 %v3953_v0 }
  0x16   :  { %3606 = vmatmul.mubr.msk.bf16.vlgmr.msra.gmra.mxu0 %vm100_vm1, %v81_v5 }
  0x17   :  { %3611 = vmatprep.mubr.msk.f32.mxu0 %vm3954_vm0, %v3953_v0 }
  0xd6   :  { %v138_v7 = vpop.f32.mrf.mxu0 }
  0xd7   :  { %v4110_v8 = vadd.f32 %v3430_v6, %v138_v7 }
  0xd8   :  { %v3607_v9 = vpop.f32.mrf.mxu0 }
  0xd9   :  { %151 = vrot.lane.b32.xlu1 %v4110_v8, %s3955_s3  ;;  %147 = vrot.lane.b32.xlu0 %v4110_v8, %s3956_s27 }
  0xda   :  { %v141_v10 = vpop.f32.mrf.mxu0 }
  0xdb   :  { %v4116_v11 = vadd.f32 %v3430_v6, %v141_v10 }
  0xdc   :  { %v3608_v12 = vpop.f32.mrf.mxu0 }
  0xdd   :  { %153 = vrot.lane.b32.xlu1 %v4116_v11, %s3955_s3  ;;  %149 = vrot.lane.b32.xlu0 %v4116_v11, %s3956_s27 }
  0xe1   :  { %157 = vrot.lane.b32.xlu1 %v4116_v11, %s3957_s4  ;;  %155 = vrot.lane.b32.xlu0 %v4110_v8, %s3957_s4 }
  0xe5   :  { %236 = vrot.lane.b32.xlu1 %v4116_v11, %s3958_s28  ;;  %159 = vrot.lane.b32.xlu0 %v4110_v8, %s3958_s28 }
 0x14b   :  { %v4130_v13 = vpop.permute.xlu1 %151  ;;  %v4132_v14 = vpop.permute.xlu0 %147 }
 0x14c   :  { %312 = vrot.lane.b32.xlu0 %v4132_v14, %s3958_s28 }
 0x14f   :  { %v4136_v15 = vpop.permute.xlu1 %153  ;;  %v4138_v16 = vpop.permute.xlu0 %149 }
 0x150   :  { %464 = vrot.lane.b32.xlu0 %v4130_v13, %s3958_s28  ;;  %388 = vrot.lane.b32.xlu1 %v4138_v16, %s3958_s28 }
 0x153   :  { %v4144_v17 = vpop.permute.xlu1 %157  ;;  %v4146_v18 = vpop.permute.xlu0 %155 }
 0x154   :  { %540 = vrot.lane.b32.xlu1 %v4136_v15, %s3958_s28  ;;  %616 = vrot.lane.b32.xlu0 %v4146_v18, %s3958_s28 }
 0x157   :  { %v237_v19 = vpop.permute.xlu1 %236  ;;  %v160_v20 = vpop.permute.xlu0 %159 }
 0x158   :  { %3615 = vmatpush3.xpose.msk.msra.mxu1 %vm161_vm2, %v237_v19  ;;  %692 = vrot.lane.b32.xlu1 %v4144_v17, %s3958_s28 }
 0x159   :  { %3610 = vmatpush3.xpose.msk.msra.mxu0 %vm161_vm2, %v160_v20  ;;  %3619 = vmatprep.subr.mxu1 %v3953_v0 }
 0x15a   :  { %3624 = vmatprep.subr.mxu0 %v3953_v0 }
 0x15b   :  { %3617 = vmatmul.mubr.msk.f32.vlgmr.msra.gmra.mxu1 %vm161_vm2, %v4116_v11 }
 0x15c   :  { %3612 = vmatmul.mubr.msk.f32.vlgmr.msra.gmra.mxu0 %vm161_vm2, %v4110_v8  ;;  %3621 = vmatprep.mubr.msk.f32.mxu1 %vm3954_vm0, %v3953_v0 }
 0x15d   :  { %3626 = vmatprep.mubr.msk.f32.mxu0 %vm3954_vm0, %v3953_v0 }
 0x1be   :  { %v313_v21 = vpop.permute.xlu0 %312 }
 0x1bf   :  { %3620 = vmatpush3.xpose.msk.msra.mxu1 %vm161_vm2, %v313_v21 }
 0x1c0   :  { %3629 = vmatprep.subr.mxu1 %v3953_v0 }
 0x1c2   :  { %v389_v22 = vpop.permute.xlu1 %388  ;;  %3622 = vmatmul.mubr.msk.f32.vlgmr.msra.gmra.mxu1 %vm161_vm2, %v4132_v14  ;;  %v465_v23 = vpop.permute.xlu0 %464 }
 0x1c3   :  { %3625 = vmatpush3.xpose.msk.msra.mxu0 %vm161_vm2, %v389_v22  ;;  %3630 = vmatpush3.xpose.msk.msra.mxu1 %vm161_vm2, %v465_v23 }
 0x1c4   :  { %3631 = vmatprep.mubr.msk.f32.mxu1 %vm3954_vm0, %v3953_v0  ;;  %3634 = vmatprep.subr.mxu0 %v3953_v0 }
 0x1c5   :  { %3639 = vmatprep.subr.mxu1 %v3953_v0 }
 0x1c6   :  { %v541_v24 = vpop.permute.xlu1 %540  ;;  %3627 = vmatmul.mubr.msk.f32.vlgmr.msra.gmra.mxu0 %vm161_vm2, %v4138_v16  ;;  %3632 = vmatmul.mubr.msk.f32.vlgmr.msra.gmra.mxu1 %vm161_vm2, %v4130_v13  ;;  %v617_v25 = vpop.permute.xlu0 %616 }
 0x1c7   :  { %3635 = vmatpush3.xpose.msk.msra.mxu0 %vm161_vm2, %v541_v24  ;;  %3640 = vmatpush3.xpose.msk.msra.mxu1 %vm161_vm2, %v617_v25 }
 0x1c8   :  { %3636 = vmatprep.mubr.msk.f32.mxu0 %vm3954_vm0, %v3953_v0  ;;  %3641 = vmatprep.mubr.msk.f32.mxu1 %vm3954_vm0, %v3953_v0 }
 0x1c9   :  { %3644 = vmatprep.subr.mxu0 %v3953_v0  ;;  %3649 = vmatprep.subr.mxu1 %v3953_v0 }
 0x1ca   :  { %v693_v26 = vpop.permute.xlu1 %692  ;;  %3637 = vmatmul.mubr.msk.f32.vlgmr.msra.gmra.mxu0 %vm161_vm2, %v4136_v15  ;;  %3642 = vmatmul.mubr.msk.f32.vlgmr.msra.gmra.mxu1 %vm161_vm2, %v4146_v18 }
 0x1cb   :  { %3645 = vmatpush3.xpose.msk.msra.mxu0 %vm161_vm2, %v693_v26  ;;  %3646 = vmatprep.mubr.msk.f32.mxu0 %vm3954_vm0, %v3953_v0 }
 0x1cc   :  { %3654 = vmatprep.subr.mxu0 %v3953_v0  ;;  %3651 = vmatprep.mubr.msk.f32.mxu1 %vm3954_vm0, %v3953_v0 }
 0x1ce   :  { %3647 = vmatmul.mubr.msk.f32.vlgmr.msra.gmra.mxu0 %vm161_vm2, %v4144_v17 }
 0x1cf   :  { %3656 = vmatprep.mubr.msk.f32.mxu0 %vm3954_vm0, %v3953_v0 }
 0x21b   :  { %v308_v27 = vpop.f32.mrf.mxu1 }
 0x21c   :  { %v232_v28 = vpop.f32.mrf.mxu0  ;;  %v769_v29 = vmul.f32 0.35355338, %v308_v27 }
 0x21d   :  { %v768_v30 = vmul.f32 0.35355338, %v232_v28  ;;  %v3618_v31 = vpop.f32.mrf.mxu1 }
 0x21e   :  { %v3613_v32 = vpop.f32.mrf.mxu0  ;;  %v779_v33 = vsel %vm161_vm2, %v769_v29, -inf }
 0x21f   :  { %780 = vmax.xlane.f32.xlu1 %v779_v33  ;;  %v776_v34 = vsel %vm161_vm2, %v768_v30, -inf }
 0x220   :  { %777 = vmax.xlane.f32.xlu0 %v776_v34 }
 0x282   :  { %v384_v35 = vpop.f32.mrf.mxu1 }
 0x283   :  { %v770_v36 = vmul.f32 0.35355338, %v384_v35 }
 0x284   :  { %v3623_v37 = vpop.f32.mrf.mxu1 }
 0x285   :  { %v782_v38 = vsel %vm161_vm2, %v770_v36, -inf }
 0x286   :  { %v536_v39 = vpop.f32.mrf.mxu1  ;;  %783 = vmax.xlane.f32.xlu0 %v782_v38  ;;  %v460_v40 = vpop.f32.mrf.mxu0 }
 0x287   :  { %v772_v41 = vmul.f32 0.35355338, %v536_v39  ;;  %v771_v42 = vmul.f32 0.35355338, %v460_v40 }
 0x288   :  { %v3628_v43 = vpop.f32.mrf.mxu0  ;;  %v3633_v44 = vpop.f32.mrf.mxu1 }
 0x289   :  { %v788_v45 = vsel %vm161_vm2, %v772_v41, -inf  ;;  %v785_v46 = vsel %vm161_vm2, %v771_v42, -inf }
 0x28a   :  { %789 = vmax.xlane.f32.xlu1 %v788_v45  ;;  %v688_v47 = vpop.f32.mrf.mxu1  ;;  %786 = vmax.xlane.f32.xlu0 %v785_v46  ;;  %v612_v48 = vpop.f32.mrf.mxu0 }
 0x28b   :  { %v774_v49 = vmul.f32 0.35355338, %v688_v47  ;;  %v773_v50 = vmul.f32 0.35355338, %v612_v48 }
 0x28c   :  { %v3638_v51 = vpop.f32.mrf.mxu0  ;;  %v3643_v52 = vpop.f32.mrf.mxu1 }
 0x28d   :  { %v794_v53 = vsel %vm161_vm2, %v774_v49, -inf  ;;  %v791_v54 = vsel %vm161_vm2, %v773_v50, -inf }
 0x28e   :  { %795 = vmax.xlane.f32.xlu1 %v794_v53  ;;  %792 = vmax.xlane.f32.xlu0 %v791_v54  ;;  %v764_v55 = vpop.f32.mrf.mxu0 }
 0x28f   :  { %v775_v56 = vmul.f32 0.35355338, %v764_v55 }
 0x290   :  { %v3648_v57 = vpop.f32.mrf.mxu0 }
 0x291   :  { %v797_v58 = vsel %vm161_vm2, %v775_v56, -inf }
 0x292   :  { %798 = vmax.xlane.f32.xlu0 %v797_v58 }
 0x29f   :  { %864 = vrot.lane.b32.xlu1 %v4110_v8, %s3959_s29 }
 0x2a3   :  { %1016 = vrot.lane.b32.xlu1 %v4132_v14, %s3959_s29 }
 0x2a7   :  { %1092 = vrot.lane.b32.xlu1 %v4138_v16, %s3959_s29 }
 0x2a8   :  { %940 = vrot.lane.b32.xlu0 %v4116_v11, %s3959_s29  ;;  %v781_v59 = vpop.xlane.xlu1 %780 }
 0x2a9   :  { %v801_v60 = vsub.f32 %v769_v29, %v781_v59  ;;  %v778_v61 = vpop.xlane.xlu0 %777 }
 0x2aa   :  { %v800_v63 = vsub.f32 %v768_v30, %v778_v61 }
 0x2ab   :  { %1244 = vrot.lane.b32.xlu1 %v4136_v15, %s3959_s29  ;;  %v810_v62 = vmul.f32 1.442695, %v801_v60 }
 0x2ac   :  { %1168 = vrot.lane.b32.xlu0 %v4130_v13, %s3959_s29  ;;  %v808_v1 = vmul.f32 1.442695, %v800_v63 }
 0x2ad   :  { %3877 = vpow2.f32 %v810_v62 }
 0x2ae   :  { %3879 = vpow2.f32 %v808_v1 }
 0x2ba   :  { %v4222_v2 = vpop.eup %3877 }
 0x2bb   :  { %v827_v5 = vsel %vm161_vm2, %v4222_v2, 0.0  ;;  %v4226_v6 = vpop.eup %3879 }
 0x2bc   :  { %v824_v7 = vsel %vm161_vm2, %v4226_v6, 0.0 }
 0x2cb   :  { %828 = vadd.xlane.f32.xlu0 %v827_v5 }
 0x2cf   :  { %825 = vadd.xlane.f32.xlu1 %v824_v7 }
 0x30f   :  { %v784_v8 = vpop.xlane.xlu0 %783 }
 0x310   :  { %v802_v9 = vsub.f32 %v770_v36, %v784_v8 }
 0x312   :  { %v812_v10 = vmul.f32 1.442695, %v802_v9 }
 0x313   :  { %v790_v11 = vpop.xlane.xlu1 %789  ;;  %v787_v12 = vpop.xlane.xlu0 %786 }
 0x314   :  { %3881 = vpow2.f32 %v812_v10  ;;  %v804_v13 = vsub.f32 %v772_v41, %v790_v11  ;;  %v803_v14 = vsub.f32 %v771_v42, %v787_v12 }
 0x316   :  { %v816_v15 = vmul.f32 1.442695, %v804_v13  ;;  %v814_v16 = vmul.f32 1.442695, %v803_v14  ;;  %v3863_v14 = vld [vmem:[%s4641_s2 + $0x8] sm:$0xff]  }
 0x317   :  { %v796_v19 = vpop.xlane.xlu1 %795  ;;  %v793_v20 = vpop.xlane.xlu0 %792 }
 0x318   :  { %3883 = vpow2.f32 %v816_v15  ;;  %v806_v21 = vsub.f32 %v774_v49, %v796_v19  ;;  %v805_v22 = vsub.f32 %v773_v50, %v793_v20  ;;  %v3864_v19 = vld [vmem:[%s4641_s2] sm:$0xff]   ;;  %s4643_s2 = sld [smem:[#allocation7_spill]] }
 0x319   :  { %3885 = vpow2.f32 %v814_v16 }
 0x31a   :  { %v820_v23 = vmul.f32 1.442695, %v806_v21  ;;  %v818_v24 = vmul.f32 1.442695, %v805_v22 }
 0x31b   :  { %v865_v25 = vpop.permute.xlu1 %864  ;;  %v799_v26 = vpop.xlane.xlu0 %798 }
 0x31c   :  { %3887 = vpow2.f32 %v820_v23  ;;  %v807_v27 = vsub.f32 %v775_v56, %v799_v26  ;;  %3650 = vmatpush3.msra.mxu1 %v865_v25 }
 0x31d   :  { %3889 = vpow2.f32 %v818_v24  ;;  %3659 = vmatprep.subr.mxu1 %v3953_v0 }
 0x31e   :  { %v822_v28 = vmul.f32 1.442695, %v807_v27 }
 0x31f   :  { %v941_v29 = vpop.permute.xlu0 %940  ;;  %v1017_v42 = vpop.permute.xlu1 %1016 }
 0x320   :  { %3891 = vpow2.f32 %v822_v28  ;;  %3655 = vmatpush3.msra.mxu0 %v941_v29 }
 0x321   :  { %v3882_v30 = vpop.eup %3881  ;;  %3664 = vmatprep.subr.mxu0 %v3953_v0 }
 0x322   :  { %v830_v31 = vsel %vm161_vm2, %v3882_v30, 0.0 }
 0x323   :  { %831 = vadd.xlane.f32.xlu1 %v830_v31  ;;  %v1093_v43 = vpop.permute.xlu1 %1092  ;;  %v1169_v44 = vpop.permute.xlu0 %1168 }
 0x325   :  { %v3884_v32 = vpop.eup %3883 }
 0x326   :  { %v3886_v33 = vpop.eup %3885  ;;  %v836_v34 = vsel %vm161_vm2, %v3884_v32, 0.0 }
 0x327   :  { %837 = vadd.xlane.f32.xlu1 %v836_v34  ;;  %v833_v35 = vsel %vm161_vm2, %v3886_v33, 0.0  ;;  %v1245_v45 = vpop.permute.xlu1 %1244 }
 0x328   :  { %834 = vadd.xlane.f32.xlu0 %v833_v35 }
 0x329   :  { %v3888_v36 = vpop.eup %3887 }
 0x32a   :  { %v4235_v37 = vpop.eup %3889  ;;  %v842_v38 = vsel %vm161_vm2, %v3888_v36, 0.0 }
 0x32b   :  { %843 = vadd.xlane.f32.xlu1 %v842_v38  ;;  %v839_v39 = vsel %vm161_vm2, %v4235_v37, 0.0 }
 0x32c   :  { %840 = vadd.xlane.f32.xlu0 %v839_v39 }
 0x32d   :  { %v4240_v40 = vpop.eup %3891 }
 0x32e   :  { %v845_v41 = vsel %vm161_vm2, %v4240_v40, 0.0 }
 0x330   :  { %846 = vadd.xlane.f32.xlu0 %v845_v41 }
 0x33c   :  { %1396 = vrot.lane.b32.xlu1 %v4144_v17, %s3959_s29 }
 0x346   :  { %1320 = vrot.lane.b32.xlu0 %v4146_v18, %s3959_s29  ;;  %s4642_s29 = sld [smem:[#allocation6_spill]] }
 0x354   :  { %v829_v46 = vpop.xlane.xlu0 %828 }
 0x355   :  { %3893 = vrcp.f32 %v829_v46 }
 0x358   :  { %v826_v47 = vpop.xlane.xlu1 %825 }
 0x359   :  { %3895 = vrcp.f32 %v826_v47 }
 0x362   :  { %v3894_v48 = vpop.eup %3893 }
 0x363   :  { %v857_v49 = vmul.f32 %v3894_v48, %v4222_v2  ;;  %v3458_v48 = vld [vmem:[%s4642_s29] ss:$0 sm:$0xff]  ;;  %s4644_s29 = sld [smem:[#allocation8_spill]] }
 0x365   :  { %3657 = vmatmul.mubr.msk.f32.vlgmr.msra.gmra.mxu0 %vm161_vm2, %v857_v49 }
 0x366   :  { %v3896_v50 = vpop.eup %3895  ;;  %3665 = vmatpush3.msra.mxu0 %v1093_v43  ;;  %3666 = vmatprep.mubr.msk.f32.mxu0 %vm3954_vm0, %v3953_v0 }
 0x367   :  { %v856_v17 = vmul.f32 %v3896_v50, %v4226_v6  ;;  %3674 = vmatprep.subr.mxu0 %v3953_v0 }
 0x369   :  { %3652 = vmatmul.mubr.msk.f32.vlgmr.msra.gmra.mxu1 %vm161_vm2, %v856_v17 }
 0x36a   :  { %3660 = vmatpush3.msra.mxu1 %v1017_v42  ;;  %3661 = vmatprep.mubr.msk.f32.mxu1 %vm3954_vm0, %v3953_v0 }
 0x36b   :  { %3669 = vmatprep.subr.mxu1 %v3953_v0 }
 0x3ac   :  { %v832_v18 = vpop.xlane.xlu1 %831 }
 0x3ad   :  { %3897 = vrcp.f32 %v832_v18 }
 0x3b0   :  { %v838_v51 = vpop.xlane.xlu1 %837 }
 0x3b1   :  { %3899 = vrcp.f32 %v838_v51  ;;  %v835_v52 = vpop.xlane.xlu0 %834 }
 0x3b2   :  { %3901 = vrcp.f32 %v835_v52 }
 0x3b4   :  { %v844_v53 = vpop.xlane.xlu1 %843 }
 0x3b5   :  { %3903 = vrcp.f32 %v844_v53  ;;  %v841_v54 = vpop.xlane.xlu0 %840 }
 0x3b6   :  { %3905 = vrcp.f32 %v841_v54 }
 0x3b8   :  { %v1397_v6 = vpop.permute.xlu1 %1396 }
 0x3b9   :  { %v847_v55 = vpop.xlane.xlu0 %846 }
 0x3ba   :  { %v3898_v56 = vpop.eup %3897  ;;  %3907 = vrcp.f32 %v847_v55 }
 0x3bb   :  { %v858_v57 = vmul.f32 %v3898_v56, %v3882_v30 }
 0x3bd   :  { %3662 = vmatmul.mubr.msk.f32.vlgmr.msra.gmra.mxu1 %vm161_vm2, %v858_v57  ;;  %v1321_v62 = vpop.permute.xlu0 %1320 }
 0x3be   :  { %v3900_v58 = vpop.eup %3899  ;;  %3670 = vmatpush3.msra.mxu1 %v1169_v44  ;;  %3671 = vmatprep.mubr.msk.f32.mxu1 %vm3954_vm0, %v3953_v0 }
 0x3bf   :  { %v3902_v59 = vpop.eup %3901  ;;  %3679 = vmatprep.subr.mxu1 %v3953_v0  ;;  %v860_v60 = vmul.f32 %v3900_v58, %v3884_v32 }
 0x3c0   :  { %v859_v61 = vmul.f32 %v3902_v59, %v3886_v33 }
 0x3c1   :  { %3672 = vmatmul.mubr.msk.f32.vlgmr.msra.gmra.mxu1 %vm161_vm2, %v860_v60 }
 0x3c2   :  { %v3904_v63 = vpop.eup %3903  ;;  %3667 = vmatmul.mubr.msk.f32.vlgmr.msra.gmra.mxu0 %vm161_vm2, %v859_v61  ;;  %3680 = vmatpush3.msra.mxu1 %v1321_v62 }
 0x3c3   :  { %v3906_v1 = vpop.eup %3905  ;;  %3675 = vmatpush3.msra.mxu0 %v1245_v45  ;;  %3676 = vmatprep.mubr.msk.f32.mxu0 %vm3954_vm0, %v3953_v0  ;;  %v862_v2 = vmul.f32 %v3904_v63, %v3888_v36 }
 0x3c4   :  { %3681 = vmatprep.mubr.msk.f32.mxu1 %vm3954_vm0, %v3953_v0  ;;  %3684 = vmatprep.subr.mxu0 %v3953_v0  ;;  %v861_v5 = vmul.f32 %v3906_v1, %v4235_v37 }
 0x3c5   :  { %3682 = vmatmul.mubr.msk.f32.vlgmr.msra.gmra.mxu1 %vm161_vm2, %v862_v2  ;;  %3689 = vmatprep.subr.bf16.mxu1 %v3953_v0 }
 0x3c6   :  { %3677 = vmatmul.mubr.msk.f32.vlgmr.msra.gmra.mxu0 %vm161_vm2, %v861_v5  ;;  %3693 = vmatprep.mubr.msk.bf16.mxu1 %vm3954_vm0, %v3953_v0  ;;  %v3866_v5 = vld [vmem:[%s4643_s2] sm:$0xff]  }
 0x3c7   :  { %v3908_v7 = vpop.eup %3907  ;;  %3685 = vmatpush3.msra.mxu0 %v1397_v6  ;;  %3686 = vmatprep.mubr.msk.f32.mxu0 %vm3954_vm0, %v3953_v0  ;;  %v74_v6 = vld [vmem:[%s4644_s29] sm:$0xff] }
 0x3c8   :  { %v863_v8 = vmul.f32 %v3908_v7, %v4240_v40  ;;  %3697 = vmatprep.subr.bf16.mxu0 %v3953_v0  ;;  %3690 = vmatpush3.bf16.msra.mxu1 %v3863_v14  ;;  %v75_v7 = vld [vmem:[%s4644_s29 + $0x8] sm:$0xff] }
 0x3c9   :  { %3691 = vmatprep.subr.bf16.mxu1 %v3953_v0 }
 0x3ca   :  { %3687 = vmatmul.mubr.msk.f32.vlgmr.msra.gmra.mxu0 %vm161_vm2, %v863_v8  ;;  %v1692_v8 = vpack.c.bf16 %v75_v7, %v74_v6 }
 0x3cb   :  { %3701 = vmatprep.mubr.msk.bf16.mxu0 %vm3954_vm0, %v3953_v0 }
 0x3cc   :  { %3692 = vmatpush3.bf16.msra.mxu1 %v3864_v19 }
 0x3cd   :  { %3705 = vmatprep.subr.bf16.mxu1 %v3953_v0 }
 0x425   :  { %v1012_v9 = vpop.f32.mrf.mxu0 }
 0x427   :  { %v3658_v10 = vpop.f32.mrf.mxu0 }
 0x428   :  { %v3868_v10 = vld [vmem:[%s4608_s6] sm:$0xff]  }
 0x429   :  { %v936_v11 = vpop.f32.mrf.mxu1 }
 0x42b   :  { %v3653_v12 = vpop.f32.mrf.mxu1 }
 0x47d   :  { %v1088_v13 = vpop.f32.mrf.mxu1 }
 0x47f   :  { %v3663_v15 = vpop.f32.mrf.mxu1 }
 0x481   :  { %v1240_v16 = vpop.f32.mrf.mxu1 }
 0x482   :  { %v1164_v20 = vpop.f32.mrf.mxu0 }
 0x483   :  { %v3831_v21 = vpack.i.bf16 %v1164_v20, %v1088_v13  ;;  %v3673_v22 = vpop.f32.mrf.mxu1 }
 0x484   :  { %v3668_v23 = vpop.f32.mrf.mxu0 }
 0x485   :  { %3832 = vrot.lane.b32.xlu0 %v3831_v21, %s3960_s8  ;;  %v1392_v24 = vpop.f32.mrf.mxu1  ;;  %v3462_v21 = vld [vmem:[%s4609_s16] ss:$0 sm:$0xff] }
 0x486   :  { %v1316_v25 = vpop.f32.mrf.mxu0 }
 0x487   :  { %v3836_v26 = vpack.i.bf16 %v1316_v25, %v1240_v16  ;;  %v3683_v27 = vpop.f32.mrf.mxu1  ;;  %v3463_v25 = vld [vmem:[%s4610_s17] ss:$0 sm:$0xff] }
 0x488   :  { %v3678_v28 = vpop.f32.mrf.mxu0 }
 0x489   :  { %3837 = vrot.lane.b32.xlu1 %v3836_v26, %s4630_s24 }
 0x48a   :  { %v1468_v29 = vpop.f32.mrf.mxu0 }
 0x48b   :  { %v3841_v30 = vpack.i.bf16 %v1468_v29, %v1392_v24 }
 0x48c   :  { %v3688_v31 = vpop.f32.mrf.mxu0 }
 0x48d   :  { %3842 = vrot.lane.b32.xlu0 %v3841_v30, %s4629_s1  ;;  %v3468_v30 = vld [vmem:[%s4611_s9] ss:$0 sm:$0xff] }
 0x4f7   :  { %v3833_v32 = vpop.permute.xlu0 %3832 }
 0x4f8   :  { %v3835_v34 = vunpack.i.h.bf16 %v3833_v32  ;;  %v3834_v35 = vunpack.i.l.bf16 %v3833_v32 }
 0x4fa   :  { %v1497_v39 = vsel %vm161_vm2, %v1012_v9, %v3835_v34  ;;  %v1496_v40 = vsel %vm161_vm2, %v936_v11, %v3834_v35  ;;  %v3867_v9 = vld [vmem:[%s4608_s6 + $0x8] sm:$0xff]  }
 0x4fb   :  { %v3838_v33 = vpop.permute.xlu1 %3837  ;;  %3698 = vmatpush3.bf16.msra.mxu0 %v3867_v9 }
 0x4fc   :  { %v3840_v36 = vunpack.i.h.bf16 %v3838_v33  ;;  %v3839_v37 = vunpack.i.l.bf16 %v3838_v33  ;;  %3699 = vmatprep.subr.bf16.mxu0 %v3953_v0 }
 0x4fe   :  { %v1500_v43 = vsel %vm1498_vm3, %v1497_v39, %v3840_v36  ;;  %v1499_v44 = vsel %vm1498_vm3, %v1496_v40, %v3839_v37 }
 0x4ff   :  { %v3843_v38 = vpop.permute.xlu0 %3842  ;;  %3700 = vmatpush3.bf16.msra.mxu0 %v3868_v10 }
 0x500   :  { %v3845_v41 = vunpack.i.h.bf16 %v3843_v38  ;;  %v3844_v42 = vunpack.i.l.bf16 %v3843_v38  ;;  %3713 = vmatprep.subr.mxu0 %v3953_v0  ;;  %v3464_v38 = vld [vmem:[%s4612_s7] ss:$0 sm:$0xff] }
 0x502   :  { %v1503_v45 = vsel %vm1501_vm4, %v1500_v43, %v3845_v41  ;;  %v1502_v46 = vsel %vm1501_vm4, %v1499_v44, %v3844_v42 }
 0x503   :  { %v1509_v47 = vpack.c.bf16 %v1503_v45, %v1502_v46 }
 0x505   :  { %3694 = vmatmul.mubr.msk.bf16.vlgmr.msra.gmra.mxu1 %vm100_vm1, %v1509_v47 }
 0x506   :  { %3709 = vmatprep.mubr.msk.bf16.mxu1 %vm3954_vm0, %v3953_v0 }
 0x5c5   :  { %v1565_v49 = vpop.f32.mrf.mxu1 }
 0x5c6   :  { %v1566_v50 = vadd.f32 %v3458_v48, %v1565_v49 }
 0x5c7   :  { %v3695_v17 = vpop.f32.mrf.mxu1 }
 0x5c8   :  { %v1572_v18 = vadd.f32 %v1566_v50, %v4093_v3 }
 0x5c9   :  { %v1568_v51 = vpop.f32.mrf.mxu1 }
 0x5ca   :  { %v1569_v52 = vadd.f32 %v3458_v48, %v1568_v51  ;;  %v1576_v53 = vsel %vm100_vm1, %v1572_v18, 0.0 }
 0x5cb   :  { %1577 = vadd.xlane.f32.xlu1 %v1576_v53  ;;  %v3696_v54 = vpop.f32.mrf.mxu1 }
 0x5cc   :  { %v1573_v55 = vadd.f32 %v1569_v52, %v4098_v4  ;;  %v3865_v4 = vld [vmem:[%s4643_s2 + $0x8] sm:$0xff]  }
 0x5cd   :  { %3706 = vmatpush3.bf16.msra.mxu1 %v3865_v4 }
 0x5ce   :  { %v1579_v56 = vsel %vm100_vm1, %v1573_v55, 0.0  ;;  %3707 = vmatprep.subr.bf16.mxu1 %v3953_v0 }
 0x5cf   :  { %1580 = vadd.xlane.f32.xlu0 %v1579_v56 }
 0x5d1   :  { %3708 = vmatpush3.bf16.msra.mxu1 %v3866_v5 }
 0x5d2   :  { %3723 = vmatprep.subr.mxu1 %v3953_v0 }
 0x5d4   :  { %3710 = vmatmul.mubr.msk.bf16.vlgmr.msra.gmra.mxu1 %vm100_vm1, %v1692_v8 }
 0x5d5   :  { %3725 = vmatprep.mubr.msk.f32.mxu1 %vm3954_vm0, %v3953_v0 }
 0x654   :  { %v1578_v57 = vpop.xlane.xlu1 %1577 }
 0x655   :  { %v1583_v58 = vmul.f32 0.03125, %v1578_v57 }
 0x657   :  { %v1585_v59 = vsub.f32 %v1572_v18, %v1583_v58 }
 0x658   :  { %v1581_v60 = vpop.xlane.xlu0 %1580 }
 0x659   :  { %v1584_v61 = vmul.f32 0.03125, %v1581_v60  ;;  %v1587_v62 = vmul.f32 %v1585_v59, %v1585_v59 }
 0x65b   :  { %v1586_v63 = vsub.f32 %v1573_v55, %v1584_v61  ;;  %v1589_v3 = vsel %vm100_vm1, %v1587_v62, 0.0 }
 0x65c   :  { %1590 = vadd.xlane.f32.xlu0 %v1589_v3 }
 0x65d   :  { %v1588_v1 = vmul.f32 %v1586_v63, %v1586_v63 }
 0x65f   :  { %v1592_v2 = vsel %vm100_vm1, %v1588_v1, 0.0 }
 0x660   :  { %1593 = vadd.xlane.f32.xlu1 %v1592_v2 }
 0x694   :  { %v1748_v31 = vpop.f32.mrf.mxu1 }
 0x695   :  { %v4354_v32 = vadd.f32 %v3468_v30, %v1748_v31 }
 0x696   :  { %v3711_v33 = vpop.f32.mrf.mxu1 }
 0x697   :  { %1771 = vrot.lane.b32.xlu0 %v4354_v32, %s3956_s27 }
 0x698   :  { %v1751_v34 = vpop.f32.mrf.mxu1 }
 0x699   :  { %v4361_v35 = vadd.f32 %v3468_v30, %v1751_v34 }
 0x69a   :  { %v3712_v36 = vpop.f32.mrf.mxu1 }
 0x69b   :  { %1773 = vrot.lane.b32.xlu1 %v4361_v35, %s3956_s27  ;;  %1777 = vrot.lane.b32.xlu0 %v4361_v35, %s3955_s3 }
 0x69f   :  { %1775 = vrot.lane.b32.xlu1 %v4354_v32, %s3955_s3  ;;  %1781 = vrot.lane.b32.xlu0 %v4361_v35, %s3957_s4 }
 0x6a3   :  { %1779 = vrot.lane.b32.xlu1 %v4354_v32, %s3957_s4 }
 0x6e5   :  { %v1591_v11 = vpop.xlane.xlu0 %1590 }
 0x6e6   :  { %v1595_v12 = vmul.f32 0.03125, %v1591_v11 }
 0x6e8   :  { %v1597_v13 = vadd.f32 1e-05, %v1595_v12 }
 0x6e9   :  { %v1594_v14 = vpop.xlane.xlu1 %1593 }
 0x6ea   :  { %3909 = vrsqrt.f32 %v1597_v13  ;;  %v1596_v15 = vmul.f32 0.03125, %v1594_v14 }
 0x6ec   :  { %v1598_v16 = vadd.f32 1e-05, %v1596_v15 }
 0x6ee   :  { %3911 = vrsqrt.f32 %v1598_v16 }
 0x6f7   :  { %v3910_v19 = vpop.eup %3909 }
 0x6f8   :  { %v1601_v20 = vmul.f32 %v3910_v19, %v1585_v59 }
 0x6fa   :  { %v1609_v24 = vmul.f32 %v3462_v21, %v1601_v20 }
 0x6fb   :  { %v3912_v22 = vpop.eup %3911 }
 0x6fc   :  { %v1602_v23 = vmul.f32 %v3912_v22, %v1586_v63  ;;  %v4342_v27 = vadd.f32 %v3463_v25, %v1609_v24 }
 0x6fe   :  { %v1610_v26 = vmul.f32 %v3462_v21, %v1602_v23 }
 0x700   :  { %v4344_v28 = vadd.f32 %v3463_v25, %v1610_v26 }
 0x702   :  { %v1624_v29 = vpack.c.bf16 %v4344_v28, %v4342_v27 }
 0x704   :  { %3702 = vmatmul.mubr.msk.bf16.vlgmr.msra.gmra.mxu0 %vm100_vm1, %v1624_v29 }
 0x705   :  { %3715 = vmatprep.mubr.msk.f32.mxu0 %vm3954_vm0, %v3953_v0  ;;  %3714 = vmatpush3.xpose.msk.msra.mxu0 %vm161_vm2, %v4354_v32 }
 0x706   :  { %3718 = vmatprep.subr.mxu0 %v3953_v0 }
 0x709   :  { %v4373_v37 = vpop.permute.xlu0 %1771 }
 0x70a   :  { %3724 = vmatpush3.xpose.msk.msra.mxu1 %vm161_vm2, %v4373_v37 }
 0x70b   :  { %3733 = vmatprep.subr.mxu1 %v3953_v0 }
 0x70d   :  { %v4391_v45 = vpop.permute.xlu1 %1773  ;;  %v4403_v47 = vpop.permute.xlu0 %1777 }
 0x711   :  { %v4401_v46 = vpop.permute.xlu1 %1775  ;;  %v4407_v49 = vpop.permute.xlu0 %1781 }
 0x715   :  { %v4405_v48 = vpop.permute.xlu1 %1779 }
 0x7c4   :  { %v1680_v39 = vpop.f32.mrf.mxu0 }
 0x7c5   :  { %v1681_v40 = vadd.f32 %v3464_v38, %v1680_v39 }
 0x7c6   :  { %v3703_v41 = vpop.f32.mrf.mxu0 }
 0x7c7   :  { %1757 = vrot.lane.b32.xlu1 %v1681_v40, %s3956_s27  ;;  %3716 = vmatmul.mubr.msk.f32.vlgmr.msra.gmra.mxu0 %vm161_vm2, %v1681_v40 }
 0x7c8   :  { %3719 = vmatpush3.xpose.msk.msra.mxu0 %vm161_vm2, %v4361_v35  ;;  %v1683_v42 = vpop.f32.mrf.mxu0  ;;  %3720 = vmatprep.mubr.msk.f32.mxu0 %vm3954_vm0, %v3953_v0 }
 0x7c9   :  { %v1684_v43 = vadd.f32 %v3464_v38, %v1683_v42  ;;  %3728 = vmatprep.subr.mxu0 %v3953_v0 }
 0x7ca   :  { %v3704_v44 = vpop.f32.mrf.mxu0 }
 0x7cb   :  { %1761 = vrot.lane.b32.xlu1 %v1681_v40, %s3955_s3  ;;  %1759 = vrot.lane.b32.xlu0 %v1684_v43, %s3956_s27 }
 0x7cc   :  { %3721 = vmatmul.mubr.msk.f32.vlgmr.msra.gmra.mxu0 %vm161_vm2, %v1684_v43 }
 0x7cd   :  { %3729 = vmatpush3.xpose.msk.msra.mxu0 %vm161_vm2, %v4391_v45  ;;  %3730 = vmatprep.mubr.msk.f32.mxu0 %vm3954_vm0, %v3953_v0 }
 0x7ce   :  { %3738 = vmatprep.subr.mxu0 %v3953_v0 }
 0x7cf   :  { %1765 = vrot.lane.b32.xlu1 %v1681_v40, %s3957_s4  ;;  %1763 = vrot.lane.b32.xlu0 %v1684_v43, %s3955_s3 }
 0x7d3   :  { %1767 = vrot.lane.b32.xlu0 %v1684_v43, %s3957_s4 }
 0x839   :  { %v1758_v50 = vpop.permute.xlu1 %1757 }
 0x83a   :  { %3726 = vmatmul.mubr.msk.f32.vlgmr.msra.gmra.mxu1 %vm161_vm2, %v1758_v50 }
 0x83b   :  { %3734 = vmatpush3.xpose.msk.msra.mxu1 %vm161_vm2, %v4401_v46  ;;  %3735 = vmatprep.mubr.msk.f32.mxu1 %vm3954_vm0, %v3953_v0 }
 0x83c   :  { %3743 = vmatprep.subr.mxu1 %v3953_v0 }
 0x83d   :  { %v1762_v17 = vpop.permute.xlu1 %1761  ;;  %v1760_v18 = vpop.permute.xlu0 %1759 }
 0x83e   :  { %3731 = vmatmul.mubr.msk.f32.vlgmr.msra.gmra.mxu0 %vm161_vm2, %v1760_v18  ;;  %3736 = vmatmul.mubr.msk.f32.vlgmr.msra.gmra.mxu1 %vm161_vm2, %v1762_v17 }
 0x83f   :  { %3739 = vmatpush3.xpose.msk.msra.mxu0 %vm161_vm2, %v4403_v47  ;;  %3744 = vmatpush3.xpose.msk.msra.mxu1 %vm161_vm2, %v4405_v48 }
 0x840   :  { %3745 = vmatprep.mubr.msk.f32.mxu1 %vm3954_vm0, %v3953_v0  ;;  %3740 = vmatprep.mubr.msk.f32.mxu0 %vm3954_vm0, %v3953_v0 }
 0x841   :  { %v1766_v51 = vpop.permute.xlu1 %1765  ;;  %v1764_v52 = vpop.permute.xlu0 %1763  ;;  %3748 = vmatprep.subr.mxu0 %v3953_v0  ;;  %3753 = vmatprep.subr.mxu1 %v3953_v0 }
 0x842   :  { %3741 = vmatmul.mubr.msk.f32.vlgmr.msra.gmra.mxu0 %vm161_vm2, %v1764_v52  ;;  %3746 = vmatmul.mubr.msk.f32.vlgmr.msra.gmra.mxu1 %vm161_vm2, %v1766_v51 }
 0x843   :  { %3749 = vmatpush3.xpose.msk.msra.mxu0 %vm161_vm2, %v4407_v49  ;;  %3750 = vmatprep.mubr.msk.f32.mxu0 %vm3954_vm0, %v3953_v0 }
 0x844   :  { %3758 = vmatprep.subr.mxu0 %v3953_v0  ;;  %3755 = vmatprep.mubr.msk.f32.mxu1 %vm3954_vm0, %v3953_v0 }
 0x845   :  { %v1768_v53 = vpop.permute.xlu0 %1767 }
 0x846   :  { %3751 = vmatmul.mubr.msk.f32.vlgmr.msra.gmra.mxu0 %vm161_vm2, %v1768_v53 }
 0x847   :  { %3760 = vmatprep.mubr.msk.f32.mxu0 %vm3954_vm0, %v3953_v0 }
 0x887   :  { %v1853_v54 = vpop.f32.mrf.mxu0 }
 0x888   :  { %v2375_v55 = vmul.f32 0.35355338, %v1853_v54 }
 0x889   :  { %v3717_v56 = vpop.f32.mrf.mxu0 }
 0x88a   :  { %v2383_v57 = vsel %vm161_vm2, %v2375_v55, -inf }
 0x88b   :  { %2384 = vmax.xlane.f32.xlu1 %v2383_v57 }
 0x88c   :  { %v1927_v58 = vpop.f32.mrf.mxu0 }
 0x88d   :  { %v2376_v59 = vmul.f32 0.35355338, %v1927_v58 }
 0x88e   :  { %v3722_v60 = vpop.f32.mrf.mxu0 }
 0x88f   :  { %v2386_v61 = vsel %vm161_vm2, %v2376_v59, -inf }
 0x890   :  { %2387 = vmax.xlane.f32.xlu0 %v2386_v61 }
 0x8fa   :  { %v2001_v62 = vpop.f32.mrf.mxu1 }
 0x8fb   :  { %v2377_v63 = vmul.f32 0.35355338, %v2001_v62 }
 0x8fc   :  { %v3727_v3 = vpop.f32.mrf.mxu1 }
 0x8fd   :  { %v2389_v1 = vsel %vm161_vm2, %v2377_v63, -inf }
 0x8fe   :  { %v2149_v2 = vpop.f32.mrf.mxu1  ;;  %2390 = vmax.xlane.f32.xlu0 %v2389_v1  ;;  %v2075_v4 = vpop.f32.mrf.mxu0 }
 0x8ff   :  { %v2379_v5 = vmul.f32 0.35355338, %v2149_v2  ;;  %v2378_v6 = vmul.f32 0.35355338, %v2075_v4 }
 0x900   :  { %v3732_v7 = vpop.f32.mrf.mxu0  ;;  %v3737_v8 = vpop.f32.mrf.mxu1 }
 0x901   :  { %v2395_v9 = vsel %vm161_vm2, %v2379_v5, -inf  ;;  %v2392_v10 = vsel %vm161_vm2, %v2378_v6, -inf }
 0x902   :  { %v2297_v11 = vpop.f32.mrf.mxu1  ;;  %2396 = vmax.xlane.f32.xlu0 %v2395_v9  ;;  %2393 = vmax.xlane.f32.xlu1 %v2392_v10  ;;  %v2223_v12 = vpop.f32.mrf.mxu0 }
 0x903   :  { %v2381_v13 = vmul.f32 0.35355338, %v2297_v11  ;;  %v2380_v14 = vmul.f32 0.35355338, %v2223_v12 }
 0x904   :  { %v3742_v15 = vpop.f32.mrf.mxu0  ;;  %v3747_v16 = vpop.f32.mrf.mxu1 }
 0x905   :  { %v2401_v19 = vsel %vm161_vm2, %v2381_v13, -inf  ;;  %v2398_v20 = vsel %vm161_vm2, %v2380_v14, -inf }
 0x906   :  { %2402 = vmax.xlane.f32.xlu0 %v2401_v19  ;;  %2399 = vmax.xlane.f32.xlu1 %v2398_v20  ;;  %v2371_v21 = vpop.f32.mrf.mxu0 }
 0x907   :  { %v2382_v22 = vmul.f32 0.35355338, %v2371_v21 }
 0x908   :  { %v3752_v23 = vpop.f32.mrf.mxu0 }
 0x909   :  { %v2404_v24 = vsel %vm161_vm2, %v2382_v22, -inf }
 0x90a   :  { %2405 = vmax.xlane.f32.xlu1 %v2404_v24 }
 0x914   :  { %v2385_v25 = vpop.xlane.xlu1 %2384 }
 0x915   :  { %v2407_v26 = vsub.f32 %v2375_v55, %v2385_v25 }
 0x917   :  { %v2415_v30 = vmul.f32 1.442695, %v2407_v26 }
 0x919   :  { %v2388_v29 = vpop.xlane.xlu0 %2387  ;;  %3913 = vpow2.f32 %v2415_v30 }
 0x91a   :  { %v2408_v31 = vsub.f32 %v2376_v59, %v2388_v29 }
 0x91b   :  { %2547 = vrot.lane.b32.xlu1 %v4361_v35, %s3958_s28 }
 0x91c   :  { %2471 = vrot.lane.b32.xlu0 %v4354_v32, %s3958_s28  ;;  %v2417_v33 = vmul.f32 1.442695, %v2408_v31 }
 0x91e   :  { %3915 = vpow2.f32 %v2417_v33 }
 0x91f   :  { %2623 = vrot.lane.b32.xlu1 %v4373_v37, %s3958_s28 }
 0x920   :  { %2699 = vrot.lane.b32.xlu0 %v4391_v45, %s3958_s28 }
 0x923   :  { %2775 = vrot.lane.b32.xlu1 %v4401_v46, %s3958_s28 }
 0x924   :  { %2851 = vrot.lane.b32.xlu0 %v4403_v47, %s3958_s28 }
 0x926   :  { %v4459_v32 = vpop.eup %3913 }
 0x927   :  { %v2431_v34 = vsel %vm161_vm2, %v4459_v32, 0.0 }
 0x92b   :  { %v4463_v35 = vpop.eup %3915 }
 0x92c   :  { %v2434_v36 = vsel %vm161_vm2, %v4463_v35, 0.0 }
 0x943   :  { %2432 = vadd.xlane.f32.xlu0 %v2431_v34 }
 0x947   :  { %2435 = vadd.xlane.f32.xlu1 %v2434_v36 }
 0x987   :  { %v2391_v37 = vpop.xlane.xlu0 %2390 }
 0x988   :  { %v2409_v38 = vsub.f32 %v2377_v63, %v2391_v37 }
 0x98a   :  { %v2419_v39 = vmul.f32 1.442695, %v2409_v38 }
 0x98b   :  { %v2397_v40 = vpop.xlane.xlu0 %2396  ;;  %v2394_v41 = vpop.xlane.xlu1 %2393 }
 0x98c   :  { %3917 = vpow2.f32 %v2419_v39  ;;  %v2411_v42 = vsub.f32 %v2379_v5, %v2397_v40  ;;  %v2410_v43 = vsub.f32 %v2378_v6, %v2394_v41 }
 0x98e   :  { %v2423_v44 = vmul.f32 1.442695, %v2411_v42  ;;  %v2421_v45 = vmul.f32 1.442695, %v2410_v43  ;;  %v3869_v43 = vld [vmem:[%s4613_s10 + $0x8] sm:$0xff]  }
 0x98f   :  { %v2403_v46 = vpop.xlane.xlu0 %2402  ;;  %v2400_v47 = vpop.xlane.xlu1 %2399 }
 0x990   :  { %3919 = vpow2.f32 %v2423_v44  ;;  %v2413_v50 = vsub.f32 %v2381_v13, %v2403_v46  ;;  %v2412_v17 = vsub.f32 %v2380_v14, %v2400_v47  ;;  %v3870_v46 = vld [vmem:[%s4613_s10] sm:$0xff]   ;;  %s4646_s10 = smov 24  }
 0x991   :  { %3921 = vpow2.f32 %v2421_v45 }
 0x992   :  { %v2427_v18 = vmul.f32 1.442695, %v2413_v50  ;;  %v2425_v51 = vmul.f32 1.442695, %v2412_v17 }
 0x993   :  { %v2472_v52 = vpop.permute.xlu0 %2471  ;;  %v2406_v53 = vpop.xlane.xlu1 %2405 }
 0x994   :  { %3923 = vpow2.f32 %v2427_v18  ;;  %v2414_v54 = vsub.f32 %v2382_v22, %v2406_v53  ;;  %3754 = vmatpush3.msra.mxu1 %v2472_v52 }
 0x995   :  { %3925 = vpow2.f32 %v2425_v51  ;;  %3763 = vmatprep.subr.mxu1 %v3953_v0 }
 0x996   :  { %v2429_v55 = vmul.f32 1.442695, %v2414_v54 }
 0x997   :  { %v2548_v56 = vpop.permute.xlu1 %2547  ;;  %v2700_v6 = vpop.permute.xlu0 %2699 }
 0x998   :  { %3927 = vpow2.f32 %v2429_v55  ;;  %3759 = vmatpush3.msra.mxu0 %v2548_v56 }
 0x999   :  { %v3918_v57 = vpop.eup %3917  ;;  %3768 = vmatprep.subr.mxu0 %v3953_v0 }
 0x99a   :  { %v2437_v58 = vsel %vm161_vm2, %v3918_v57, 0.0 }
 0x99b   :  { %2438 = vadd.xlane.f32.xlu0 %v2437_v58  ;;  %v2624_v7 = vpop.permute.xlu1 %2623  ;;  %v2852_v8 = vpop.permute.xlu0 %2851 }
 0x99d   :  { %v3920_v59 = vpop.eup %3919 }
 0x99e   :  { %v3922_v60 = vpop.eup %3921  ;;  %v2443_v61 = vsel %vm161_vm2, %v3920_v59, 0.0 }
 0x99f   :  { %2444 = vadd.xlane.f32.xlu0 %v2443_v61  ;;  %v2440_v62 = vsel %vm161_vm2, %v3922_v60, 0.0  ;;  %v2776_v9 = vpop.permute.xlu1 %2775 }
 0x9a0   :  { %2441 = vadd.xlane.f32.xlu1 %v2440_v62 }
 0x9a1   :  { %v3924_v63 = vpop.eup %3923 }
 0x9a2   :  { %v4472_v3 = vpop.eup %3925  ;;  %v2449_v1 = vsel %vm161_vm2, %v3924_v63, 0.0 }
 0x9a3   :  { %2450 = vadd.xlane.f32.xlu0 %v2449_v1  ;;  %v2446_v2 = vsel %vm161_vm2, %v4472_v3, 0.0 }
 0x9a4   :  { %2447 = vadd.xlane.f32.xlu1 %v2446_v2 }
 0x9a5   :  { %v4477_v4 = vpop.eup %3927 }
 0x9a6   :  { %v2452_v5 = vsel %vm161_vm2, %v4477_v4, 0.0 }
 0x9a8   :  { %2453 = vadd.xlane.f32.xlu1 %v2452_v5 }
 0x9b9   :  { %2927 = vrot.lane.b32.xlu1 %v4405_v48, %s3958_s28  ;;  %3003 = vrot.lane.b32.xlu0 %v4407_v49, %s3958_s28  ;;  %s4645_s28 = smov 16  }
 0x9cc   :  { %v2433_v10 = vpop.xlane.xlu0 %2432 }
 0x9cd   :  { %3929 = vrcp.f32 %v2433_v10 }
 0x9d0   :  { %v2436_v11 = vpop.xlane.xlu1 %2435 }
 0x9d1   :  { %3931 = vrcp.f32 %v2436_v11 }
 0x9da   :  { %v3930_v12 = vpop.eup %3929 }
 0x9db   :  { %v2463_v13 = vmul.f32 %v3930_v12, %v4459_v32  ;;  %v3496_v12 = vld [vmem:[%s4614_s11] ss:$0 sm:$0xff] }
 0x9dd   :  { %3756 = vmatmul.mubr.msk.f32.vlgmr.msra.gmra.mxu1 %vm161_vm2, %v2463_v13 }
 0x9de   :  { %v3932_v14 = vpop.eup %3931  ;;  %3764 = vmatpush3.msra.mxu1 %v2624_v7  ;;  %3765 = vmatprep.mubr.msk.f32.mxu1 %vm3954_vm0, %v3953_v0 }
 0x9df   :  { %v2464_v48 = vmul.f32 %v3932_v14, %v4463_v35  ;;  %3773 = vmatprep.subr.mxu1 %v3953_v0 }
 0x9e1   :  { %3761 = vmatmul.mubr.msk.f32.vlgmr.msra.gmra.mxu0 %vm161_vm2, %v2464_v48 }
 0x9e2   :  { %3769 = vmatpush3.msra.mxu0 %v2700_v6  ;;  %3770 = vmatprep.mubr.msk.f32.mxu0 %vm3954_vm0, %v3953_v0 }
 0x9e3   :  { %3778 = vmatprep.subr.mxu0 %v3953_v0 }
 0xa24   :  { %v2439_v49 = vpop.xlane.xlu0 %2438 }
 0xa25   :  { %3933 = vrcp.f32 %v2439_v49 }
 0xa28   :  { %v2445_v15 = vpop.xlane.xlu0 %2444 }
 0xa29   :  { %3935 = vrcp.f32 %v2445_v15  ;;  %v2442_v16 = vpop.xlane.xlu1 %2441 }
 0xa2a   :  { %3937 = vrcp.f32 %v2442_v16 }
 0xa2c   :  { %v2451_v19 = vpop.xlane.xlu0 %2450 }
 0xa2d   :  { %3939 = vrcp.f32 %v2451_v19  ;;  %v2448_v20 = vpop.xlane.xlu1 %2447 }
 0xa2e   :  { %3941 = vrcp.f32 %v2448_v20 }
 0xa30   :  { %v3004_v35 = vpop.permute.xlu0 %3003 }
 0xa31   :  { %v2454_v21 = vpop.xlane.xlu1 %2453 }
 0xa32   :  { %v3934_v22 = vpop.eup %3933  ;;  %3943 = vrcp.f32 %v2454_v21 }
 0xa33   :  { %v2465_v23 = vmul.f32 %v3934_v22, %v3918_v57 }
 0xa35   :  { %3766 = vmatmul.mubr.msk.f32.vlgmr.msra.gmra.mxu1 %vm161_vm2, %v2465_v23  ;;  %v2928_v30 = vpop.permute.xlu1 %2927 }
 0xa36   :  { %v3936_v24 = vpop.eup %3935  ;;  %3774 = vmatpush3.msra.mxu1 %v2776_v9  ;;  %3775 = vmatprep.mubr.msk.f32.mxu1 %vm3954_vm0, %v3953_v0 }
 0xa37   :  { %v3938_v25 = vpop.eup %3937  ;;  %3783 = vmatprep.subr.mxu1 %v3953_v0  ;;  %v2467_v26 = vmul.f32 %v3936_v24, %v3920_v59 }
 0xa38   :  { %v2466_v29 = vmul.f32 %v3938_v25, %v3922_v60 }
 0xa39   :  { %3776 = vmatmul.mubr.msk.f32.vlgmr.msra.gmra.mxu1 %vm161_vm2, %v2467_v26 }
 0xa3a   :  { %v3940_v31 = vpop.eup %3939  ;;  %3771 = vmatmul.mubr.msk.f32.vlgmr.msra.gmra.mxu0 %vm161_vm2, %v2466_v29  ;;  %3784 = vmatpush3.msra.mxu1 %v2928_v30 }
 0xa3b   :  { %v3942_v33 = vpop.eup %3941  ;;  %3779 = vmatpush3.msra.mxu0 %v2852_v8  ;;  %3780 = vmatprep.mubr.msk.f32.mxu0 %vm3954_vm0, %v3953_v0  ;;  %v2469_v32 = vmul.f32 %v3940_v31, %v3924_v63 }
 0xa3c   :  { %3785 = vmatprep.mubr.msk.f32.mxu1 %vm3954_vm0, %v3953_v0  ;;  %3788 = vmatprep.subr.mxu0 %v3953_v0  ;;  %v2468_v34 = vmul.f32 %v3942_v33, %v4472_v3 }
 0xa3d   :  { %3786 = vmatmul.mubr.msk.f32.vlgmr.msra.gmra.mxu1 %vm161_vm2, %v2469_v32  ;;  %3793 = vmatprep.subr.bf16.mxu1 %v3953_v0 }
 0xa3e   :  { %3781 = vmatmul.mubr.msk.f32.vlgmr.msra.gmra.mxu0 %vm161_vm2, %v2468_v34  ;;  %3797 = vmatprep.mubr.msk.bf16.mxu1 %vm3954_vm0, %v3953_v0  ;;  %v3872_v34 = vld [vmem:[%s4615_s12] sm:$0xff]  }
 0xa3f   :  { %v3944_v36 = vpop.eup %3943  ;;  %3789 = vmatpush3.msra.mxu0 %v3004_v35  ;;  %3790 = vmatprep.mubr.msk.f32.mxu0 %vm3954_vm0, %v3953_v0  ;;  %v3873_v35 = vld [vmem:[%s4616_s14 + $0x18] sm:$0xff]  }
 0xa40   :  { %v2470_v37 = vmul.f32 %v3944_v36, %v4477_v4  ;;  %3801 = vmatprep.subr.bf16.mxu0 %v3953_v0  ;;  %3794 = vmatpush3.bf16.msra.mxu1 %v3869_v43 }
 0xa41   :  { %3795 = vmatprep.subr.bf16.mxu1 %v3953_v0 }
 0xa42   :  { %3791 = vmatmul.mubr.msk.f32.vlgmr.msra.gmra.mxu0 %vm161_vm2, %v2470_v37 }
 0xa43   :  { %3805 = vmatprep.mubr.msk.bf16.mxu0 %vm3954_vm0, %v3953_v0 }
 0xa44   :  { %3796 = vmatpush3.bf16.msra.mxu1 %v3870_v46 }
 0xa45   :  { %3809 = vmatprep.subr.bf16.mxu1 %v3953_v0 }
 0xa9d   :  { %v2543_v38 = vpop.f32.mrf.mxu1 }
 0xa9f   :  { %v3757_v39 = vpop.f32.mrf.mxu1 }
 0xaa1   :  { %v2619_v40 = vpop.f32.mrf.mxu0 }
 0xaa3   :  { %v3762_v41 = vpop.f32.mrf.mxu0 }
 0xaf5   :  { %v2695_v42 = vpop.f32.mrf.mxu1 }
 0xaf7   :  { %v3767_v44 = vpop.f32.mrf.mxu1 }
 0xaf8   :  { %v3500_v44 = vld [vmem:[%s4617_s18] ss:$0 sm:$0xff] }
 0xaf9   :  { %v2847_v45 = vpop.f32.mrf.mxu1 }
 0xafa   :  { %v2771_v47 = vpop.f32.mrf.mxu0 }
 0xafb   :  { %v3846_v50 = vpack.i.bf16 %v2771_v47, %v2695_v42  ;;  %v3777_v17 = vpop.f32.mrf.mxu1 }
 0xafc   :  { %v3772_v18 = vpop.f32.mrf.mxu0 }
 0xafd   :  { %3847 = vrot.lane.b32.xlu1 %v3846_v50, %s3960_s8  ;;  %v2999_v51 = vpop.f32.mrf.mxu1  ;;  %v3501_v50 = vld [vmem:[%s4618_s19] ss:$0 sm:$0xff] }
 0xafe   :  { %v2923_v52 = vpop.f32.mrf.mxu0 }
 0xaff   :  { %v3851_v53 = vpack.i.bf16 %v2923_v52, %v2847_v45  ;;  %v3787_v54 = vpop.f32.mrf.mxu1 }
 0xb00   :  { %v3782_v55 = vpop.f32.mrf.mxu0  ;;  %v3875_v54 = vld [vmem:[%s4616_s14 + $0x8] sm:$0xff]  }
 0xb01   :  { %3852 = vrot.lane.b32.xlu0 %v3851_v53, %s4645_s28  ;;  %v3874_v53 = vld [vmem:[%s4616_s14 + $0x10] sm:$0xff]   ;;  %v3876_v55 = vld [vmem:[%s4616_s14] sm:$0xff]  }
 0xb02   :  { %v3075_v56 = vpop.f32.mrf.mxu0 }
 0xb03   :  { %v3856_v57 = vpack.i.bf16 %v3075_v56, %v2999_v51  ;;  %v3502_v56 = vld [vmem:[%s4619_s13] ss:$0 sm:$0xff] }
 0xb04   :  { %v3792_v58 = vpop.f32.mrf.mxu0 }
 0xb05   :  { %3857 = vrot.lane.b32.xlu1 %v3856_v57, %s4646_s10 }
 0xb6f   :  { %v3848_v59 = vpop.permute.xlu1 %3847 }
 0xb70   :  { %v3850_v61 = vunpack.i.h.bf16 %v3848_v59  ;;  %v3849_v62 = vunpack.i.l.bf16 %v3848_v59 }
 0xb72   :  { %v3104_v2 = vsel %vm161_vm2, %v2619_v40, %v3850_v61  ;;  %v3103_v4 = vsel %vm161_vm2, %v2543_v38, %v3849_v62 }
 0xb73   :  { %v3853_v60 = vpop.permute.xlu0 %3852 }
 0xb74   :  { %v3855_v63 = vunpack.i.h.bf16 %v3853_v60  ;;  %v3854_v3 = vunpack.i.l.bf16 %v3853_v60 }
 0xb76   :  { %v3106_v7 = vsel %vm1498_vm3, %v3104_v2, %v3855_v63  ;;  %v3105_v8 = vsel %vm1498_vm3, %v3103_v4, %v3854_v3 }
 0xb77   :  { %v3858_v1 = vpop.permute.xlu1 %3857 }
 0xb78   :  { %v3860_v5 = vunpack.i.h.bf16 %v3858_v1  ;;  %v3859_v6 = vunpack.i.l.bf16 %v3858_v1 }
 0xb7a   :  { %v3108_v9 = vsel %vm1501_vm4, %v3106_v7, %v3860_v5  ;;  %v3107_v10 = vsel %vm1501_vm4, %v3105_v8, %v3859_v6 }
 0xb7b   :  { %v3114_v11 = vpack.c.bf16 %v3108_v9, %v3107_v10 }
 0xb7d   :  { %3798 = vmatmul.mubr.msk.bf16.vlgmr.msra.gmra.mxu1 %vm100_vm1, %v3114_v11 }
 0xb7e   :  { %3817 = vmatprep.mubr.msk.bf16.mxu1 %vm3954_vm0, %v3953_v0  ;;  %3810 = vmatpush3.bf16.msra.mxu1 %v3873_v35 }
 0xb7f   :  { %3811 = vmatprep.subr.bf16.mxu1 %v3953_v0 }
 0xb82   :  { %3812 = vmatpush3.bf16.msra.mxu1 %v3874_v53 }
 0xb83   :  { %3813 = vmatprep.subr.bf16.mxu1 %v3953_v0 }
 0xb86   :  { %3814 = vmatpush3.bf16.msra.mxu1 %v3875_v54 }
 0xb87   :  { %3815 = vmatprep.subr.bf16.mxu1 %v3953_v0 }
 0xb8a   :  { %3816 = vmatpush3.bf16.msra.mxu1 %v3876_v55 }
 0xc3d   :  { %v3170_v13 = vpop.f32.mrf.mxu1 }
 0xc3e   :  { %v3171_v14 = vadd.f32 %v3496_v12, %v3170_v13 }
 0xc3f   :  { %v3799_v48 = vpop.f32.mrf.mxu1 }
 0xc40   :  { %v3177_v49 = vadd.f32 %v3171_v14, %v4342_v27 }
 0xc41   :  { %v3173_v15 = vpop.f32.mrf.mxu1 }
 0xc42   :  { %v3174_v16 = vadd.f32 %v3496_v12, %v3173_v15  ;;  %v3181_v19 = vsel %vm100_vm1, %v3177_v49, 0.0 }
 0xc43   :  { %3182 = vadd.xlane.f32.xlu0 %v3181_v19  ;;  %v3800_v20 = vpop.f32.mrf.mxu1 }
 0xc44   :  { %v3178_v21 = vadd.f32 %v3174_v16, %v4344_v28  ;;  %v3871_v28 = vld [vmem:[%s4615_s12 + $0x8] sm:$0xff]  }
 0xc45   :  { %3802 = vmatpush3.bf16.msra.mxu0 %v3871_v28 }
 0xc46   :  { %v3184_v22 = vsel %vm100_vm1, %v3178_v21, 0.0  ;;  %3803 = vmatprep.subr.bf16.mxu0 %v3953_v0  ;;  %v3506_v0 = vld [vmem:[%s4620_s15] ss:$0 sm:$0xff] }
 0xc47   :  { %3185 = vadd.xlane.f32.xlu1 %v3184_v22 }
 0xc49   :  { %3804 = vmatpush3.bf16.msra.mxu0 %v3872_v34 }
 0xccc   :  { %v3183_v23 = vpop.xlane.xlu0 %3182 }
 0xccd   :  { %v3187_v24 = vmul.f32 0.03125, %v3183_v23 }
 0xccf   :  { %v3189_v25 = vsub.f32 %v3177_v49, %v3187_v24 }
 0xcd0   :  { %v3186_v26 = vpop.xlane.xlu1 %3185 }
 0xcd1   :  { %v3188_v29 = vmul.f32 0.03125, %v3186_v26  ;;  %v3191_v30 = vmul.f32 %v3189_v25, %v3189_v25 }
 0xcd3   :  { %v3190_v31 = vsub.f32 %v3178_v21, %v3188_v29  ;;  %v3193_v27 = vsel %vm100_vm1, %v3191_v30, 0.0 }
 0xcd4   :  { %3194 = vadd.xlane.f32.xlu0 %v3193_v27  ;;  %v3512_v27 = vld [vmem:[%s4621_s20] ss:$0 sm:$0xff] }
 0xcd5   :  { %v3192_v33 = vmul.f32 %v3190_v31, %v3190_v31 }
 0xcd7   :  { %v3196_v32 = vsel %vm100_vm1, %v3192_v33, 0.0 }
 0xcd8   :  { %3197 = vadd.xlane.f32.xlu0 %v3196_v32  ;;  %v3513_v32 = vld [vmem:[%s4622_s21] ss:$0 sm:$0xff] }
 0xd5d   :  { %v3195_v36 = vpop.xlane.xlu0 %3194 }
 0xd5e   :  { %v3199_v37 = vmul.f32 0.03125, %v3195_v36 }
 0xd60   :  { %v3201_v38 = vadd.f32 1e-05, %v3199_v37 }
 0xd61   :  { %v3198_v39 = vpop.xlane.xlu0 %3197 }
 0xd62   :  { %3945 = vrsqrt.f32 %v3201_v38  ;;  %v3200_v40 = vmul.f32 0.03125, %v3198_v39 }
 0xd64   :  { %v3202_v41 = vadd.f32 1e-05, %v3200_v40 }
 0xd66   :  { %3947 = vrsqrt.f32 %v3202_v41 }
 0xd6f   :  { %v3946_v42 = vpop.eup %3945 }
 0xd70   :  { %v3205_v43 = vmul.f32 %v3946_v42, %v3189_v25 }
 0xd72   :  { %v3213_v47 = vmul.f32 %v3500_v44, %v3205_v43 }
 0xd73   :  { %v3948_v45 = vpop.eup %3947 }
 0xd74   :  { %v3206_v46 = vmul.f32 %v3948_v45, %v3190_v31  ;;  %v3221_v18 = vadd.f32 %v3501_v50, %v3213_v47 }
 0xd76   :  { %v3214_v17 = vmul.f32 %v3500_v44, %v3206_v46 }
 0xd78   :  { %v3222_v51 = vadd.f32 %v3501_v50, %v3214_v17 }
 0xd7a   :  { %v3228_v52 = vpack.c.bf16 %v3222_v51, %v3221_v18 }
 0xd7c   :  { %3806 = vmatmul.mubr.msk.bf16.vlgmr.msra.gmra.mxu0 %vm100_vm1, %v3228_v52 }
 0xe3c   :  { %v3284_v57 = vpop.f32.mrf.mxu0 }
 0xe3d   :  { %v3285_v59 = vadd.f32 %v3502_v56, %v3284_v57 }
 0xe3e   :  { %v3807_v58 = vpop.f32.mrf.mxu0 }
 0xe3f   :  { %v3291_v63 = vmax.f32 %v3285_v59, 0.0 }
 0xe40   :  { %v3287_v60 = vpop.f32.mrf.mxu0 }
 0xe41   :  { %v3288_v61 = vadd.f32 %v3502_v56, %v3287_v60 }
 0xe42   :  { %v3808_v62 = vpop.f32.mrf.mxu0 }
 0xe43   :  { %v3292_v3 = vmax.f32 %v3288_v61, 0.0 }
 0xe45   :  { %v3302_v1 = vpack.c.bf16 %v3292_v3, %v3291_v63 }
 0xe47   :  { %3818 = vmatmul.mubr.msk.bf16.vlgmr.msra.gmra.mxu1 %vm3333_vm5, %v3302_v1 }
 0xf07   :  { %v3371_v2 = vpop.f32.mrf.mxu1 }
 0xf08   :  { %v3372_v4 = vadd.f32 %v3506_v0, %v3371_v2 }
 0xf09   :  { %v3819_v5 = vpop.f32.mrf.mxu1 }
 0xf0a   :  { %v3378_v6 = vadd.f32 %v3372_v4, %v3221_v18 }
 0xf0b   :  { %v3374_v7 = vpop.f32.mrf.mxu1 }
 0xf0c   :  { %v3375_v8 = vadd.f32 %v3506_v0, %v3374_v7  ;;  %v3382_v9 = vsel %vm100_vm1, %v3378_v6, 0.0 }
 0xf0d   :  { %3383 = vadd.xlane.f32.xlu1 %v3382_v9  ;;  %v3820_v10 = vpop.f32.mrf.mxu1 }
 0xf0e   :  { %v3379_v11 = vadd.f32 %v3375_v8, %v3222_v51 }
 0xf10   :  { %v3385_v12 = vsel %vm100_vm1, %v3379_v11, 0.0 }
 0xf11   :  { %3386 = vadd.xlane.f32.xlu0 %v3385_v12 }
 0xf96   :  { %v3384_v13 = vpop.xlane.xlu1 %3383 }
 0xf97   :  { %v3388_v14 = vmul.f32 0.03125, %v3384_v13 }
 0xf99   :  { %v3390_v48 = vsub.f32 %v3378_v6, %v3388_v14 }
 0xf9a   :  { %v3387_v49 = vpop.xlane.xlu0 %3386 }
 0xf9b   :  { %v3389_v15 = vmul.f32 0.03125, %v3387_v49  ;;  %v3392_v16 = vmul.f32 %v3390_v48, %v3390_v48 }
 0xf9d   :  { %v3391_v19 = vsub.f32 %v3379_v11, %v3389_v15  ;;  %v3394_v20 = vsel %vm100_vm1, %v3392_v16, 0.0 }
 0xf9e   :  { %3395 = vadd.xlane.f32.xlu1 %v3394_v20 }
 0xf9f   :  { %v3393_v21 = vmul.f32 %v3391_v19, %v3391_v19 }
 0xfa1   :  { %v3397_v22 = vsel %vm100_vm1, %v3393_v21, 0.0 }
 0xfa2   :  { %3398 = vadd.xlane.f32.xlu0 %v3397_v22 }
0x1027   :  { %v3396_v23 = vpop.xlane.xlu1 %3395 }
0x1028   :  { %v3400_v24 = vmul.f32 0.03125, %v3396_v23 }
0x102a   :  { %v3402_v25 = vadd.f32 1e-05, %v3400_v24 }
0x102b   :  { %v3399_v26 = vpop.xlane.xlu0 %3398 }
0x102c   :  { %3949 = vrsqrt.f32 %v3402_v25  ;;  %v3401_v29 = vmul.f32 0.03125, %v3399_v26 }
0x102e   :  { %v3403_v30 = vadd.f32 1e-05, %v3401_v29 }
0x1030   :  { %3951 = vrsqrt.f32 %v3403_v30 }
0x1039   :  { %v3950_v31 = vpop.eup %3949 }
0x103a   :  { %v3406_v33 = vmul.f32 %v3950_v31, %v3390_v48 }
0x103c   :  { %v3414_v28 = vmul.f32 %v3512_v27, %v3406_v33 }
0x103d   :  { %v3952_v34 = vpop.eup %3951 }
0x103e   :  { %v3422_v35 = vadd.f32 %v3513_v32, %v3414_v28  ;;  %v3407_v36 = vmul.f32 %v3952_v34, %v3391_v19 }
0x1040   :  { %3424 = vst.msk [vmem:[%s4623_s22] sm:$0xff] %vm100_vm1, %v3422_v35  ;;  %v3415_v37 = vmul.f32 %v3512_v27, %v3407_v36 }
0x1042   :  { %v3423_v38 = vadd.f32 %v3513_v32, %v3415_v37 }
0x1044   :  { %3425 = vst.msk [vmem:[%s4623_s22 + $0x8] sm:$0xff] %vm100_vm1, %v3423_v38 }

</bundles_post_ra>
